<compile_context>
chip_gen: v7x
topology: tpu7x:2x2x1
jax: 0.10.0
libtpu: 0.0.40
codegen_flags: <defaults>
</compile_context>

<pallas_src>
import functools

import jax
import jax.numpy as jnp
from jax.experimental import pallas as pl
from jax.experimental.pallas import tpu as pltpu

LN_EPS = 1e-5   # torch.nn.LayerNorm default
BN_EPS = 1e-5   # torch.nn.BatchNorm1d default
LANE = 128


def _layernorm(x, g, b):
    mu = jnp.mean(x, axis=-1, keepdims=True)
    var = jnp.mean((x - mu) ** 2, axis=-1, keepdims=True)
    return (x - mu) * jax.lax.rsqrt(var + LN_EPS) * g + b


def _conv3_bn_relu(x, w_ref, scale, shift):
    """x: (L, Cin) f32; w_ref: (3, Cin, Cout) bf16 ref.  Conv1d(k=3,pad=1)+folded BN+ReLU.

    out[t] = w0 . x[t-1] + w1 . x[t] + w2 . x[t+1]   (zero-padded boundaries).
    """
    xb = x.astype(w_ref.dtype)
    y0 = jnp.dot(xb, w_ref[0], preferred_element_type=jnp.float32)
    y1 = jnp.dot(xb, w_ref[1], preferred_element_type=jnp.float32)
    y2 = jnp.dot(xb, w_ref[2], preferred_element_type=jnp.float32)
    zero = jnp.zeros((1, y1.shape[1]), jnp.float32)
    y = (y1
         + jnp.concatenate([zero, y0[:-1]], axis=0)    # out[t] += w0 . x[t-1]
         + jnp.concatenate([y2[1:], zero], axis=0))    # out[t] += w2 . x[t+1]
    return jnp.maximum(y * scale + shift, 0.0)


# --------------------------------------------------------------------------------------
# The single fused kernel.
# --------------------------------------------------------------------------------------

def fused_forward_kernel(x_ref,
                         c1w_ref, bn1s_ref, bn1h_ref,
                         c2w_ref, bn2s_ref, bn2h_ref,
                         win_ref, bin_ref, cos_ref, sin_ref,
                         wqkv_ref, bqkv_ref, wo_ref, bo_ref,
                         ln1g_ref, ln1b_ref, w1_ref, b1_ref, w2_ref, b2_ref,
                         ln2g_ref, ln2b_ref,
                         wout_ref, bout_ref,
                         o_ref, act_ref, *, num_heads):
    """grid = (B, num_layers).  One batch element per outer ("parallel") step; the layer
    axis is sequential with the (L, H) activation resident in VMEM scratch."""
    l = pl.program_id(1)
    last = pl.num_programs(1) - 1
    L, H = act_ref.shape
    hd = H // num_heads

    # ---- layer-0 prologue: conv stages + input_linear + rotary positional encoding ----
    @pl.when(l == 0)
    def _prologue():
        h = _conv3_bn_relu(x_ref[0], c1w_ref, bn1s_ref[...], bn1h_ref[...])
        h = _conv3_bn_relu(h, c2w_ref, bn2s_ref[...], bn2h_ref[...])
        y = jnp.dot(h.astype(win_ref.dtype), win_ref[...],
                    preferred_element_type=jnp.float32) + bin_ref[...]
        # rotate_half (explicit slice+concat; positions index the batch element — the
        # reference's permute/x.size(1) quirk, reproduced exactly).
        half = H // 2
        y_rot = jnp.concatenate([-y[:, half:], y[:, :half]], axis=-1)
        act_ref[...] = y * cos_ref[0] + y_rot * sin_ref[0]

    # ---- one post-norm TransformerEncoderLayer (layer index == grid axis 1) ----
    xl = act_ref[...]                                                    # (L, H) f32
    qkv = jnp.dot(xl.astype(wqkv_ref.dtype), wqkv_ref[0],
                  preferred_element_type=jnp.float32) + bqkv_ref[0]      # (L, 3H) f32
    # Lane-aligned Q/K/V slices (offsets 0 / H / 2H) + layout-preserving head split.
    # 1/sqrt(hd) is already folded into the Q third of wqkv/bqkv at pack time.
    q = qkv[:, :H].reshape(L, num_heads, hd)
    k = qkv[:, H:2 * H].reshape(L, num_heads, hd)
    v = qkv[:, 2 * H:].reshape(L, num_heads, hd)
    # TODO(synk): flash-style key tiling + online softmax if L grows beyond toy size (the
    # per-head (L, L) f32 score block is what hits v7x's 64 MiB VMEM first).
    s = jnp.einsum('lhd,mhd->hlm', q.astype(jnp.bfloat16), k.astype(jnp.bfloat16),
                   preferred_element_type=jnp.float32)                   # (nh, L, L)
    s = s - jnp.max(s, axis=-1, keepdims=True)
    p = jnp.exp(s)
    p = p / jnp.sum(p, axis=-1, keepdims=True)                           # exact divide (f32)
    attn = jnp.einsum('hlm,mhd->lhd', p.astype(jnp.bfloat16), v.astype(jnp.bfloat16),
                      preferred_element_type=jnp.float32).reshape(L, H)
    attn = jnp.dot(attn.astype(wo_ref.dtype), wo_ref[0],
                   preferred_element_type=jnp.float32) + bo_ref[0]
    h1 = _layernorm(xl + attn, ln1g_ref[0], ln1b_ref[0])

    f = jnp.maximum(jnp.dot(h1.astype(w1_ref.dtype), w1_ref[0],
                            preferred_element_type=jnp.float32) + b1_ref[0], 0.0)
    f = jnp.dot(f.astype(w2_ref.dtype), w2_ref[0],
                preferred_element_type=jnp.float32) + b2_ref[0]
    h2 = _layernorm(h1 + f, ln2g_ref[0], ln2b_ref[0])

    @pl.when(l < last)                       # skip the dead activation store on last layer
    def _carry():
        act_ref[...] = h2

    # ---- final-layer epilogue: lane-padded output_linear (lane-dense stores) ----
    @pl.when(l == last)
    def _epilogue():
        o_ref[0] = jnp.dot(h2.astype(wout_ref.dtype), wout_ref[...],
                           preferred_element_type=jnp.float32) + bout_ref[...]


# --------------------------------------------------------------------------------------
# BlockSpec helpers, packing, and the forward wrapper.
# --------------------------------------------------------------------------------------

def _const_spec(shape):
    nd = len(shape)
    return pl.BlockSpec(tuple(shape), lambda b, l, _n=nd: (0,) * _n)


def _batch_spec(shape):                       # leading dim indexed by the batch grid axis
    nd = len(shape)
    return pl.BlockSpec((1,) + tuple(shape), lambda b, l, _n=nd: (b,) + (0,) * _n)


def _layer_spec(shape):                       # leading dim indexed by the layer grid axis
    nd = len(shape)
    return pl.BlockSpec((1,) + tuple(shape), lambda b, l, _n=nd: (l,) + (0,) * _n)


def _rope_tables(B, H):
    # Reproduces RotaryPositionalEncoding with seq_len = x.size(1) (== batch after permute).
    inv_freq = 1.0 / (10000.0 ** (jnp.arange(0, H, 2, dtype=jnp.float32) / H))
    t = jnp.arange(B, dtype=jnp.float32)
    freqs = t[:, None] * inv_freq[None, :]
    emb = jnp.concatenate([freqs, freqs], axis=-1)          # (B, H)
    return jnp.cos(emb), jnp.sin(emb)


def _rope_tables_for_kernel(B, H):
    cos, sin = _rope_tables(B, H)
    return cos[:, None, :], sin[:, None, :]                 # (B, 1, H) each


def _pack_encoder_params(layers, num_heads):
    """Stack per-layer params along a leading layer axis.  Matmul weights -> bf16, the
    1/sqrt(head_dim) scale folded into the Q third; biases / LN params stay f32."""
    H = layers[0]['wqkv'].shape[0]
    hd = H // num_heads
    q_scale = jnp.concatenate([jnp.full((H,), 1.0 / (hd ** 0.5), jnp.float32),
                               jnp.ones((2 * H,), jnp.float32)])

    def stack(name):
        return jnp.stack([lp[name] for lp in layers], axis=0)

    packed = {name: stack(name) for name in
              ('bo', 'ln1_g', 'ln1_b', 'b1', 'b2', 'ln2_g', 'ln2_b')}
    packed['wqkv'] = (stack('wqkv') * q_scale).astype(jnp.bfloat16)
    packed['bqkv'] = stack('bqkv') * q_scale
    packed['wo'] = stack('wo').astype(jnp.bfloat16)
    packed['w1'] = stack('w1').astype(jnp.bfloat16)
    packed['w2'] = stack('w2').astype(jnp.bfloat16)
    return packed


def _derived_vmem_limit(L, Cin, H, ff, n_pad, num_layers):
    """Rough footprint (double-buffered bf16 layer weights + resident consts + scratch +
    live intermediates) with 2x headroom, floored at 4 MiB — never claim the whole chip."""
    bf16, f32 = 2, 4
    per_layer = bf16 * (4 * H * H + 2 * H * ff) + f32 * (9 * H + ff)
    consts = bf16 * (3 * Cin * H + 3 * H * H + H * H + H * n_pad) + f32 * (9 * H + n_pad)
    blocks = f32 * 2 * (L * Cin + L * n_pad + 2 * H)       # double-buffered x / out / cos / sin
    scratch = f32 * L * H
    live = f32 * L * (3 * H + ff + 6 * H)                  # loose bound on live temporaries
    need = 2 * per_layer + consts + blocks + scratch + live
    return int(min(max(2 * need, 4 << 20), 32 << 20))


def transformer_model_forward(params, x, num_heads):
    """x: (B, L, input_size) -> (B, L, output_size).  Mirrors TransformerModel.forward (eval)."""
    B, L, Cin = x.shape
    H = params['in_lin_w'].shape[0]
    ff = params['layers'][0]['w1'].shape[1]
    num_layers = len(params['layers'])
    out_size = params['out_lin_w'].shape[1]
    n_pad = ((out_size + LANE - 1) // LANE) * LANE          # lane-dense padded output width

    bf = jnp.bfloat16
    packed = _pack_encoder_params(params['layers'], num_heads)
    cos, sin = _rope_tables_for_kernel(B, H)

    wout = jnp.zeros((H, n_pad), jnp.float32).at[:, :out_size].set(
        params['out_lin_w']).astype(bf)
    bout = jnp.zeros((1, n_pad), jnp.float32).at[:, :out_size].set(params['out_lin_b'])

    in_specs = [
        _batch_spec((L, Cin)),                               # x
        _const_spec((3, Cin, H)),                            # conv1 weight
        _const_spec((1, H)), _const_spec((1, H)),            # bn1 scale / shift
        _const_spec((3, H, H)),                              # conv2 weight
        _const_spec((1, H)), _const_spec((1, H)),            # bn2 scale / shift
        _const_spec((H, H)), _const_spec((1, H)),            # input_linear W / b
        _batch_spec((1, H)), _batch_spec((1, H)),            # RoPE cos / sin (per batch index)
        _layer_spec((H, 3 * H)), _layer_spec((1, 3 * H)),    # W_qkv / b_qkv
        _layer_spec((H, H)), _layer_spec((1, H)),            # W_o / b_o
        _layer_spec((1, H)), _layer_spec((1, H)),            # LN1 gamma / beta
        _layer_spec((H, ff)), _layer_spec((1, ff)),          # FFN W1 / b1
        _layer_spec((ff, H)), _layer_spec((1, H)),           # FFN W2 / b2
        _layer_spec((1, H)), _layer_spec((1, H)),            # LN2 gamma / beta
        _const_spec((H, n_pad)), _const_spec((1, n_pad)),    # output_linear W / b (padded)
    ]

    flops = 2 * B * (L * (3 * Cin * H + 3 * H * H + H * H + H * n_pad)
                     + num_layers * L * (4 * H * H + 2 * L * H + 2 * H * ff))
    transcendentals = B * num_layers * (num_heads * L * L + 4 * L)
    weight_bytes = 2 * (3 * Cin * H + 3 * H * H + H * H + H * n_pad
                        + num_layers * (4 * H * H + 2 * H * ff))
    bytes_accessed = 4 * B * L * (Cin + n_pad) + B * weight_bytes

    out = pl.pallas_call(
        functools.partial(fused_forward_kernel, num_heads=num_heads),
        out_shape=jax.ShapeDtypeStruct((B, L, n_pad), jnp.float32),
        grid_spec=pltpu.PrefetchScalarGridSpec(
            num_scalar_prefetch=0,
            grid=(B, num_layers),            # batch parallel (v7x megacore), layers sequential
            in_specs=in_specs,
            out_specs=_batch_spec((L, n_pad)),
            scratch_shapes=[pltpu.VMEM((L, H), jnp.float32)],
        ),
        compiler_params=pltpu.CompilerParams(
            dimension_semantics=("parallel", "arbitrary"),
            vmem_limit_bytes=_derived_vmem_limit(L, Cin, H, ff, n_pad, num_layers),
        ),
        cost_estimate=pl.CostEstimate(flops=flops, transcendentals=transcendentals,
                                      bytes_accessed=bytes_accessed),
    )(x,
      params['conv1_w'].astype(bf), params['bn1_scale'], params['bn1_shift'],
      params['conv2_w'].astype(bf), params['bn2_scale'], params['bn2_shift'],
      params['in_lin_w'].astype(bf), params['in_lin_b'], cos, sin,
      packed['wqkv'], packed['bqkv'], packed['wo'], packed['bo'],
      packed['ln1_g'], packed['ln1_b'], packed['w1'], packed['b1'],
      packed['w2'], packed['b2'], packed['ln2_g'], packed['ln2_b'],
      wout, bout)
    return out[:, :, :out_size]


# --------------------------------------------------------------------------------------
# Pure-JAX f32 reference (PyTorch's (L, B, H) layout) and parameter initialization.
# --------------------------------------------------------------------------------------

def reference_forward(params, x, num_heads):
    B, L, _ = x.shape

    def conv_bn_relu_ref(h, w, scale, shift):
        hp = jnp.pad(h, ((0, 0), (1, 1), (0, 0)))
        Lh = h.shape[1]
        acc = sum(jnp.einsum('blc,cd->bld', hp[:, k:k + Lh, :], w[k]) for k in range(3))
        return jnp.maximum(acc * scale + shift, 0.0)

    h = conv_bn_relu_ref(x, params['conv1_w'], params['bn1_scale'], params['bn1_shift'])
    h = conv_bn_relu_ref(h, params['conv2_w'], params['bn2_scale'], params['bn2_shift'])
    h = jnp.transpose(h, (1, 0, 2))                     # (L, B, H)
    H = h.shape[-1]
    hd = H // num_heads
    h = h @ params['in_lin_w'] + params['in_lin_b']
    cos, sin = _rope_tables(B, H)
    half = H // 2
    h_rot = jnp.concatenate([-h[..., half:], h[..., :half]], axis=-1)
    h = h * cos + h_rot * sin
    for lp in params['layers']:
        qkv = h @ lp['wqkv'] + lp['bqkv']
        q, k, v = jnp.split(qkv, 3, axis=-1)
        qh = q.reshape(L, B, num_heads, hd)
        kh = k.reshape(L, B, num_heads, hd)
        vh = v.reshape(L, B, num_heads, hd)
        scores = jnp.einsum('lbnd,mbnd->bnlm', qh, kh) / (hd ** 0.5)
        probs = jax.nn.softmax(scores, axis=-1)
        att = jnp.einsum('bnlm,mbnd->lbnd', probs, vh).reshape(L, B, H)
        att = att @ lp['wo'] + lp['bo']
        h = _layernorm(h + att, lp['ln1_g'], lp['ln1_b'])
        f = jnp.maximum(h @ lp['w1'] + lp['b1'], 0.0) @ lp['w2'] + lp['b2']
        h = _layernorm(h + f, lp['ln2_g'], lp['ln2_b'])
    h = jnp.transpose(h, (1, 0, 2))
    return h @ params['out_lin_w'] + params['out_lin_b']


def init_params(key, input_size, hidden_dim, num_heads, num_layers, output_size):
    keys = iter(jax.random.split(key, 64))

    def w(shape, s=0.05):
        return jax.random.normal(next(keys), shape, dtype=jnp.float32) * s

    p = {}

    def conv_block(cin, cout):
        cw = w((3, cin, cout))                       # (k, Cin, Cout); PyTorch is (Cout, Cin, k)
        cb = w((cout,))
        gamma = 1.0 + w((cout,))
        beta = w((cout,))
        rmean = w((cout,))
        rvar = 1.0 + jnp.abs(w((cout,)))
        scale = gamma / jnp.sqrt(rvar + BN_EPS)
        shift = (cb - rmean) * scale + beta
        return cw, scale.reshape(1, -1), shift.reshape(1, -1)

    p['conv1_w'], p['bn1_scale'], p['bn1_shift'] = conv_block(input_size, hidden_dim)
    p['conv2_w'], p['bn2_scale'], p['bn2_shift'] = conv_block(hidden_dim, hidden_dim)

    p['in_lin_w'] = w((hidden_dim, hidden_dim))
    p['in_lin_b'] = w((hidden_dim,)).reshape(1, -1)

    ff = hidden_dim * 2
    layers = []
    for _ in range(num_layers):
        layers.append({
            'wqkv': w((hidden_dim, 3 * hidden_dim)),
            'bqkv': w((3 * hidden_dim,)).reshape(1, -1),
            'wo': w((hidden_dim, hidden_dim)),
            'bo': w((hidden_dim,)).reshape(1, -1),
            'ln1_g': (1.0 + w((hidden_dim,))).reshape(1, -1),
            'ln1_b': w((hidden_dim,)).reshape(1, -1),
            'w1': w((hidden_dim, ff)),
            'b1': w((ff,)).reshape(1, -1),
            'w2': w((ff, hidden_dim)),
            'b2': w((hidden_dim,)).reshape(1, -1),
            'ln2_g': (1.0 + w((hidden_dim,))).reshape(1, -1),
            'ln2_b': w((hidden_dim,)).reshape(1, -1),
        })
    p['layers'] = layers

    p['out_lin_w'] = w((hidden_dim, output_size))
    p['out_lin_b'] = w((output_size,)).reshape(1, -1)
    return p


# --------------------------------------------------------------------------------------

if __name__ == "__main__":
    # Small shapes consistent with the module; hidden_dim kept at the spec's 128 so the
    # main activation/matmul lane dimension is exactly lane-dense.
    B, L = 2, 16
    input_size, hidden_dim, num_heads, num_layers, output_size = 32, 128, 2, 2, 32

    key = jax.random.PRNGKey(0)
    kx, kp = jax.random.split(key)
    params = init_params(kp, input_size, hidden_dim, num_heads, num_layers, output_size)
    x = jax.random.normal(kx, (B, L, input_size), dtype=jnp.float32)

    fwd = jax.jit(functools.partial(transformer_model_forward, num_heads=num_heads))
    out = jax.block_until_ready(fwd(params, x))
    assert out.shape == (B, L, output_size), out.shape

    ref = reference_forward(params, x, num_heads)
    max_err = float(jnp.max(jnp.abs(out - ref)))
    # Tolerance covers bf16 matmul inputs (f32 accumulation) vs. the pure-f32 reference.
    assert max_err < 1e-1, f"mismatch vs pure-JAX reference, max abs err = {max_err}"

    print("KERNEL_OK")
</pallas_src>

<mosaic_0001>
module attributes {stable_mosaic.version = 11 : i64} {
  func.func @fused_forward_kernel(%arg0: i32, %arg1: i32, %arg2: memref<1x16x32xf32, #tpu.memory_space<vmem>>, %arg3: memref<3x32x128xbf16, #tpu.memory_space<vmem>>, %arg4: memref<1x128xf32, #tpu.memory_space<vmem>>, %arg5: memref<1x128xf32, #tpu.memory_space<vmem>>, %arg6: memref<3x128x128xbf16, #tpu.memory_space<vmem>>, %arg7: memref<1x128xf32, #tpu.memory_space<vmem>>, %arg8: memref<1x128xf32, #tpu.memory_space<vmem>>, %arg9: memref<128x128xbf16, #tpu.memory_space<vmem>>, %arg10: memref<1x128xf32, #tpu.memory_space<vmem>>, %arg11: memref<1x1x128xf32, #tpu.memory_space<vmem>>, %arg12: memref<1x1x128xf32, #tpu.memory_space<vmem>>, %arg13: memref<1x128x384xbf16, #tpu.memory_space<vmem>>, %arg14: memref<1x1x384xf32, #tpu.memory_space<vmem>>, %arg15: memref<1x128x128xbf16, #tpu.memory_space<vmem>>, %arg16: memref<1x1x128xf32, #tpu.memory_space<vmem>>, %arg17: memref<1x1x128xf32, #tpu.memory_space<vmem>>, %arg18: memref<1x1x128xf32, #tpu.memory_space<vmem>>, %arg19: memref<1x128x256xbf16, #tpu.memory_space<vmem>>, %arg20: memref<1x1x256xf32, #tpu.memory_space<vmem>>, %arg21: memref<1x256x128xbf16, #tpu.memory_space<vmem>>, %arg22: memref<1x1x128xf32, #tpu.memory_space<vmem>>, %arg23: memref<1x1x128xf32, #tpu.memory_space<vmem>>, %arg24: memref<1x1x128xf32, #tpu.memory_space<vmem>>, %arg25: memref<128x128xbf16, #tpu.memory_space<vmem>>, %arg26: memref<1x128xf32, #tpu.memory_space<vmem>>, %arg27: memref<1x16x128xf32, #tpu.memory_space<vmem>>, %arg28: memref<16x128xf32, #tpu.memory_space<vmem>>) attributes {dimension_semantics = [#tpu.dimension_semantics<parallel>, #tpu.dimension_semantics<arbitrary>], iteration_bounds = array<i64: 2, 2>, scalar_prefetch = 0 : i64, scratch_operands = 1 : i64, tpu.core_type = #tpu.core_type<tc>, window_params = [{transform_indices = @transform_0, window_bounds = array<i64: 1, 16, 32>}, {pipeline_mode = #tpu.pipeline_mode<synchronous>, transform_indices = @transform_1, window_bounds = array<i64: 3, 32, 128>}, {pipeline_mode = #tpu.pipeline_mode<synchronous>, transform_indices = @transform_2, window_bounds = array<i64: 1, 128>}, {pipeline_mode = #tpu.pipeline_mode<synchronous>, transform_indices = @transform_3, window_bounds = array<i64: 1, 128>}, {pipeline_mode = #tpu.pipeline_mode<synchronous>, transform_indices = @transform_4, window_bounds = array<i64: 3, 128, 128>}, {pipeline_mode = #tpu.pipeline_mode<synchronous>, transform_indices = @transform_5, window_bounds = array<i64: 1, 128>}, {pipeline_mode = #tpu.pipeline_mode<synchronous>, transform_indices = @transform_6, window_bounds = array<i64: 1, 128>}, {pipeline_mode = #tpu.pipeline_mode<synchronous>, transform_indices = @transform_7, window_bounds = array<i64: 128, 128>}, {pipeline_mode = #tpu.pipeline_mode<synchronous>, transform_indices = @transform_8, window_bounds = array<i64: 1, 128>}, {transform_indices = @transform_9, window_bounds = array<i64: 1, 1, 128>}, {transform_indices = @transform_10, window_bounds = array<i64: 1, 1, 128>}, {transform_indices = @transform_11, window_bounds = array<i64: 1, 128, 384>}, {transform_indices = @transform_12, window_bounds = array<i64: 1, 1, 384>}, {transform_indices = @transform_13, window_bounds = array<i64: 1, 128, 128>}, {transform_indices = @transform_14, window_bounds = array<i64: 1, 1, 128>}, {transform_indices = @transform_15, window_bounds = array<i64: 1, 1, 128>}, {transform_indices = @transform_16, window_bounds = array<i64: 1, 1, 128>}, {transform_indices = @transform_17, window_bounds = array<i64: 1, 128, 256>}, {transform_indices = @transform_18, window_bounds = array<i64: 1, 1, 256>}, {transform_indices = @transform_19, window_bounds = array<i64: 1, 256, 128>}, {transform_indices = @transform_20, window_bounds = array<i64: 1, 1, 128>}, {transform_indices = @transform_21, window_bounds = array<i64: 1, 1, 128>}, {transform_indices = @transform_22, window_bounds = array<i64: 1, 1, 128>}, {pipeline_mode = #tpu.pipeline_mode<synchronous>, transform_indices = @transform_23, window_bounds = array<i64: 128, 128>}, {pipeline_mode = #tpu.pipeline_mode<synchronous>, transform_indices = @transform_24, window_bounds = array<i64: 1, 128>}, {transform_indices = @transform_25, window_bounds = array<i64: 1, 16, 128>}]} {
    %c0_i32 = arith.constant 0 : i32
    %0 = arith.cmpi eq, %arg1, %c0_i32 : i32
    %1 = arith.extui %0 : i1 to i32
    %c0_i32_0 = arith.constant 0 : i32
    %2 = arith.cmpi ne, %1, %c0_i32_0 : i32
    scf.if %2 {
      %c0_59 = arith.constant 0 : index
      %c0_60 = arith.constant 0 : index
      %c0_61 = arith.constant 0 : index
      %121 = vector.load %arg2[%c0_59, %c0_60, %c0_61] : memref<1x16x32xf32, #tpu.memory_space<vmem>>, vector<1x16x32xf32>
      %122 = vector.shape_cast %121 : vector<1x16x32xf32> to vector<16x32xf32>
      %c0_62 = arith.constant 0 : index
      %c0_63 = arith.constant 0 : index
      %123 = vector.load %arg4[%c0_62, %c0_63] : memref<1x128xf32, #tpu.memory_space<vmem>>, vector<1x128xf32>
      %c0_64 = arith.constant 0 : index
      %c0_65 = arith.constant 0 : index
      %124 = vector.load %arg5[%c0_64, %c0_65] : memref<1x128xf32, #tpu.memory_space<vmem>>, vector<1x128xf32>
      %125 = arith.truncf %122 : vector<16x32xf32> to vector<16x32xbf16>
      %c0_66 = arith.constant 0 : index
      %c0_67 = arith.constant 0 : index
      %c0_68 = arith.constant 0 : index
      %126 = vector.load %arg3[%c0_66, %c0_67, %c0_68] : memref<3x32x128xbf16, #tpu.memory_space<vmem>>, vector<1x32x128xbf16>
      %127 = vector.shape_cast %126 : vector<1x32x128xbf16> to vector<32x128xbf16>
      %cst_69 = arith.constant dense<0.000000e+00> : vector<16x128xf32>
      %128 = tpu.matmul %125, %127, %cst_69 {dimension_numbers = #tpu.dot_dimension_numbers<[1], [0], [0], [1], [0, 0, 1, 1], [], []>} : vector<16x32xbf16>, vector<32x128xbf16>, vector<16x128xf32> -> vector<16x128xf32>
      %c1 = arith.constant 1 : index
      %c0_70 = arith.constant 0 : index
      %c0_71 = arith.constant 0 : index
      %129 = vector.load %arg3[%c1, %c0_70, %c0_71] : memref<3x32x128xbf16, #tpu.memory_space<vmem>>, vector<1x32x128xbf16>
      %130 = vector.shape_cast %129 : vector<1x32x128xbf16> to vector<32x128xbf16>
      %cst_72 = arith.constant dense<0.000000e+00> : vector<16x128xf32>
      %131 = tpu.matmul %125, %130, %cst_72 {dimension_numbers = #tpu.dot_dimension_numbers<[1], [0], [0], [1], [0, 0, 1, 1], [], []>} : vector<16x32xbf16>, vector<32x128xbf16>, vector<16x128xf32> -> vector<16x128xf32>
      %c2 = arith.constant 2 : index
      %c0_73 = arith.constant 0 : index
      %c0_74 = arith.constant 0 : index
      %132 = vector.load %arg3[%c2, %c0_73, %c0_74] : memref<3x32x128xbf16, #tpu.memory_space<vmem>>, vector<1x32x128xbf16>
      %133 = vector.shape_cast %132 : vector<1x32x128xbf16> to vector<32x128xbf16>
      %cst_75 = arith.constant dense<0.000000e+00> : vector<16x128xf32>
      %134 = tpu.matmul %125, %133, %cst_75 {dimension_numbers = #tpu.dot_dimension_numbers<[1], [0], [0], [1], [0, 0, 1, 1], [], []>} : vector<16x32xbf16>, vector<32x128xbf16>, vector<16x128xf32> -> vector<16x128xf32>
      %cst_76 = arith.constant 0.000000e+00 : f32
      %135 = vector.broadcast %cst_76 : f32 to vector<1x128xf32>
      %136 = vector.extract_strided_slice %128 {offsets = [0, 0], sizes = [15, 128], strides = [1, 1]} : vector<16x128xf32> to vector<15x128xf32>
      %137 = tpu.concatenate %135, %136 in 0 : vector<1x128xf32>, vector<15x128xf32> -> vector<16x128xf32>
      %138 = arith.addf %131, %137 : vector<16x128xf32>
      %139 = vector.extract_strided_slice %134 {offsets = [1, 0], sizes = [15, 128], strides = [1, 1]} : vector<16x128xf32> to vector<15x128xf32>
      %140 = tpu.concatenate %139, %135 in 0 : vector<15x128xf32>, vector<1x128xf32> -> vector<16x128xf32>
      %141 = arith.addf %138, %140 : vector<16x128xf32>
      %142 = vector.broadcast %123 : vector<1x128xf32> to vector<16x128xf32>
      %143 = arith.mulf %141, %142 : vector<16x128xf32>
      %144 = vector.broadcast %124 : vector<1x128xf32> to vector<16x128xf32>
      %145 = arith.addf %143, %144 : vector<16x128xf32>
      %cst_77 = arith.constant 0.000000e+00 : f32
      %146 = vector.broadcast %cst_77 : f32 to vector<16x128xf32>
      %147 = arith.maximumf %145, %146 : vector<16x128xf32>
      %c0_78 = arith.constant 0 : index
      %c0_79 = arith.constant 0 : index
      %148 = vector.load %arg7[%c0_78, %c0_79] : memref<1x128xf32, #tpu.memory_space<vmem>>, vector<1x128xf32>
      %c0_80 = arith.constant 0 : index
      %c0_81 = arith.constant 0 : index
      %149 = vector.load %arg8[%c0_80, %c0_81] : memref<1x128xf32, #tpu.memory_space<vmem>>, vector<1x128xf32>
      %150 = arith.truncf %147 : vector<16x128xf32> to vector<16x128xbf16>
      %c0_82 = arith.constant 0 : index
      %c0_83 = arith.constant 0 : index
      %c0_84 = arith.constant 0 : index
      %151 = vector.load %arg6[%c0_82, %c0_83, %c0_84] : memref<3x128x128xbf16, #tpu.memory_space<vmem>>, vector<1x128x128xbf16>
      %152 = vector.shape_cast %151 : vector<1x128x128xbf16> to vector<128x128xbf16>
      %cst_85 = arith.constant dense<0.000000e+00> : vector<16x128xf32>
      %153 = tpu.matmul %150, %152, %cst_85 {dimension_numbers = #tpu.dot_dimension_numbers<[1], [0], [0], [1], [0, 0, 1, 1], [], []>} : vector<16x128xbf16>, vector<128x128xbf16>, vector<16x128xf32> -> vector<16x128xf32>
      %c1_86 = arith.constant 1 : index
      %c0_87 = arith.constant 0 : index
      %c0_88 = arith.constant 0 : index
      %154 = vector.load %arg6[%c1_86, %c0_87, %c0_88] : memref<3x128x128xbf16, #tpu.memory_space<vmem>>, vector<1x128x128xbf16>
      %155 = vector.shape_cast %154 : vector<1x128x128xbf16> to vector<128x128xbf16>
      %cst_89 = arith.constant dense<0.000000e+00> : vector<16x128xf32>
      %156 = tpu.matmul %150, %155, %cst_89 {dimension_numbers = #tpu.dot_dimension_numbers<[1], [0], [0], [1], [0, 0, 1, 1], [], []>} : vector<16x128xbf16>, vector<128x128xbf16>, vector<16x128xf32> -> vector<16x128xf32>
      %c2_90 = arith.constant 2 : index
      %c0_91 = arith.constant 0 : index
      %c0_92 = arith.constant 0 : index
      %157 = vector.load %arg6[%c2_90, %c0_91, %c0_92] : memref<3x128x128xbf16, #tpu.memory_space<vmem>>, vector<1x128x128xbf16>
      %158 = vector.shape_cast %157 : vector<1x128x128xbf16> to vector<128x128xbf16>
      %cst_93 = arith.constant dense<0.000000e+00> : vector<16x128xf32>
      %159 = tpu.matmul %150, %158, %cst_93 {dimension_numbers = #tpu.dot_dimension_numbers<[1], [0], [0], [1], [0, 0, 1, 1], [], []>} : vector<16x128xbf16>, vector<128x128xbf16>, vector<16x128xf32> -> vector<16x128xf32>
      %cst_94 = arith.constant 0.000000e+00 : f32
      %160 = vector.broadcast %cst_94 : f32 to vector<1x128xf32>
      %161 = vector.extract_strided_slice %153 {offsets = [0, 0], sizes = [15, 128], strides = [1, 1]} : vector<16x128xf32> to vector<15x128xf32>
      %162 = tpu.concatenate %160, %161 in 0 : vector<1x128xf32>, vector<15x128xf32> -> vector<16x128xf32>
      %163 = arith.addf %156, %162 : vector<16x128xf32>
      %164 = vector.extract_strided_slice %159 {offsets = [1, 0], sizes = [15, 128], strides = [1, 1]} : vector<16x128xf32> to vector<15x128xf32>
      %165 = tpu.concatenate %164, %160 in 0 : vector<15x128xf32>, vector<1x128xf32> -> vector<16x128xf32>
      %166 = arith.addf %163, %165 : vector<16x128xf32>
      %167 = vector.broadcast %148 : vector<1x128xf32> to vector<16x128xf32>
      %168 = arith.mulf %166, %167 : vector<16x128xf32>
      %169 = vector.broadcast %149 : vector<1x128xf32> to vector<16x128xf32>
      %170 = arith.addf %168, %169 : vector<16x128xf32>
      %cst_95 = arith.constant 0.000000e+00 : f32
      %171 = vector.broadcast %cst_95 : f32 to vector<16x128xf32>
      %172 = arith.maximumf %170, %171 : vector<16x128xf32>
      %173 = arith.truncf %172 : vector<16x128xf32> to vector<16x128xbf16>
      %c0_96 = arith.constant 0 : index
      %c0_97 = arith.constant 0 : index
      %174 = vector.load %arg9[%c0_96, %c0_97] : memref<128x128xbf16, #tpu.memory_space<vmem>>, vector<128x128xbf16>
      %cst_98 = arith.constant dense<0.000000e+00> : vector<16x128xf32>
      %175 = tpu.matmul %173, %174, %cst_98 {dimension_numbers = #tpu.dot_dimension_numbers<[1], [0], [0], [1], [0, 0, 1, 1], [], []>} : vector<16x128xbf16>, vector<128x128xbf16>, vector<16x128xf32> -> vector<16x128xf32>
      %c0_99 = arith.constant 0 : index
      %c0_100 = arith.constant 0 : index
      %176 = vector.load %arg10[%c0_99, %c0_100] : memref<1x128xf32, #tpu.memory_space<vmem>>, vector<1x128xf32>
      %177 = vector.broadcast %176 : vector<1x128xf32> to vector<16x128xf32>
      %178 = arith.addf %175, %177 : vector<16x128xf32>
      %179 = vector.extract_strided_slice %178 {offsets = [0, 64], sizes = [16, 64], strides = [1, 1]} : vector<16x128xf32> to vector<16x64xf32>
      %cst_101 = arith.constant 0.000000e+00 : f32
      %180 = vector.broadcast %cst_101 : f32 to vector<16x64xf32>
      %181 = arith.subf %180, %179 : vector<16x64xf32>
      %182 = vector.extract_strided_slice %178 {offsets = [0, 0], sizes = [16, 64], strides = [1, 1]} : vector<16x128xf32> to vector<16x64xf32>
      %183 = tpu.concatenate %181, %182 in 1 : vector<16x64xf32>, vector<16x64xf32> -> vector<16x128xf32>
      %c0_102 = arith.constant 0 : index
      %c0_103 = arith.constant 0 : index
      %c0_104 = arith.constant 0 : index
      %184 = vector.load %arg11[%c0_102, %c0_103, %c0_104] : memref<1x1x128xf32, #tpu.memory_space<vmem>>, vector<1x1x128xf32>
      %185 = vector.shape_cast %184 : vector<1x1x128xf32> to vector<1x128xf32>
      %186 = vector.broadcast %185 : vector<1x128xf32> to vector<16x128xf32>
      %187 = arith.mulf %178, %186 : vector<16x128xf32>
      %c0_105 = arith.constant 0 : index
      %c0_106 = arith.constant 0 : index
      %c0_107 = arith.constant 0 : index
      %188 = vector.load %arg12[%c0_105, %c0_106, %c0_107] : memref<1x1x128xf32, #tpu.memory_space<vmem>>, vector<1x1x128xf32>
      %189 = vector.shape_cast %188 : vector<1x1x128xf32> to vector<1x128xf32>
      %190 = vector.broadcast %189 : vector<1x128xf32> to vector<16x128xf32>
      %191 = arith.mulf %183, %190 : vector<16x128xf32>
      %192 = arith.addf %187, %191 : vector<16x128xf32>
      %c0_108 = arith.constant 0 : index
      %c0_109 = arith.constant 0 : index
      %193 = vector.load %arg28[%c0_108, %c0_109] : memref<16x128xf32, #tpu.memory_space<vmem>>, vector<16x128xf32>
      tpu.vector_store %arg28[%c0_108, %c0_109], %192 {strides = array<i32>} : memref<16x128xf32, #tpu.memory_space<vmem>>, vector<16x128xf32>,
    } else {
    }
    %c0 = arith.constant 0 : index
    %c0_1 = arith.constant 0 : index
    %3 = vector.load %arg28[%c0, %c0_1] : memref<16x128xf32, #tpu.memory_space<vmem>>, vector<16x128xf32>
    %4 = arith.truncf %3 : vector<16x128xf32> to vector<16x128xbf16>
    %c0_2 = arith.constant 0 : index
    %c0_3 = arith.constant 0 : index
    %c0_4 = arith.constant 0 : index
    %5 = vector.load %arg13[%c0_2, %c0_3, %c0_4] : memref<1x128x384xbf16, #tpu.memory_space<vmem>>, vector<1x128x384xbf16>
    %6 = vector.shape_cast %5 : vector<1x128x384xbf16> to vector<128x384xbf16>
    %cst = arith.constant dense<0.000000e+00> : vector<16x384xf32>
    %7 = tpu.matmul %4, %6, %cst {dimension_numbers = #tpu.dot_dimension_numbers<[1], [0], [0], [1], [0, 0, 1, 1], [], []>} : vector<16x128xbf16>, vector<128x384xbf16>, vector<16x384xf32> -> vector<16x384xf32>
    %c0_5 = arith.constant 0 : index
    %c0_6 = arith.constant 0 : index
    %c0_7 = arith.constant 0 : index
    %8 = vector.load %arg14[%c0_5, %c0_6, %c0_7] : memref<1x1x384xf32, #tpu.memory_space<vmem>>, vector<1x1x384xf32>
    %9 = vector.shape_cast %8 : vector<1x1x384xf32> to vector<1x384xf32>
    %10 = vector.broadcast %9 : vector<1x384xf32> to vector<16x384xf32>
    %11 = arith.addf %7, %10 : vector<16x384xf32>
    %12 = vector.extract_strided_slice %11 {offsets = [0, 0], sizes = [16, 128], strides = [1, 1]} : vector<16x384xf32> to vector<16x128xf32>
    %13 = vector.shape_cast %12 : vector<16x128xf32> to vector<16x2x64xf32>
    %14 = vector.extract_strided_slice %11 {offsets = [0, 128], sizes = [16, 128], strides = [1, 1]} : vector<16x384xf32> to vector<16x128xf32>
    %15 = vector.shape_cast %14 : vector<16x128xf32> to vector<16x2x64xf32>
    %16 = vector.extract_strided_slice %11 {offsets = [0, 256], sizes = [16, 128], strides = [1, 1]} : vector<16x384xf32> to vector<16x128xf32>
    %17 = vector.shape_cast %16 : vector<16x128xf32> to vector<16x2x64xf32>
    %18 = arith.truncf %13 : vector<16x2x64xf32> to vector<16x2x64xbf16>
    %19 = arith.truncf %15 : vector<16x2x64xf32> to vector<16x2x64xbf16>
    "tpu.trace_start"() <{level = 10 : i32, message = "lhd,mhd->hlm"}> : () -> ()
    %cst_8 = arith.constant dense<0.000000e+00> : vector<2x16x16xf32>
    %20 = tpu.matmul %18, %19, %cst_8 {dimension_numbers = #tpu.dot_dimension_numbers<[2], [2], [0], [0], [0, 1, 0, 0, 1, 0], [1], [1]>} : vector<16x2x64xbf16>, vector<16x2x64xbf16>, vector<2x16x16xf32> -> vector<2x16x16xf32>
    "tpu.trace_stop"() : () -> ()
    %cst_9 = arith.constant dense<0xFF800000> : vector<2x16xf32>
    %21 = vector.multi_reduction <maximumf>, %20, %cst_9 [2] : vector<2x16x16xf32> to vector<2x16xf32>
    %22 = vector.shape_cast %21 : vector<2x16xf32> to vector<2x16x1xf32>
    %23 = vector.broadcast %22 : vector<2x16x1xf32> to vector<2x16x16xf32>
    %24 = arith.subf %20, %23 : vector<2x16x16xf32>
    %25 = math.exp %24 : vector<2x16x16xf32>
    %cst_10 = arith.constant dense<0.000000e+00> : vector<2x16xf32>
    %26 = vector.multi_reduction <add>, %25, %cst_10 [2] : vector<2x16x16xf32> to vector<2x16xf32>
    %27 = vector.shape_cast %26 : vector<2x16xf32> to vector<2x16x1xf32>
    %28 = vector.broadcast %27 : vector<2x16x1xf32> to vector<2x16x16xf32>
    %29 = arith.divf %25, %28 : vector<2x16x16xf32>
    %30 = arith.truncf %29 : vector<2x16x16xf32> to vector<2x16x16xbf16>
    %31 = arith.truncf %17 : vector<16x2x64xf32> to vector<16x2x64xbf16>
    "tpu.trace_start"() <{level = 10 : i32, message = "hlm,mhd->lhd"}> : () -> ()
    %cst_11 = arith.constant dense<0.000000e+00> : vector<2x64x16xf32>
    %32 = tpu.matmul %31, %30, %cst_11 {dimension_numbers = #tpu.dot_dimension_numbers<[0], [2], [2], [1], [0, 1, 0, 2, 1, 1], [1], [0]>} : vector<16x2x64xbf16>, vector<2x16x16xbf16>, vector<2x64x16xf32> -> vector<2x64x16xf32>
    %33 = tpu.transpose %32, [2, 0, 1] : vector<2x64x16xf32> -> vector<16x2x64xf32>
    "tpu.trace_stop"() : () -> ()
    %34 = vector.shape_cast %33 : vector<16x2x64xf32> to vector<16x128xf32>
    %35 = arith.truncf %34 : vector<16x128xf32> to vector<16x128xbf16>
    %c0_12 = arith.constant 0 : index
    %c0_13 = arith.constant 0 : index
    %c0_14 = arith.constant 0 : index
    %36 = vector.load %arg15[%c0_12, %c0_13, %c0_14] : memref<1x128x128xbf16, #tpu.memory_space<vmem>>, vector<1x128x128xbf16>
    %37 = vector.shape_cast %36 : vector<1x128x128xbf16> to vector<128x128xbf16>
    %cst_15 = arith.constant dense<0.000000e+00> : vector<16x128xf32>
    %38 = tpu.matmul %35, %37, %cst_15 {dimension_numbers = #tpu.dot_dimension_numbers<[1], [0], [0], [1], [0, 0, 1, 1], [], []>} : vector<16x128xbf16>, vector<128x128xbf16>, vector<16x128xf32> -> vector<16x128xf32>
    %c0_16 = arith.constant 0 : index
    %c0_17 = arith.constant 0 : index
    %c0_18 = arith.constant 0 : index
    %39 = vector.load %arg16[%c0_16, %c0_17, %c0_18] : memref<1x1x128xf32, #tpu.memory_space<vmem>>, vector<1x1x128xf32>
    %40 = vector.shape_cast %39 : vector<1x1x128xf32> to vector<1x128xf32>
    %41 = vector.broadcast %40 : vector<1x128xf32> to vector<16x128xf32>
    %42 = arith.addf %38, %41 : vector<16x128xf32>
    %43 = arith.addf %3, %42 : vector<16x128xf32>
    %c0_19 = arith.constant 0 : index
    %c0_20 = arith.constant 0 : index
    %c0_21 = arith.constant 0 : index
    %44 = vector.load %arg17[%c0_19, %c0_20, %c0_21] : memref<1x1x128xf32, #tpu.memory_space<vmem>>, vector<1x1x128xf32>
    %45 = vector.shape_cast %44 : vector<1x1x128xf32> to vector<1x128xf32>
    %c0_22 = arith.constant 0 : index
    %c0_23 = arith.constant 0 : index
    %c0_24 = arith.constant 0 : index
    %46 = vector.load %arg18[%c0_22, %c0_23, %c0_24] : memref<1x1x128xf32, #tpu.memory_space<vmem>>, vector<1x1x128xf32>
    %47 = vector.shape_cast %46 : vector<1x1x128xf32> to vector<1x128xf32>
    %cst_25 = arith.constant dense<0.000000e+00> : vector<16xf32>
    %48 = vector.multi_reduction <add>, %43, %cst_25 [1] : vector<16x128xf32> to vector<16xf32>
    %49 = vector.shape_cast %48 : vector<16xf32> to vector<16x1xf32>
    %cst_26 = arith.constant 1.280000e+02 : f32
    %50 = vector.broadcast %cst_26 : f32 to vector<16x1xf32>
    %51 = arith.divf %49, %50 : vector<16x1xf32>
    %52 = vector.broadcast %51 : vector<16x1xf32> to vector<16x128xf32>
    %53 = arith.subf %43, %52 : vector<16x128xf32>
    %54 = arith.mulf %53, %53 : vector<16x128xf32>
    %cst_27 = arith.constant dense<0.000000e+00> : vector<16xf32>
    %55 = vector.multi_reduction <add>, %54, %cst_27 [1] : vector<16x128xf32> to vector<16xf32>
    %56 = vector.shape_cast %55 : vector<16xf32> to vector<16x1xf32>
    %cst_28 = arith.constant 1.280000e+02 : f32
    %57 = vector.broadcast %cst_28 : f32 to vector<16x1xf32>
    %58 = arith.divf %56, %57 : vector<16x1xf32>
    %59 = vector.broadcast %51 : vector<16x1xf32> to vector<16x128xf32>
    %60 = arith.subf %43, %59 : vector<16x128xf32>
    %cst_29 = arith.constant 9.99999974E-6 : f32
    %61 = vector.broadcast %cst_29 : f32 to vector<16x1xf32>
    %62 = arith.addf %58, %61 : vector<16x1xf32>
    %63 = math.rsqrt %62 : vector<16x1xf32>
    %64 = vector.broadcast %63 : vector<16x1xf32> to vector<16x128xf32>
    %65 = arith.mulf %60, %64 : vector<16x128xf32>
    %66 = vector.broadcast %45 : vector<1x128xf32> to vector<16x128xf32>
    %67 = arith.mulf %65, %66 : vector<16x128xf32>
    %68 = vector.broadcast %47 : vector<1x128xf32> to vector<16x128xf32>
    %69 = arith.addf %67, %68 : vector<16x128xf32>
    %70 = arith.truncf %69 : vector<16x128xf32> to vector<16x128xbf16>
    %c0_30 = arith.constant 0 : index
    %c0_31 = arith.constant 0 : index
    %c0_32 = arith.constant 0 : index
    %71 = vector.load %arg19[%c0_30, %c0_31, %c0_32] : memref<1x128x256xbf16, #tpu.memory_space<vmem>>, vector<1x128x256xbf16>
    %72 = vector.shape_cast %71 : vector<1x128x256xbf16> to vector<128x256xbf16>
    %cst_33 = arith.constant dense<0.000000e+00> : vector<16x256xf32>
    %73 = tpu.matmul %70, %72, %cst_33 {dimension_numbers = #tpu.dot_dimension_numbers<[1], [0], [0], [1], [0, 0, 1, 1], [], []>} : vector<16x128xbf16>, vector<128x256xbf16>, vector<16x256xf32> -> vector<16x256xf32>
    %c0_34 = arith.constant 0 : index
    %c0_35 = arith.constant 0 : index
    %c0_36 = arith.constant 0 : index
    %74 = vector.load %arg20[%c0_34, %c0_35, %c0_36] : memref<1x1x256xf32, #tpu.memory_space<vmem>>, vector<1x1x256xf32>
    %75 = vector.shape_cast %74 : vector<1x1x256xf32> to vector<1x256xf32>
    %76 = vector.broadcast %75 : vector<1x256xf32> to vector<16x256xf32>
    %77 = arith.addf %73, %76 : vector<16x256xf32>
    %cst_37 = arith.constant 0.000000e+00 : f32
    %78 = vector.broadcast %cst_37 : f32 to vector<16x256xf32>
    %79 = arith.maximumf %77, %78 : vector<16x256xf32>
    %80 = arith.truncf %79 : vector<16x256xf32> to vector<16x256xbf16>
    %c0_38 = arith.constant 0 : index
    %c0_39 = arith.constant 0 : index
    %c0_40 = arith.constant 0 : index
    %81 = vector.load %arg21[%c0_38, %c0_39, %c0_40] : memref<1x256x128xbf16, #tpu.memory_space<vmem>>, vector<1x256x128xbf16>
    %82 = vector.shape_cast %81 : vector<1x256x128xbf16> to vector<256x128xbf16>
    %cst_41 = arith.constant dense<0.000000e+00> : vector<16x128xf32>
    %83 = tpu.matmul %80, %82, %cst_41 {dimension_numbers = #tpu.dot_dimension_numbers<[1], [0], [0], [1], [0, 0, 1, 1], [], []>} : vector<16x256xbf16>, vector<256x128xbf16>, vector<16x128xf32> -> vector<16x128xf32>
    %c0_42 = arith.constant 0 : index
    %c0_43 = arith.constant 0 : index
    %c0_44 = arith.constant 0 : index
    %84 = vector.load %arg22[%c0_42, %c0_43, %c0_44] : memref<1x1x128xf32, #tpu.memory_space<vmem>>, vector<1x1x128xf32>
    %85 = vector.shape_cast %84 : vector<1x1x128xf32> to vector<1x128xf32>
    %86 = vector.broadcast %85 : vector<1x128xf32> to vector<16x128xf32>
    %87 = arith.addf %83, %86 : vector<16x128xf32>
    %88 = arith.addf %69, %87 : vector<16x128xf32>
    %c0_45 = arith.constant 0 : index
    %c0_46 = arith.constant 0 : index
    %c0_47 = arith.constant 0 : index
    %89 = vector.load %arg23[%c0_45, %c0_46, %c0_47] : memref<1x1x128xf32, #tpu.memory_space<vmem>>, vector<1x1x128xf32>
    %90 = vector.shape_cast %89 : vector<1x1x128xf32> to vector<1x128xf32>
    %c0_48 = arith.constant 0 : index
    %c0_49 = arith.constant 0 : index
    %c0_50 = arith.constant 0 : index
    %91 = vector.load %arg24[%c0_48, %c0_49, %c0_50] : memref<1x1x128xf32, #tpu.memory_space<vmem>>, vector<1x1x128xf32>
    %92 = vector.shape_cast %91 : vector<1x1x128xf32> to vector<1x128xf32>
    %cst_51 = arith.constant dense<0.000000e+00> : vector<16xf32>
    %93 = vector.multi_reduction <add>, %88, %cst_51 [1] : vector<16x128xf32> to vector<16xf32>
    %94 = vector.shape_cast %93 : vector<16xf32> to vector<16x1xf32>
    %cst_52 = arith.constant 1.280000e+02 : f32
    %95 = vector.broadcast %cst_52 : f32 to vector<16x1xf32>
    %96 = arith.divf %94, %95 : vector<16x1xf32>
    %97 = vector.broadcast %96 : vector<16x1xf32> to vector<16x128xf32>
    %98 = arith.subf %88, %97 : vector<16x128xf32>
    %99 = arith.mulf %98, %98 : vector<16x128xf32>
    %cst_53 = arith.constant dense<0.000000e+00> : vector<16xf32>
    %100 = vector.multi_reduction <add>, %99, %cst_53 [1] : vector<16x128xf32> to vector<16xf32>
    %101 = vector.shape_cast %100 : vector<16xf32> to vector<16x1xf32>
    %cst_54 = arith.constant 1.280000e+02 : f32
    %102 = vector.broadcast %cst_54 : f32 to vector<16x1xf32>
    %103 = arith.divf %101, %102 : vector<16x1xf32>
    %104 = vector.broadcast %96 : vector<16x1xf32> to vector<16x128xf32>
    %105 = arith.subf %88, %104 : vector<16x128xf32>
    %cst_55 = arith.constant 9.99999974E-6 : f32
    %106 = vector.broadcast %cst_55 : f32 to vector<16x1xf32>
    %107 = arith.addf %103, %106 : vector<16x1xf32>
    %108 = math.rsqrt %107 : vector<16x1xf32>
    %109 = vector.broadcast %108 : vector<16x1xf32> to vector<16x128xf32>
    %110 = arith.mulf %105, %109 : vector<16x128xf32>
    %111 = vector.broadcast %90 : vector<1x128xf32> to vector<16x128xf32>
    %112 = arith.mulf %110, %111 : vector<16x128xf32>
    %113 = vector.broadcast %92 : vector<1x128xf32> to vector<16x128xf32>
    %114 = arith.addf %112, %113 : vector<16x128xf32>
    %c1_i32 = arith.constant 1 : i32
    %115 = arith.cmpi slt, %arg1, %c1_i32 : i32
    %116 = arith.extui %115 : i1 to i32
    %c0_i32_56 = arith.constant 0 : i32
    %117 = arith.cmpi ne, %116, %c0_i32_56 : i32
    scf.if %117 {
      %c0_59 = arith.constant 0 : index
      %c0_60 = arith.constant 0 : index
      %121 = vector.load %arg28[%c0_59, %c0_60] : memref<16x128xf32, #tpu.memory_space<vmem>>, vector<16x128xf32>
      tpu.vector_store %arg28[%c0_59, %c0_60], %114 {strides = array<i32>} : memref<16x128xf32, #tpu.memory_space<vmem>>, vector<16x128xf32>,
    } else {
    }
    %c1_i32_57 = arith.constant 1 : i32
    %118 = arith.cmpi eq, %arg1, %c1_i32_57 : i32
    %119 = arith.extui %118 : i1 to i32
    %c0_i32_58 = arith.constant 0 : i32
    %120 = arith.cmpi ne, %119, %c0_i32_58 : i32
    scf.if %120 {
      %121 = arith.truncf %114 : vector<16x128xf32> to vector<16x128xbf16>
      %c0_59 = arith.constant 0 : index
      %c0_60 = arith.constant 0 : index
      %122 = vector.load %arg25[%c0_59, %c0_60] : memref<128x128xbf16, #tpu.memory_space<vmem>>, vector<128x128xbf16>
      %cst_61 = arith.constant dense<0.000000e+00> : vector<16x128xf32>
      %123 = tpu.matmul %121, %122, %cst_61 {dimension_numbers = #tpu.dot_dimension_numbers<[1], [0], [0], [1], [0, 0, 1, 1], [], []>} : vector<16x128xbf16>, vector<128x128xbf16>, vector<16x128xf32> -> vector<16x128xf32>
      %c0_62 = arith.constant 0 : index
      %c0_63 = arith.constant 0 : index
      %124 = vector.load %arg26[%c0_62, %c0_63] : memref<1x128xf32, #tpu.memory_space<vmem>>, vector<1x128xf32>
      %125 = vector.broadcast %124 : vector<1x128xf32> to vector<16x128xf32>
      %126 = arith.addf %123, %125 : vector<16x128xf32>
      %c0_64 = arith.constant 0 : index
      %c0_65 = arith.constant 0 : index
      %c0_66 = arith.constant 0 : index
      %127 = vector.load %arg27[%c0_64, %c0_65, %c0_66] : memref<1x16x128xf32, #tpu.memory_space<vmem>>, vector<1x16x128xf32>
      %128 = vector.shape_cast %127 : vector<1x16x128xf32> to vector<16x128xf32>
      %129 = vector.shape_cast %126 : vector<16x128xf32> to vector<1x16x128xf32>
      tpu.vector_store %arg27[%c0_64, %c0_65, %c0_66], %129 {strides = array<i32>} : memref<1x16x128xf32, #tpu.memory_space<vmem>>, vector<1x16x128xf32>,
    } else {
    }
    return
  }
  func.func @transform_0(%arg0: i32, %arg1: i32) -> (i32, i32, i32) {
    %c0_i32 = arith.constant 0 : i32
    %c0_i32_0 = arith.constant 0 : i32
    %c0_i32_1 = arith.constant 0 : i32
    return %arg0, %c0_i32, %c0_i32_0 : i32, i32, i32
  }
  func.func @transform_1(%arg0: i32, %arg1: i32) -> (i32, i32, i32) {
    %c0_i32 = arith.constant 0 : i32
    %c0_i32_0 = arith.constant 0 : i32
    %c0_i32_1 = arith.constant 0 : i32
    %c0_i32_2 = arith.constant 0 : i32
    return %c0_i32, %c0_i32_0, %c0_i32_1 : i32, i32, i32
  }
  func.func @transform_2(%arg0: i32, %arg1: i32) -> (i32, i32) {
    %c0_i32 = arith.constant 0 : i32
    %c0_i32_0 = arith.constant 0 : i32
    %c0_i32_1 = arith.constant 0 : i32
    return %c0_i32, %c0_i32_0 : i32, i32
  }
  func.func @transform_3(%arg0: i32, %arg1: i32) -> (i32, i32) {
    %c0_i32 = arith.constant 0 : i32
    %c0_i32_0 = arith.constant 0 : i32
    %c0_i32_1 = arith.constant 0 : i32
    return %c0_i32, %c0_i32_0 : i32, i32
  }
  func.func @transform_4(%arg0: i32, %arg1: i32) -> (i32, i32, i32) {
    %c0_i32 = arith.constant 0 : i32
    %c0_i32_0 = arith.constant 0 : i32
    %c0_i32_1 = arith.constant 0 : i32
    %c0_i32_2 = arith.constant 0 : i32
    return %c0_i32, %c0_i32_0, %c0_i32_1 : i32, i32, i32
  }
  func.func @transform_5(%arg0: i32, %arg1: i32) -> (i32, i32) {
    %c0_i32 = arith.constant 0 : i32
    %c0_i32_0 = arith.constant 0 : i32
    %c0_i32_1 = arith.constant 0 : i32
    return %c0_i32, %c0_i32_0 : i32, i32
  }
  func.func @transform_6(%arg0: i32, %arg1: i32) -> (i32, i32) {
    %c0_i32 = arith.constant 0 : i32
    %c0_i32_0 = arith.constant 0 : i32
    %c0_i32_1 = arith.constant 0 : i32
    return %c0_i32, %c0_i32_0 : i32, i32
  }
  func.func @transform_7(%arg0: i32, %arg1: i32) -> (i32, i32) {
    %c0_i32 = arith.constant 0 : i32
    %c0_i32_0 = arith.constant 0 : i32
    %c0_i32_1 = arith.constant 0 : i32
    return %c0_i32, %c0_i32_0 : i32, i32
  }
  func.func @transform_8(%arg0: i32, %arg1: i32) -> (i32, i32) {
    %c0_i32 = arith.constant 0 : i32
    %c0_i32_0 = arith.constant 0 : i32
    %c0_i32_1 = arith.constant 0 : i32
    return %c0_i32, %c0_i32_0 : i32, i32
  }
  func.func @transform_9(%arg0: i32, %arg1: i32) -> (i32, i32, i32) {
    %c0_i32 = arith.constant 0 : i32
    %c0_i32_0 = arith.constant 0 : i32
    %c0_i32_1 = arith.constant 0 : i32
    return %arg0, %c0_i32, %c0_i32_0 : i32, i32, i32
  }
  func.func @transform_10(%arg0: i32, %arg1: i32) -> (i32, i32, i32) {
    %c0_i32 = arith.constant 0 : i32
    %c0_i32_0 = arith.constant 0 : i32
    %c0_i32_1 = arith.constant 0 : i32
    return %arg0, %c0_i32, %c0_i32_0 : i32, i32, i32
  }
  func.func @transform_11(%arg0: i32, %arg1: i32) -> (i32, i32, i32) {
    %c0_i32 = arith.constant 0 : i32
    %c0_i32_0 = arith.constant 0 : i32
    %c0_i32_1 = arith.constant 0 : i32
    return %arg1, %c0_i32, %c0_i32_0 : i32, i32, i32
  }
  func.func @transform_12(%arg0: i32, %arg1: i32) -> (i32, i32, i32) {
    %c0_i32 = arith.constant 0 : i32
    %c0_i32_0 = arith.constant 0 : i32
    %c0_i32_1 = arith.constant 0 : i32
    return %arg1, %c0_i32, %c0_i32_0 : i32, i32, i32
  }
  func.func @transform_13(%arg0: i32, %arg1: i32) -> (i32, i32, i32) {
    %c0_i32 = arith.constant 0 : i32
    %c0_i32_0 = arith.constant 0 : i32
    %c0_i32_1 = arith.constant 0 : i32
    return %arg1, %c0_i32, %c0_i32_0 : i32, i32, i32
  }
  func.func @transform_14(%arg0: i32, %arg1: i32) -> (i32, i32, i32) {
    %c0_i32 = arith.constant 0 : i32
    %c0_i32_0 = arith.constant 0 : i32
    %c0_i32_1 = arith.constant 0 : i32
    return %arg1, %c0_i32, %c0_i32_0 : i32, i32, i32
  }
  func.func @transform_15(%arg0: i32, %arg1: i32) -> (i32, i32, i32) {
    %c0_i32 = arith.constant 0 : i32
    %c0_i32_0 = arith.constant 0 : i32
    %c0_i32_1 = arith.constant 0 : i32
    return %arg1, %c0_i32, %c0_i32_0 : i32, i32, i32
  }
  func.func @transform_16(%arg0: i32, %arg1: i32) -> (i32, i32, i32) {
    %c0_i32 = arith.constant 0 : i32
    %c0_i32_0 = arith.constant 0 : i32
    %c0_i32_1 = arith.constant 0 : i32
    return %arg1, %c0_i32, %c0_i32_0 : i32, i32, i32
  }
  func.func @transform_17(%arg0: i32, %arg1: i32) -> (i32, i32, i32) {
    %c0_i32 = arith.constant 0 : i32
    %c0_i32_0 = arith.constant 0 : i32
    %c0_i32_1 = arith.constant 0 : i32
    return %arg1, %c0_i32, %c0_i32_0 : i32, i32, i32
  }
  func.func @transform_18(%arg0: i32, %arg1: i32) -> (i32, i32, i32) {
    %c0_i32 = arith.constant 0 : i32
    %c0_i32_0 = arith.constant 0 : i32
    %c0_i32_1 = arith.constant 0 : i32
    return %arg1, %c0_i32, %c0_i32_0 : i32, i32, i32
  }
  func.func @transform_19(%arg0: i32, %arg1: i32) -> (i32, i32, i32) {
    %c0_i32 = arith.constant 0 : i32
    %c0_i32_0 = arith.constant 0 : i32
    %c0_i32_1 = arith.constant 0 : i32
    return %arg1, %c0_i32, %c0_i32_0 : i32, i32, i32
  }
  func.func @transform_20(%arg0: i32, %arg1: i32) -> (i32, i32, i32) {
    %c0_i32 = arith.constant 0 : i32
    %c0_i32_0 = arith.constant 0 : i32
    %c0_i32_1 = arith.constant 0 : i32
    return %arg1, %c0_i32, %c0_i32_0 : i32, i32, i32
  }
  func.func @transform_21(%arg0: i32, %arg1: i32) -> (i32, i32, i32) {
    %c0_i32 = arith.constant 0 : i32
    %c0_i32_0 = arith.constant 0 : i32
    %c0_i32_1 = arith.constant 0 : i32
    return %arg1, %c0_i32, %c0_i32_0 : i32, i32, i32
  }
  func.func @transform_22(%arg0: i32, %arg1: i32) -> (i32, i32, i32) {
    %c0_i32 = arith.constant 0 : i32
    %c0_i32_0 = arith.constant 0 : i32
    %c0_i32_1 = arith.constant 0 : i32
    return %arg1, %c0_i32, %c0_i32_0 : i32, i32, i32
  }
  func.func @transform_23(%arg0: i32, %arg1: i32) -> (i32, i32) {
    %c0_i32 = arith.constant 0 : i32
    %c0_i32_0 = arith.constant 0 : i32
    %c0_i32_1 = arith.constant 0 : i32
    return %c0_i32, %c0_i32_0 : i32, i32
  }
  func.func @transform_24(%arg0: i32, %arg1: i32) -> (i32, i32) {
    %c0_i32 = arith.constant 0 : i32
    %c0_i32_0 = arith.constant 0 : i32
    %c0_i32_1 = arith.constant 0 : i32
    return %c0_i32, %c0_i32_0 : i32, i32
  }
  func.func @transform_25(%arg0: i32, %arg1: i32) -> (i32, i32, i32) {
    %c0_i32 = arith.constant 0 : i32
    %c0_i32_0 = arith.constant 0 : i32
    %c0_i32_1 = arith.constant 0 : i32
    return %arg0, %c0_i32, %c0_i32_0 : i32, i32, i32
  }
}

</mosaic_0001>

<bundles_post_ra>
// kernel: transformer_model_forward.1
= control target key start
LH: loop header
LB: loop body
LE: loop exit
PB: predicated region body
PF: predicated region fallthrough
CT: control target
= control target key end

     0   :  { %s13879_s0 = inlined_call_operand.vmem [shape: f32[2,16,32], index: 0, kind: input, shape index: {}]   ;;  %s13880_s1 = inlined_call_operand.vmem [shape: bf16[3,32,128], index: 1, kind: input, shape index: {}]   ;;  %s13881_s2 = inlined_call_operand.vmem [shape: f32[1,128], index: 2, kind: input, shape index: {}]   ;;  %s13882_s3 = inlined_call_operand.vmem [shape: f32[1,128], index: 3, kind: input, shape index: {}]   ;;  %s13883_s4 = inlined_call_operand.vmem [shape: bf16[3,128,128], index: 4, kind: input, shape index: {}]   ;;  %s13884_s5 = inlined_call_operand.vmem [shape: f32[1,128], index: 5, kind: input, shape index: {}]   ;;  %s13885_s6 = inlined_call_operand.vmem [shape: f32[1,128], index: 6, kind: input, shape index: {}]   ;;  %s13886_s7 = inlined_call_operand.vmem [shape: bf16[128,128], index: 7, kind: input, shape index: {}]   ;;  %s13887_s8 = inlined_call_operand.vmem [shape: f32[1,128], index: 8, kind: input, shape index: {}]   ;;  %s13888_s9 = inlined_call_operand.vmem [shape: f32[2,1,128], index: 9, kind: input, shape index: {}]   ;;  %s13889_s10 = inlined_call_operand.vmem [shape: f32[2,1,128], index: 10, kind: input, shape index: {}]   ;;  %s13890_s11 = inlined_call_operand.vmem [shape: bf16[2,128,384], index: 11, kind: input, shape index: {}]   ;;  %s13891_s12 = inlined_call_operand.vmem [shape: f32[2,1,384], index: 12, kind: input, shape index: {}]   ;;  %s13892_s13 = inlined_call_operand.vmem [shape: bf16[2,128,128], index: 13, kind: input, shape index: {}]   ;;  %s13893_s14 = inlined_call_operand.vmem [shape: f32[2,1,128], index: 14, kind: input, shape index: {}]   ;;  %s13894_s15 = inlined_call_operand.vmem [shape: f32[2,1,128], index: 15, kind: input, shape index: {}]   ;;  %s13895_s16 = inlined_call_operand.vmem [shape: f32[2,1,128], index: 16, kind: input, shape index: {}]   ;;  %s13896_s17 = inlined_call_operand.vmem [shape: bf16[2,128,256], index: 17, kind: input, shape index: {}]   ;;  %s13897_s18 = inlined_call_operand.vmem [shape: f32[2,1,256], index: 18, kind: input, shape index: {}]   ;;  %s13898_s19 = inlined_call_operand.vmem [shape: bf16[2,256,128], index: 19, kind: input, shape index: {}]   ;;  %s13899_s20 = inlined_call_operand.vmem [shape: f32[2,1,128], index: 20, kind: input, shape index: {}]   ;;  %s13900_s21 = inlined_call_operand.vmem [shape: f32[2,1,128], index: 21, kind: input, shape index: {}]   ;;  %s13901_s22 = inlined_call_operand.vmem [shape: f32[2,1,128], index: 22, kind: input, shape index: {}]   ;;  %s13902_s23 = inlined_call_operand.vmem [shape: bf16[128,128], index: 23, kind: input, shape index: {}]   ;;  %s13903_s24 = inlined_call_operand.vmem [shape: f32[1,128], index: 24, kind: input, shape index: {}]   ;;  %s13904_s25 = inlined_call_operand.hbm [shape: f32[2,16,128], index: 25, kind: output, shape index: {}]  }
   0x1   :  { %14000 = sst [smem:[#allocation56_spill]] %s13879_s0 }
   0x2   :  { %14001 = sst [smem:[#allocation57_spill]] %s13880_s1 }
   0x3   :  { %14002 = sst [smem:[#allocation58_spill]] %s13881_s2 }
   0x4   :  { %14003 = sst [smem:[#allocation59_spill]] %s13882_s3 }
   0x5   :  { %14004 = sst [smem:[#allocation60_spill]] %s13883_s4 }
   0x6   :  { %14005 = sst [smem:[#allocation61_spill]] %s13884_s5 }
   0x7   :  { %14006 = sst [smem:[#allocation62_spill]] %s13885_s6 }
   0x8   :  { %14007 = sst [smem:[#allocation63_spill]] %s13886_s7 }
   0x9   :  { %14008 = sst [smem:[#allocation64_spill]] %s13887_s8 }
   0xa   :  { %14009 = sst [smem:[#allocation65_spill]] %s13888_s9 }
   0xb   :  { %14010 = sst [smem:[#allocation66_spill]] %s13889_s10 }
   0xc   :  { %14011 = sst [smem:[#allocation67_spill]] %s13890_s11 }
   0xd   :  { %14012 = sst [smem:[#allocation68_spill]] %s13891_s12 }
   0xe   :  { %14013 = sst [smem:[#allocation69_spill]] %s13892_s13 }
   0xf   :  { %14014 = sst [smem:[#allocation70_spill]] %s13894_s15 }
  0x10   :  { %14015 = sst [smem:[#allocation71_spill]] %s13895_s16 }
  0x11   :  { %14016 = sst [smem:[#allocation72_spill]] %s13896_s17 }
  0x12   :  { %14017 = sst [smem:[#allocation73_spill]] %s13900_s21 }
  0x13   :  { %14018 = sst [smem:[#allocation74_spill]] %s13901_s22 }
  0x14   :  { %14019 = sst [smem:[#allocation75_spill]] %s13902_s23 }
  0x15   :  { %14020 = sst [smem:[#allocation76_spill]] %s13903_s24 }
  0x16   :  { %14021 = sst [smem:[#allocation77_spill]] %s13904_s25 }
  0x17   :  { %30 = vsyncpa [#allocation4], 0 }
  0x18   :  { %32 = vsyncpa [#allocation4 + $0x1], 0  ;;  %s11178_s29 = smov 0   ;;  %s11180_s2 = smov 0  }
  0x19   :  { %s11182_s6 = smov 0   ;;  %s11184_s30 = smov 0  }
  0x1a   :  { %s11186_s7 = smov 0   ;;  %s11188_s3 = smov 0  }
  0x1b   :  { %s11190_s26 = smov 0   ;;  %s11192_s1 = smov 0  }
  0x1c LB: > { %14022 = sst [smem:[#allocation6_spill]] %s11004_s29  ;;  %s10152_s8 = sadd.s32 4294967295, %s11032_s1   ;;  %s11032_s1 = sphi %s11192_s1, %s38_s1   ;;  %s11028_s26 = sphi %s11190_s26, %s14294_s26   ;;  %s11024_s3 = sphi %s11188_s3, %s14293_s3   ;;  %s11020_s7 = sphi %s11186_s7, %s14292_s7   ;;  %s11016_s30 = sphi %s11184_s30, %s14291_s30   ;;  %s11012_s6 = sphi %s11182_s6, %s14290_s6   ;;  %s11008_s2 = sphi %s11180_s2, %s14289_s2   ;;  %s11004_s29 = sphi %s11178_s29, %s14288_s29  }
  0x1d   : > { %14023 = sst [smem:[#allocation7_spill]] %s11008_s2  ;;  %s10153_s27 = sadd.s32 4294967294, %s11032_s1  }
  0x1e   : > { %14024 = sst [smem:[#allocation8_spill]] %s11012_s6  ;;  %s47_s4 = sadd.s32 1, %s11024_s3 }
  0x1f   : > { %14025 = sst [smem:[#allocation9_spill]] %s11016_s30  ;;  %p48_p0 = scmp.ge.s32.totalorder %s47_s4, 2 }
  0x20   : > { %14026 = sst [smem:[#allocation10_spill]] %s11020_s7  ;;  %s50_s28 = sadd.s32 1, %s11028_s26 }
  0x21   : > { %14027 = sst [smem:[#allocation11_spill]] %s11024_s3  ;;  %p667_p1 = scmp.ne.s32.totalorder %s11012_s6, %s11008_s2 }
  0x22   : > { %14028 = sst [smem:[#allocation12_spill]] %s11028_s26  ;;  %p668_p2 = scmp.eq.s32.totalorder %s10152_s8, 3 }
  0x23   : > { %14029 = sst [smem:[#allocation13_spill]] %s11032_s1  ;;  %s14296_s4 = smov (%p48_p0, %s47_s4), 0 }
  0x24   : > { %14030 = sst [smem:[#allocation14_spill]] %s14296_s4  ;;  %s14298_s28 = smov (!%p48_p0, %s50_s28), %s11028_s26 }
  0x25   : > { %p11227_p3 = por %p668_p2, %p667_p1  ;;  %p673_p4 = scmp.ne.s32.totalorder %s11008_s2, %s11004_s29 }
  0x26   : > { %p52_p5 = scmp.ge.s32.totalorder %s14298_s28, 2  ;;  %p674_p6 = scmp.eq.s32.totalorder %s10153_s27, 3 }
  0x27   : > { %s14031_s9 = scalar_select %p11227_p3, 1, 0 }
  0x28   : > { %p10156_p7 = scmp.ge.s32.totalorder %s11032_s1, 1  ;;  %p824_p8 = scmp.lt.s32.totalorder %s11032_s1, 5 }
  0x29   : > { %14032 = sst [smem:[#allocation15_spill]] %s14031_s9  ;;  %s14300_s28 = smov (%p52_p5, %s14298_s28), 0 }
  0x2a   : > { %14033 = sst [smem:[#allocation16_spill]] %s14300_s28  ;;  %p11237_p9 = por %p674_p6, %p673_p4 }
  0x2b   : > { %p825_p10 = pnand %p10156_p7, %p824_p8  ;;  %s654_s0 = ssub.s32 %s11028_s26, %s14300_s28 }
  0x2c   : > { %s14034_s5 = scalar_select %p11237_p9, 1, 0 }
  0x2d   : > { %s657_s8 = sadd.s32 1, %s11012_s6  ;;  %p655_p11 = scmp.eq.s32.totalorder %s654_s0, 0 }
  0x2e   : > { %14035 = sst [smem:[#allocation17_spill]] %s14034_s5  ;;  %828 = sbr.rel (%p825_p10) target bundleno = 4523 (0x11ab), region = 120 }
  0x2f   : > { %s11245_s4 = scalar_select %p655_p11, %s11012_s6, %s657_s8  }
  0x31   : > { %14036 = sst [smem:[#allocation18_spill]] %s11245_s4 }
  0x35   : > { %s13912_s27 = sand.u32 1, %s11008_s2   ;;  %p944_p12 = scmp.lt.s32.totalorder %s11020_s7, 1 }
  0x36   : > { %s10157_s3 = sshll.u32 %s13912_s27, 4  ;;  %p955_p13 = scmp.lt.s32.totalorder %s11016_s30, 1 }
  0x37   : > { %s11253_s29 = scalar_select %p944_p12, %s11020_s7, 1 }
  0x38   : > { %s11256_s0 = scalar_select %p955_p13, %s11016_s30, 1 }
  0x39   : > { %s10365_s8 = sshll.u32 %s11253_s29, 4  ;;  %s14038_s1 = sld [smem:[#allocation56_spill]] }
  0x3a   : > { %s10694_s24 = smul.u32 192, %s11256_s0  ;;  %s10366_s23 = sshll.u32 %s11256_s0, 6 }
  0x3b   : > { %s10695_s30 = smul.u32 3, %s11256_s0  ;;  %s14040_s13 = sld [smem:[#allocation69_spill]] }
  0x3c   : > { %s14041_s11 = sld [smem:[#allocation67_spill]]  ;;  %s14042_s12 = sld [smem:[#allocation68_spill]] }
  0x3d   : > { %s10367_s28 = sshll.u32 %s11256_s0, 7  ;;  %s14045_s17 = sld [smem:[#allocation72_spill]] }
  0x3e   : > { %s11317_s10 = scalar_lea.vmem %s13898_s19, %s10367_s28  ;;  %s14047_s16 = sld [smem:[#allocation74_spill]] }
  0x3f   : > { %s11266_s25 = scalar_lea.vmem %s14038_s1, %s10365_s8  ;;  %s10165_s1 = sshll.u32 %s11256_s0, 1 }
  0x40   : > { %s11331_s2 = scalar_lea.vmem [#allocation3], %s10157_s3 }
  0x41   : > { %s11278_s26 = scalar_lea.vmem %s14040_s13, %s10366_s23  ;;  %s994_s23 = scalar_lea.vmem %s13899_s20, %s11256_s0 }
  0x42   : > { %s11283_s6 = scalar_lea.vmem %s14041_s11, %s10694_s24  ;;  %s11292_s7 = scalar_lea.vmem %s14042_s12, %s10695_s30 }
  0x43   : > { %s11306_s11 = scalar_lea.vmem %s14045_s17, %s10367_s28  ;;  %s11312_s30 = scalar_lea.vmem %s13897_s18, %s10165_s1 }
  0x44   : > { %s14046_s24 = sld [smem:[#allocation73_spill]]  ;;  %s1000_s15 = scalar_lea.vmem %s14047_s16, %s11256_s0 }
  0x45   : > { %s14048_s1 = sld [smem:[#allocation9_spill]] }
  0x4a   : > { %s997_s27 = scalar_lea.vmem %s14046_s24, %s11256_s0 }
  0x4b   : > { %p10168_p0 = scmp.ne.s32.totalorder %s14048_s1, 0 }
  0x4c   : > { %s14049_s9 = sld [smem:[#allocation57_spill]] (!%p10168_p0)  ;;  %v11034_v1 = vmov (!%p10168_p0), 0.0   ;;  %vm11035_vm0 = vmmov (!%p10168_p0), 0   ;;  %v1006_v4 = vld [vmem:[%s11266_s25] sm:$0xff] (!%p10168_p0)  ;;  %v1007_v5 = vld [vmem:[%s11266_s25 + $0x8] sm:$0xff] (!%p10168_p0)  ;;  %vm1027_vm1 = vcmask (!%p10168_p0), 261120  }
  0x4d   : > { %1005 = sbr.rel (%p10168_p0) target bundleno = 923 (0x39b), region = 124  ;;  %10484 = vmatprep.subr.bf16.mxu0 (!%p10168_p0), %v11034_v1  ;;  %10492 = vmatprep.subr.bf16.mxu1 (!%p10168_p0), %v11034_v1  ;;  %v1010_v6 = vpack.c.bf16 (!%p10168_p0), %v1007_v5, %v1006_v4  ;;  %s14050_s24 = sld [smem:[#allocation60_spill]] (!%p10168_p0)  ;;  %vm1199_vm2 = vcmask (!%p10168_p0), 1046528   ;;  %vm1137_vm3 = vcmask (!%p10168_p0), 1040384   ;;  %vm1713_vm4 = vcmask (!%p10168_p0), 523264  }
  0x4e   : > { %10488 = vmatprep.mubr.msk.bf16.mxu0 (!%p10168_p0), %vm11035_vm0, %v11034_v1  ;;  %10496 = vmatprep.mubr.msk.bf16.mxu1 (!%p10168_p0), %vm11035_vm0, %v11034_v1  ;;  %s14051_s3 = sld [smem:[#allocation58_spill]] (!%p10168_p0)  ;;  %s14052_s25 = sld [smem:[#allocation59_spill]] (!%p10168_p0) }
  0x4f   : > { %s14053_s21 = sld [smem:[#allocation63_spill]] (!%p10168_p0)  ;;  %s14054_s8 = sld [smem:[#allocation61_spill]] (!%p10168_p0) }
  0x50   : > { %s14055_s22 = sld [smem:[#allocation62_spill]] (!%p10168_p0)  ;;  %s14056_s28 = sld [smem:[#allocation64_spill]] (!%p10168_p0) }
  0x51   : > { %s11036_s13 = smov (!%p10168_p0), 64   ;;  %s14057_s17 = sld [smem:[#allocation65_spill]] (!%p10168_p0) }
  0x52   : > { %v10780_v0 = vld [vmem:[%s14049_s9] sm:$0xff] (!%p10168_p0)   ;;  %v10781_v2 = vld [vmem:[%s14049_s9 + $0x8] sm:$0xff] (!%p10168_p0)   ;;  %v10783_v8 = vld [vmem:[%s14049_s9 + $0x10] sm:$0xff] (!%p10168_p0)  }
  0x53   : > { %10485 = vmatpush3.bf16.msra.mxu0 (!%p10168_p0), %v10780_v0  ;;  %v10782_v3 = vld [vmem:[%s14049_s9 + $0x20] sm:$0xff] (!%p10168_p0)   ;;  %v10784_v7 = vld [vmem:[%s14049_s9 + $0x28] sm:$0xff] (!%p10168_p0)   ;;  %v10785_v10 = vld [vmem:[%s14049_s9 + $0x18] sm:$0xff] (!%p10168_p0)  }
  0x54   : > { %10486 = vmatprep.subr.bf16.mxu0 %v11034_v1  ;;  %10493 = vmatpush3.bf16.msra.mxu1 %v10782_v3  ;;  %v10786_v9 = vld [vmem:[%s14050_s24] sm:$0xff]   ;;  %v10788_v11 = vld [vmem:[%s14050_s24 + $0x8] sm:$0xff]   ;;  %v10790_v13 = vld [vmem:[%s14050_s24 + $0x10] sm:$0xff]  }
  0x55   : > { %10494 = vmatprep.subr.bf16.mxu1 %v11034_v1  ;;  %v10787_v12 = vld [vmem:[%s14050_s24 + $0x80] sm:$0xff]   ;;  %v10789_v14 = vld [vmem:[%s14050_s24 + $0x88] sm:$0xff]   ;;  %v10791_v15 = vld [vmem:[%s14050_s24 + $0x90] sm:$0xff]  }
  0x56   : > { %v10792_v16 = vld [vmem:[%s14050_s24 + $0x18] sm:$0xff]   ;;  %v10794_v18 = vld [vmem:[%s14050_s24 + $0x20] sm:$0xff]   ;;  %v10796_v20 = vld [vmem:[%s14050_s24 + $0x28] sm:$0xff]  }
  0x57   : > { %10487 = vmatpush3.bf16.msra.mxu0 %v10781_v2  ;;  %v10793_v17 = vld [vmem:[%s14050_s24 + $0x98] sm:$0xff]   ;;  %v10795_v19 = vld [vmem:[%s14050_s24 + $0xa0] sm:$0xff]   ;;  %v10797_v21 = vld [vmem:[%s14050_s24 + $0xa8] sm:$0xff]  }
  0x58   : > { %10500 = vmatprep.subr.bf16.mxu0 %v11034_v1  ;;  %10495 = vmatpush3.bf16.msra.mxu1 %v10784_v7  ;;  %v10798_v22 = vld [vmem:[%s14050_s24 + $0x30] sm:$0xff]   ;;  %v10800_v24 = vld [vmem:[%s14050_s24 + $0x38] sm:$0xff]   ;;  %v10186_v44 = vld [vmem:[%s14051_s3] ss:$0 sm:$0xff]  ;;  %s14058_s3 = scalar_lea.vmem %s14057_s17, %s11253_s29 }
  0x59   : > { %10508 = vmatprep.subr.bf16.mxu1 %v11034_v1  ;;  %v10799_v23 = vld [vmem:[%s14050_s24 + $0xb0] sm:$0xff]   ;;  %v10801_v25 = vld [vmem:[%s14050_s24 + $0xb8] sm:$0xff]   ;;  %v10187_v50 = vld [vmem:[%s14052_s25] ss:$0 sm:$0xff]  ;;  %s14059_s25 = sld [smem:[#allocation66_spill]] }
  0x5a   : > { %10489 = vmatmul.mubr.msk.bf16.vlgmr.msra.gmra.mrb[0].mxu0 %vm1027_vm1, %v1010_v6  ;;  %v10802_v58 = vld [vmem:[%s14050_s24 + $0x40] sm:$0xff]   ;;  %v10803_v60 = vld [vmem:[%s14050_s24 + $0x48] sm:$0xff]   ;;  %v10804_v61 = vld [vmem:[%s14050_s24 + $0x50] sm:$0xff]  }
  0x5b   : > { %10501 = vmatpush3.bf16.msra.mxu0 %v10783_v8  ;;  %10504 = vmatprep.mubr.msk.bf16.mxu0 %vm11035_vm0, %v11034_v1  ;;  %v10805_v62 = vld [vmem:[%s14050_s24 + $0x58] sm:$0xff]   ;;  %v10806_v63 = vld [vmem:[%s14050_s24 + $0x60] sm:$0xff]   ;;  %v10807_v0 = vld [vmem:[%s14050_s24 + $0x68] sm:$0xff]  }
  0x5c   : > { %10502 = vmatprep.subr.bf16.mxu0 %v11034_v1  ;;  %10497 = vmatmul.mubr.msk.bf16.vlgmr.msra.gmra.mrb[0].mxu1 %vm1027_vm1, %v1010_v6  ;;  %v10808_v2 = vld [vmem:[%s14050_s24 + $0x70] sm:$0xff]   ;;  %v10809_v3 = vld [vmem:[%s14050_s24 + $0x78] sm:$0xff]   ;;  %v10810_v4 = vld [vmem:[%s14053_s21] sm:$0xff]  }
  0x5d   : > { %10509 = vmatpush3.bf16.msra.mxu1 %v10786_v9  ;;  %10524 = vmatprep.mubr.msk.bf16.mxu1 %vm11035_vm0, %v11034_v1  ;;  %v10811_v5 = vld [vmem:[%s14053_s21 + $0x8] sm:$0xff]   ;;  %v10813_v7 = vld [vmem:[%s14053_s21 + $0x18] sm:$0xff]   ;;  %v10814_v8 = vld [vmem:[%s14053_s21 + $0x20] sm:$0xff]  }
  0x5e   : > { %10510 = vmatprep.subr.bf16.mxu1 %v11034_v1  ;;  %v10815_v9 = vld [vmem:[%s14053_s21 + $0x28] sm:$0xff]  }
  0x5f   : > { %10503 = vmatpush3.bf16.msra.mxu0 %v10785_v10  ;;  %v10816_v10 = vld [vmem:[%s14053_s21 + $0x30] sm:$0xff]  }
  0x60   : > { %10528 = vmatprep.subr.bf16.mxu0 %v11034_v1 }
  0x61   : > { %10511 = vmatpush3.bf16.msra.mxu1 %v10788_v11  ;;  %v10817_v11 = vld [vmem:[%s14053_s21 + $0x38] sm:$0xff]  }
  0x62   : > { %10505 = vmatmul.mubr.msk.bf16.vlgmr.msra.gmra.mrb[4].mxu0 %vm1027_vm1, %v1010_v6  ;;  %10512 = vmatprep.subr.bf16.mxu1 %v11034_v1  ;;  %v10812_v6 = vld [vmem:[%s14053_s21 + $0x10] sm:$0xff]  }
  0x63   : > { %10529 = vmatpush3.bf16.msra.mxu0 %v10787_v12  ;;  %10544 = vmatprep.mubr.msk.bf16.mxu0 %vm11035_vm0, %v11034_v1 }
  0x64   : > { %10530 = vmatprep.subr.bf16.mxu0 %v11034_v1 }
  0x65   : > { %10513 = vmatpush3.bf16.msra.mxu1 %v10790_v13 }
  0x66   : > { %10514 = vmatprep.subr.bf16.mxu1 %v11034_v1 }
  0x67   : > { %10531 = vmatpush3.bf16.msra.mxu0 %v10789_v14 }
  0x68   : > { %10532 = vmatprep.subr.bf16.mxu0 %v11034_v1 }
  0x69   : > { %10515 = vmatpush3.bf16.msra.mxu1 %v10792_v16 }
  0x6a   : > { %10516 = vmatprep.subr.bf16.mxu1 %v11034_v1 }
  0x6b   : > { %10533 = vmatpush3.bf16.msra.mxu0 %v10791_v15 }
  0x6c   : > { %10534 = vmatprep.subr.bf16.mxu0 %v11034_v1 }
  0x6d   : > { %10517 = vmatpush3.bf16.msra.mxu1 %v10794_v18 }
  0x6e   : > { %10518 = vmatprep.subr.bf16.mxu1 %v11034_v1 }
  0x6f   : > { %10535 = vmatpush3.bf16.msra.mxu0 %v10793_v17 }
  0x70   : > { %10536 = vmatprep.subr.bf16.mxu0 %v11034_v1 }
  0x71   : > { %10519 = vmatpush3.bf16.msra.mxu1 %v10796_v20 }
  0x72   : > { %10520 = vmatprep.subr.bf16.mxu1 %v11034_v1 }
  0x73   : > { %10537 = vmatpush3.bf16.msra.mxu0 %v10795_v19 }
  0x74   : > { %10538 = vmatprep.subr.bf16.mxu0 %v11034_v1 }
  0x75   : > { %10521 = vmatpush3.bf16.msra.mxu1 %v10798_v22 }
  0x76   : > { %10522 = vmatprep.subr.bf16.mxu1 %v11034_v1 }
  0x77   : > { %10539 = vmatpush3.bf16.msra.mxu0 %v10797_v21 }
  0x78   : > { %10540 = vmatprep.subr.bf16.mxu0 %v11034_v1 }
  0x79   : > { %10523 = vmatpush3.bf16.msra.mxu1 %v10800_v24 }
  0x7a   : > { %10548 = vmatprep.subr.bf16.mxu1 %v11034_v1 }
  0x7b   : > { %10541 = vmatpush3.bf16.msra.mxu0 %v10799_v23 }
  0x7c   : > { %10542 = vmatprep.subr.bf16.mxu0 %v11034_v1 }
  0x7f   : > { %10543 = vmatpush3.bf16.msra.mxu0 %v10801_v25 }
  0x80   : > { %10568 = vmatprep.subr.bf16.mxu0 %v11034_v1 }
 0x12d   : > { %v1065_v26 = vpop.f32.mrb[0].mxu0 }
 0x12e   : > { %v10490_v27 = vpop.f32.mrb[1].mxu0  ;;  %v1138_v30 = vrot.slane %v1065_v26, 7 }
 0x12f   : > { %v1068_v28 = vpop.f32.mrb[2].mxu0  ;;  %v1128_v29 = vpop.f32.mrb[0].mxu1 }
 0x130   : > { %v1139_v31 = vrot.slane %v1068_v28, 7  ;;  %v10491_v32 = vpop.f32.mrb[3].mxu0  ;;  %v1200_v33 = vrot.slane %v1128_v29, 1  ;;  %v10498_v34 = vpop.f32.mrb[1].mxu1  ;;  %v1143_v40 = vsel %vm1137_vm3, 0.0, %v1138_v30 }
 0x131   : > { %v1131_v35 = vpop.f32.mrb[2].mxu1  ;;  %v10244_v29 = vld [vmem:[%s14054_s8] ss:$0 sm:$0xff] }
 0x132   : > { %v1201_v36 = vrot.slane %v1131_v35, 1  ;;  %v10499_v37 = vpop.f32.mrb[3].mxu1  ;;  %v1140_v38 = vsel %vm1137_vm3, %v1138_v30, %v1139_v31  ;;  %v10245_v35 = vld [vmem:[%s14055_s22] ss:$0 sm:$0xff]  ;;  %s14060_s22 = scalar_lea.vmem %s14059_s25, %s11253_s29 }
 0x134   : > { %v1202_v39 = vsel %vm1199_vm2, %v1200_v33, %v1201_v36  ;;  %v1205_v49 = vsel %vm1199_vm2, %v1201_v36, 0.0 }
 0x135   : > { %v1190_v41 = vpop.f32.mrb[4].mxu0 }
 0x136   : > { %v1191_v42 = vadd.f32 %v1190_v41, %v1143_v40  ;;  %v10506_v43 = vpop.f32.mrb[5].mxu0 }
 0x137   : > { %v1193_v45 = vpop.f32.mrb[6].mxu0 }
 0x138   : > { %v1206_v46 = vadd.f32 %v1202_v39, %v1191_v42  ;;  %v1194_v47 = vadd.f32 %v1193_v45, %v1140_v38  ;;  %v10507_v48 = vpop.f32.mrb[7].mxu0 }
 0x13a   : > { %v1214_v51 = vmul.f32 %v10186_v44, %v1206_v46  ;;  %v1207_v52 = vadd.f32 %v1205_v49, %v1194_v47 }
 0x13c   : > { %v1222_v53 = vadd.f32 %v10187_v50, %v1214_v51  ;;  %v1215_v54 = vmul.f32 %v10186_v44, %v1207_v52  ;;  %v10246_v44 = vld [vmem:[%s14056_s28] ss:$0 sm:$0xff] }
 0x13e   : > { %v1223_v55 = vadd.f32 %v10187_v50, %v1215_v54  ;;  %v1224_v56 = vmax.f32 %v1222_v53, 0.0  ;;  %v10255_v54 = vld [vmem:[%s14058_s3] ss:$0 sm:$0xff] }
 0x140   : > { %v1225_v57 = vmax.f32 %v1223_v55, 0.0  ;;  %v10256_v55 = vld [vmem:[%s14060_s22] ss:$0 sm:$0xff] }
 0x142   : > { %v1228_v59 = vpack.c.bf16 %v1225_v57, %v1224_v56 }
 0x144   : > { %10525 = vmatmul.mubr.bf16.vlgmr.msra.gmra.mrb[4].mxu1 %v1228_v59  ;;  %10545 = vmatmul.mubr.bf16.vlgmr.msra.gmra.mrb[8].mxu0 %v1228_v59 }
 0x145   : > { %10549 = vmatpush3.bf16.msra.mxu1 %v10802_v58  ;;  %10564 = vmatprep.mubr.msk.bf16.mxu1 %vm11035_vm0, %v11034_v1 }
 0x146   : > { %10550 = vmatprep.subr.bf16.mxu1 %v11034_v1  ;;  %10584 = vmatprep.mubr.msk.bf16.mxu0 %vm11035_vm0, %v11034_v1 }
 0x147   : > { %10569 = vmatpush3.bf16.msra.mxu0 %v10810_v4 }
 0x148   : > { %10570 = vmatprep.subr.bf16.mxu0 %v11034_v1 }
 0x149   : > { %10551 = vmatpush3.bf16.msra.mxu1 %v10803_v60 }
 0x14a   : > { %10552 = vmatprep.subr.bf16.mxu1 %v11034_v1 }
 0x14b   : > { %10571 = vmatpush3.bf16.msra.mxu0 %v10811_v5 }
 0x14c   : > { %10572 = vmatprep.subr.bf16.mxu0 %v11034_v1 }
 0x14d   : > { %10553 = vmatpush3.bf16.msra.mxu1 %v10804_v61 }
 0x14e   : > { %10554 = vmatprep.subr.bf16.mxu1 %v11034_v1 }
 0x14f   : > { %10573 = vmatpush3.bf16.msra.mxu0 %v10812_v6 }
 0x150   : > { %10574 = vmatprep.subr.bf16.mxu0 %v11034_v1 }
 0x151   : > { %10555 = vmatpush3.bf16.msra.mxu1 %v10805_v62 }
 0x152   : > { %10556 = vmatprep.subr.bf16.mxu1 %v11034_v1 }
 0x153   : > { %10575 = vmatpush3.bf16.msra.mxu0 %v10813_v7 }
 0x154   : > { %10576 = vmatprep.subr.bf16.mxu0 %v11034_v1 }
 0x155   : > { %10557 = vmatpush3.bf16.msra.mxu1 %v10806_v63 }
 0x156   : > { %10558 = vmatprep.subr.bf16.mxu1 %v11034_v1 }
 0x157   : > { %10577 = vmatpush3.bf16.msra.mxu0 %v10814_v8 }
 0x158   : > { %10578 = vmatprep.subr.bf16.mxu0 %v11034_v1 }
 0x159   : > { %10559 = vmatpush3.bf16.msra.mxu1 %v10807_v0 }
 0x15a   : > { %10560 = vmatprep.subr.bf16.mxu1 %v11034_v1 }
 0x15b   : > { %10579 = vmatpush3.bf16.msra.mxu0 %v10815_v9 }
 0x15c   : > { %10580 = vmatprep.subr.bf16.mxu0 %v11034_v1 }
 0x15d   : > { %10561 = vmatpush3.bf16.msra.mxu1 %v10808_v2 }
 0x15e   : > { %10562 = vmatprep.subr.bf16.mxu1 %v11034_v1 }
 0x15f   : > { %10581 = vmatpush3.bf16.msra.mxu0 %v10816_v10 }
 0x160   : > { %10582 = vmatprep.subr.bf16.mxu0 %v11034_v1 }
 0x161   : > { %10563 = vmatpush3.bf16.msra.mxu1 %v10809_v3 }
 0x163   : > { %10583 = vmatpush3.bf16.msra.mxu0 %v10817_v11 }
 0x164   : > { %10565 = vmatmul.mubr.bf16.vlgmr.msra.gmra.mrb[8].mxu1 %v1228_v59 }
 0x217   : > { %v1327_v12 = vpop.f32.mrb[4].mxu1  ;;  %v1450_v13 = vpop.f32.mrb[8].mxu0 }
 0x218   : > { %v10526_v14 = vpop.f32.mrb[5].mxu1  ;;  %v10546_v15 = vpop.f32.mrb[9].mxu0  ;;  %v1459_v18 = vrot.slane %v1327_v12, 7  ;;  %v1556_v19 = vrot.slane %v1450_v13, 1 }
 0x219   : > { %v1330_v16 = vpop.f32.mrb[6].mxu1  ;;  %v1453_v17 = vpop.f32.mrb[10].mxu0 }
 0x21a   : > { %v1460_v20 = vrot.slane %v1330_v16, 7  ;;  %v1557_v21 = vrot.slane %v1453_v17, 1  ;;  %v10527_v22 = vpop.f32.mrb[7].mxu1  ;;  %v10547_v23 = vpop.f32.mrb[11].mxu0  ;;  %v1464_v25 = vsel %vm1137_vm3, 0.0, %v1459_v18 }
 0x21c   : > { %v1558_v24 = vsel %vm1199_vm2, %v1556_v19, %v1557_v21  ;;  %v1461_v1 = vsel %vm1137_vm3, %v1459_v18, %v1460_v20  ;;  %v1561_v34 = vsel %vm1199_vm2, %v1557_v21, 0.0 }
 0x237   : > { %v1547_v26 = vpop.f32.mrb[8].mxu1 }
 0x238   : > { %v1548_v27 = vadd.f32 %v1547_v26, %v1464_v25  ;;  %v10566_v28 = vpop.f32.mrb[9].mxu1 }
 0x239   : > { %v1550_v30 = vpop.f32.mrb[10].mxu1 }
 0x23a   : > { %v1562_v31 = vadd.f32 %v1558_v24, %v1548_v27  ;;  %v1551_v32 = vadd.f32 %v1550_v30, %v1461_v1  ;;  %v10567_v33 = vpop.f32.mrb[11].mxu1 }
 0x23c   : > { %v1570_v36 = vmul.f32 %v10244_v29, %v1562_v31  ;;  %v1563_v37 = vadd.f32 %v1561_v34, %v1551_v32 }
 0x23e   : > { %v1578_v38 = vadd.f32 %v10245_v35, %v1570_v36  ;;  %v1571_v39 = vmul.f32 %v10244_v29, %v1563_v37 }
 0x240   : > { %v1579_v40 = vadd.f32 %v10245_v35, %v1571_v39  ;;  %v1580_v41 = vmax.f32 %v1578_v38, 0.0 }
 0x242   : > { %v1581_v42 = vmax.f32 %v1579_v40, 0.0 }
 0x244   : > { %v1582_v43 = vpack.c.bf16 %v1581_v42, %v1580_v41 }
 0x246   : > { %10585 = vmatmul.mubr.bf16.vlgmr.msra.gmra.mrb[12].mxu0 %v1582_v43 }
 0x319   : > { %v1688_v45 = vpop.f32.mrb[12].mxu0 }
 0x31a   : > { %v1689_v46 = vadd.f32 %v10246_v44, %v1688_v45  ;;  %v10586_v47 = vpop.f32.mrb[13].mxu0 }
 0x31b   : > { %v1691_v48 = vpop.f32.mrb[14].mxu0 }
 0x31c   : > { %v1692_v49 = vadd.f32 %v10246_v44, %v1691_v48  ;;  %1707 = vrot.lane.b32.xlu1 %v1689_v46, %s11036_s13  ;;  %v10587_v50 = vpop.f32.mrb[15].mxu0  ;;  %v1695_v51 = vsub.f32 0.0, %v1689_v46  ;;  %v1723_v58 = vmul.f32 %v10255_v54, %v1689_v46 }
 0x31e   : > { %1699 = vrot.lane.b32.xlu0 %v1695_v51, %s11036_s13  ;;  %v1696_v52 = vsub.f32 0.0, %v1692_v49  ;;  %v1724_v0 = vmul.f32 %v10255_v54, %v1692_v49 }
 0x320   : > { %1709 = vrot.lane.b32.xlu1 %v1692_v49, %s11036_s13 }
 0x322   : > { %1701 = vrot.lane.b32.xlu0 %v1696_v52, %s11036_s13 }
 0x38e   : > { %v1708_v53 = vpop.permute.xlu1 %1707 }
 0x390   : > { %v1700_v56 = vpop.permute.xlu0 %1699 }
 0x391   : > { %v1714_v57 = vsel %vm1713_vm4, %v1700_v56, %v1708_v53 }
 0x392   : > { %v1732_v59 = vmul.f32 %v10256_v55, %v1714_v57  ;;  %v1710_v61 = vpop.permute.xlu1 %1709 }
 0x394   : > { %v1734_v60 = vadd.f32 %v1732_v59, %v1723_v58  ;;  %v1702_v62 = vpop.permute.xlu0 %1701 }
 0x395   : > { %v1715_v63 = vsel %vm1713_vm4, %v1702_v62, %v1710_v61 }
 0x396   : > { %1736 = vst [vmem:[#allocation2] sm:$0xff] %v1734_v60  ;;  %v1733_v2 = vmul.f32 %v10256_v55, %v1715_v63 }
 0x398   : > { %v1735_v3 = vadd.f32 %v1733_v2, %v1724_v0 }
 0x39a   : > { %1737 = vst [vmem:[#allocation2 + $0x8] sm:$0xff] %v1735_v3 }
 0x39b PF: > { %v10823_v4 = vld [vmem:[%s11283_s6 + $0x4] ss:$12 sps:$4 sm:$0xff]   ;;  %v10825_v5 = vld [vmem:[%s11283_s6] ss:$12 sps:$4 sm:$0xff]   ;;  %v13926_v6 = vmov 0   ;;  %v13927_v24 = vmov 0.0   ;;  %v1775_v1 = vlaneseq }
 0x39c   : > { %1950 = vmatprep.mubr.bf16.mxu0 %v13926_v6  ;;  %1918 = vmatprep.subr.bf16.mxu0 %v10823_v4  ;;  %v10826_v7 = vld [vmem:[%s11283_s6 + $0x1c] ss:$12 sps:$4 sm:$0xff]   ;;  %v10828_v8 = vld [vmem:[%s11283_s6 + $0x18] ss:$12 sps:$4 sm:$0xff]   ;;  %v10829_v9 = vld [vmem:[%s11283_s6 + $0x34] ss:$12 sps:$4 sm:$0xff]  }
 0x39d   : > { %1919 = vmatpush1.bf16.msra.mxu0 %v10825_v5  ;;  %v10831_v10 = vld [vmem:[%s11283_s6 + $0x30] ss:$12 sps:$4 sm:$0xff]   ;;  %v10832_v11 = vld [vmem:[%s11283_s6 + $0x4c] ss:$12 sps:$4 sm:$0xff]   ;;  %v10834_v12 = vld [vmem:[%s11283_s6 + $0x48] ss:$12 sps:$4 sm:$0xff]   ;;  %10588 = vmatprep.subr.bf16.mxu1 %v13927_v24 }
 0x39e   : > { %1920 = vmatprep.subr.bf16.mxu0 %v10826_v7  ;;  %v10835_v13 = vld [vmem:[%s11283_s6 + $0x64] ss:$12 sps:$4 sm:$0xff]   ;;  %v10837_v14 = vld [vmem:[%s11283_s6 + $0x60] ss:$12 sps:$4 sm:$0xff]   ;;  %v10838_v15 = vld [vmem:[%s11283_s6 + $0x7c] ss:$12 sps:$4 sm:$0xff]  }
 0x39f   : > { %v10840_v16 = vld [vmem:[%s11283_s6 + $0x78] ss:$12 sps:$4 sm:$0xff]   ;;  %v10841_v17 = vld [vmem:[%s11283_s6 + $0x94] ss:$12 sps:$4 sm:$0xff]   ;;  %v10843_v18 = vld [vmem:[%s11283_s6 + $0x90] ss:$12 sps:$4 sm:$0xff]  }
 0x3a0   : > { %v10844_v19 = vld [vmem:[%s11283_s6 + $0xac] ss:$12 sps:$4 sm:$0xff]   ;;  %v10846_v20 = vld [vmem:[%s11283_s6 + $0xa8] ss:$12 sps:$4 sm:$0xff]   ;;  %v1738_v21 = vld [vmem:[#allocation2] sm:$0xff]  ;;  %v11559_v25 = vshrl.u32 %v1775_v1, 7 }
 0x3a1   : > { %1921 = vmatpush1.bf16.msra.mxu0 %v10828_v8  ;;  %v1739_v22 = vld [vmem:[#allocation2 + $0x8] sm:$0xff]  ;;  %v1773_v27 = vld [vmem:[%s11292_s7] sm:$0x7]  ;;  %s11039_s29 = smov 64   ;;  %v11040_v39 = vmov 1983009808  }
 0x3a2   : > { %1922 = vmatprep.subr.bf16.mxu0 %v10829_v9  ;;  %v11555_v23 = vpack.c.bf16 %v1739_v22, %v1738_v21  ;;  %14061 = vst [vmem:[#allocation19_spill] sm:$0xff] %v11559_v25  ;;  %v13925_v26 = vsub.s32 0, %v11559_v25  ;;  %v13924_v28 = vsub.s32 1, %v11559_v25  ;;  %v2012_v40 = vunpack.c.l.s4 %v11040_v39  ;;  %s14266_s5 = sld [smem:[#allocation70_spill]]  ;;  %s14268_s16 = sld [smem:[#allocation71_spill]] }
 0x3a3   : > { %v11041_v42 = vmov 1934713408   ;;  %vm11042_vm5 = vmmov 0   ;;  %vm5606_vm6 = vcmask 523264   ;;  %vm5695_vm7 = vcmask 130048  }
 0x3a4   : > { %v1778_v29 = vrot.slane %v1773_v27, %v13925_v26  ;;  %v1782_v30 = vrot.slane %v1773_v27, %v13924_v28  ;;  %v2013_v41 = vunpack.c.0.s8 %v2012_v40  ;;  %v2043_v43 = vunpack.c.l.s4 %v11041_v42  ;;  %10604 = vmatprep.mubr.msk.bf16.mxu1 %vm11042_vm5, %v13927_v24 }
 0x3a5   : > { %1923 = vmatpush1.bf16.msra.mxu0 %v10831_v10 }
 0x3a6   : > { %1924 = vmatprep.subr.bf16.mxu0 %v10832_v11  ;;  %v11576_v44 = vsub.s32 %v2013_v41, %v11559_v25  ;;  %v2044_v45 = vunpack.c.0.s8 %v2043_v43 }
 0x3a8   : > { %14062 = vst [vmem:[#allocation20_spill] sm:$0xff] %v11576_v44  ;;  %v11584_v53 = vsub.s32 %v2044_v45, %v11559_v25  ;;  %s14267_s28 = scalar_lea.vmem %s14266_s5, %s11256_s0  ;;  %s14269_s17 = scalar_lea.vmem %s14268_s16, %s11256_s0 }
 0x3a9   : > { %1925 = vmatpush1.bf16.msra.mxu0 %v10834_v12 }
 0x3aa   : > { %1926 = vmatprep.subr.bf16.mxu0 %v10835_v13 }
 0x3ad   : > { %1927 = vmatpush1.bf16.msra.mxu0 %v10837_v14 }
 0x3ae   : > { %1928 = vmatprep.subr.bf16.mxu0 %v10838_v15 }
 0x3b1   : > { %1929 = vmatpush1.bf16.msra.mxu0 %v10840_v16 }
 0x3b2   : > { %1930 = vmatprep.subr.bf16.mxu0 %v10841_v17 }
 0x3b5   : > { %1931 = vmatpush1.bf16.msra.mxu0 %v10843_v18 }
 0x3b6   : > { %1932 = vmatprep.subr.bf16.mxu0 %v10844_v19 }
 0x3b9   : > { %1933 = vmatpush1.bf16.msra.mxu0 %v10846_v20 }
 0x3bc   : > { %1951 = vmatmul.mubr.bf16.vlgmr.msra.gmra.mrb[0].mxu0 %v11555_v23 }
 0x48f   : > { %v1952_v31 = vpop.f32.mrb[0].mxu0 }
 0x490   : > { %v1953_v32 = vadd.f32 %v1952_v31, %v1778_v29  ;;  %v1954_v33 = vpop.f32.mrb[1].mxu0 }
 0x491   : > { %v1955_v34 = vadd.f32 %v1954_v33, %v1782_v30  ;;  %v1956_v35 = vpop.f32.mrb[2].mxu0 }
 0x492   : > { %v1958_v36 = vpop.f32.mrb[3].mxu0  ;;  %2004 = vrot.lane.b32.xlu1 %v1953_v32, %s11039_s29  ;;  %v1957_v37 = vadd.f32 %v1956_v35, %v1778_v29  ;;  %v2010_v46 = vcombine.high %v1953_v32, %v13927_v24  ;;  %v2017_v48 = vrot.slane %v1953_v32, %v11576_v44 }
 0x493   : > { %2144 = vrot.lane.b32.xlu0 %v1955_v34, %s11039_s29  ;;  %v11571_v38 = vadd.f32 %v1958_v36, %v1782_v30  ;;  %v2157_v54 = vrot.slane %v1955_v34, %v11576_v44  ;;  %v2150_v17 = vcombine.high %v1955_v34, %v13927_v24 }
 0x494   : > { %v2076_v49 = vcombine.high %v1957_v37, %v13927_v24  ;;  %v2024_v56 = vrot.slane %v2010_v46, %v11576_v44  ;;  %v2083_v60 = vrot.slane %v1957_v37, %v11576_v44 }
 0x495   : > { %v2164_v46 = vrot.slane %v2150_v17, %v11576_v44 }
 0x496   : > { %v2090_v62 = vrot.slane %v2076_v49, %v11576_v44 }
 0x497   : > { %2006 = vrot.lane.b32.xlu0 %v1957_v37, %s11039_s29 }
 0x49b   : > { %2146 = vrot.lane.b32.xlu0 %v11571_v38, %s11039_s29 }
 0x504   : > { %v2005_v47 = vpop.permute.xlu1 %2004 }
 0x505   : > { %v2025_v50 = vcombine.high %v2005_v47, %v13927_v24  ;;  %v2032_v51 = vrot.slane %v2005_v47, %v11576_v44  ;;  %v2145_v52 = vpop.permute.xlu0 %2144 }
 0x506   : > { %v2172_v55 = vrot.slane %v2145_v52, %v11576_v44  ;;  %v2165_v2 = vcombine.high %v2145_v52, %v13927_v24 }
 0x507   : > { %v2039_v57 = vrot.slane %v2025_v50, %v11576_v44  ;;  %v2040_v58 = vcombine.low %v2017_v48, %v2032_v51  ;;  %v2041_v59 = vcombine.high %v2017_v48, %v2032_v51 }
 0x508   : > { %v2181_v61 = vcombine.high %v2157_v54, %v2172_v55  ;;  %v2180_v8 = vcombine.low %v2157_v54, %v2172_v55  ;;  %v2179_v32 = vrot.slane %v2165_v2, %v11576_v44  ;;  %v10847_v54 = vld [vmem:[%s11283_s6 + $0x8] ss:$12 sps:$4 sm:$0xff]  }
 0x509   : > { %v2056_v63 = vcombine.low %v2024_v56, %v2039_v57  ;;  %v2057_v0 = vcombine.high %v2024_v56, %v2039_v57  ;;  %v2007_v3 = vpop.permute.xlu0 %2006  ;;  %v2048_v9 = vrot.slane %v2040_v58, %v11584_v53  ;;  %v2055_v10 = vrot.slane %v2041_v59, %v11584_v53  ;;  %10589 = vmatpush3.bf16.msra.mxu1 %v10847_v54 }
 0x50a   : > { %v2091_v4 = vcombine.high %v2007_v3, %v13927_v24  ;;  %v2098_v5 = vrot.slane %v2007_v3, %v11576_v44  ;;  %v11596_v7 = vrot.slane %v2181_v61, %v11584_v53  ;;  %v2188_v35 = vrot.slane %v2180_v8, %v11584_v53  ;;  %10590 = vmatprep.subr.bf16.mxu1 %v13927_v24 }
 0x50b   : > { %v2064_v11 = vrot.slane %v2056_v63, %v11584_v53  ;;  %v2071_v12 = vrot.slane %v2057_v0, %v11584_v53  ;;  %v2072_v27 = vcombine.high %v2048_v9, %v13927_v24  ;;  %v2073_v29 = vcombine.high %v2055_v10, %v13927_v24  ;;  %v10848_v0 = vld [vmem:[%s11283_s6 + $0x20] ss:$12 sps:$4 sm:$0xff]  }
 0x50c   : > { %v2105_v13 = vrot.slane %v2091_v4, %v11576_v44  ;;  %v2106_v14 = vcombine.low %v2083_v60, %v2098_v5  ;;  %v2107_v15 = vcombine.high %v2083_v60, %v2098_v5  ;;  %v2440_v16 = vpack.c.bf16 %v11596_v7, %v11596_v7 }
 0x50d   : > { %v2074_v18 = vcombine.high %v2064_v11, %v13927_v24  ;;  %v2075_v19 = vcombine.high %v2071_v12, %v13927_v24  ;;  %v10281_v30 = vpack.c.bf16 %v2064_v11, %v2048_v9  ;;  %v10282_v31 = vpack.c.bf16 %v2071_v12, %v2055_v10  ;;  %10591 = vmatpush3.bf16.msra.mxu1 %v10848_v0  ;;  %v10849_v11 = vld [vmem:[%s11283_s6 + $0x38] ss:$12 sps:$4 sm:$0xff]  }
 0x50e   : > { %v2114_v20 = vrot.slane %v2106_v14, %v11584_v53  ;;  %v2121_v21 = vrot.slane %v2107_v15, %v11584_v53  ;;  %v2122_v22 = vcombine.low %v2090_v62, %v2105_v13  ;;  %v2123_v1 = vcombine.high %v2090_v62, %v2105_v13  ;;  %2590 = vxpose.xlu0.c.b16.start.end [1/1] (short) (narrow) %v2440_v16, 64 }
 0x50f   : > { %v10285_v36 = vpack.c.bf16 %v2074_v18, %v2072_v27  ;;  %v10286_v37 = vpack.c.bf16 %v2075_v19, %v2073_v29  ;;  %v2461_v47 = vrot.slane %v10281_v30, %v11576_v44  ;;  %v2469_v48 = vrot.slane %v10282_v31, %v11576_v44  ;;  %10592 = vmatprep.subr.bf16.mxu1 %v13927_v24  ;;  %v10850_v18 = vld [vmem:[%s11283_s6 + $0x50] ss:$12 sps:$4 sm:$0xff]   ;;  %v10851_v30 = vld [vmem:[%s11283_s6 + $0x68] ss:$12 sps:$4 sm:$0xff]  }
 0x510   : > { %v2130_v33 = vrot.slane %v2122_v22, %v11584_v53  ;;  %v2137_v34 = vrot.slane %v2123_v1, %v11584_v53  ;;  %v2138_v39 = vcombine.high %v2114_v20, %v13927_v24  ;;  %v2139_v40 = vcombine.high %v2121_v21, %v13927_v24  ;;  %v2147_v22 = vpop.permute.xlu0 %2146 }
 0x511   : > { %v2510_v55 = vrot.slane %v10285_v36, %v11576_v44  ;;  %v2518_v56 = vrot.slane %v10286_v37, %v11576_v44  ;;  %v2438_v57 = vpack.c.bf16 %v2188_v35, %v2188_v35  ;;  %v2196_v58 = vcombine.low %v2164_v46, %v2179_v32  ;;  %10593 = vmatpush3.bf16.msra.mxu1 %v10849_v11 }
 0x512   : > { %v2140_v41 = vcombine.high %v2130_v33, %v13927_v24  ;;  %v2141_v42 = vcombine.high %v2137_v34, %v13927_v24  ;;  %v10283_v43 = vpack.c.bf16 %v2130_v33, %v2114_v20  ;;  %v10284_v45 = vpack.c.bf16 %v2137_v34, %v2121_v21  ;;  %10594 = vmatprep.subr.bf16.mxu1 %v13927_v24 }
 0x513   : > { %v2486_v62 = vcombine.low %v2461_v47, %v2469_v48  ;;  %2558 = vxpose.xlu1.c.b16.start.end [1/1] (short) (narrow) %v2438_v57, 64  ;;  %v11631_v63 = vrot.slane %v2196_v58, %v11584_v53  ;;  %v2535_v2 = vcombine.low %v2510_v55, %v2518_v56  ;;  %v2197_v10 = vcombine.high %v2164_v46, %v2179_v32 }
 0x514   : > { %v2477_v49 = vrot.slane %v10283_v43, %v11576_v44  ;;  %v2485_v50 = vrot.slane %v10284_v45, %v11576_v44  ;;  %v10287_v51 = vpack.c.bf16 %v2140_v41, %v2138_v39  ;;  %v10288_v52 = vpack.c.bf16 %v2141_v42, %v2139_v40  ;;  %v10853_v39 = vld [vmem:[%s11283_s6 + $0x98] ss:$12 sps:$4 sm:$0xff]   ;;  %v10854_v42 = vld [vmem:[%s11283_s6 + $0xb0] ss:$12 sps:$4 sm:$0xff]  }
 0x515   : > { %v2214_v5 = vcombine.high %v11631_v63, %v13927_v24  ;;  %v2493_v8 = vrot.slane %v2486_v62, %v11584_v53  ;;  %v2542_v13 = vrot.slane %v2535_v2, %v11584_v53  ;;  %v2212_v15 = vcombine.high %v2188_v35, %v13927_v24  ;;  %10595 = vmatpush3.bf16.msra.mxu1 %v10850_v18  ;;  %v10852_v35 = vld [vmem:[%s11283_s6 + $0x80] ss:$12 sps:$4 sm:$0xff]   ;;  %s14265_s6 = scalar_lea.vmem %s13893_s14, %s11256_s0 }
 0x516   : > { %v2494_v59 = vcombine.low %v2477_v49, %v2485_v50  ;;  %v2526_v60 = vrot.slane %v10287_v51, %v11576_v44  ;;  %v2534_v61 = vrot.slane %v10288_v52, %v11576_v44  ;;  %v2211_v17 = vrot.slane %v2197_v10, %v11584_v53  ;;  %10596 = vmatprep.subr.bf16.mxu1 %v13927_v24 }
 0x517   : > { %v2443_v9 = vpack.c.bf16 %v2214_v5, %v2214_v5  ;;  %v2439_v1 = vpack.c.bf16 %v2212_v15, %v2212_v15  ;;  %v2238_v31 = vrot.slane %v2147_v22, %v11576_v44  ;;  %v2223_v32 = vrot.slane %v11571_v38, %v11576_v44 }
 0x518   : > { %v2501_v3 = vrot.slane %v2494_v59, %v11584_v53  ;;  %v2543_v4 = vcombine.low %v2526_v60, %v2534_v61  ;;  %v2215_v29 = vcombine.high %v2211_v17, %v13927_v24  ;;  %v2213_v36 = vcombine.high %v11596_v7, %v13927_v24 }
 0x519   : > { %10597 = vmatpush3.bf16.msra.mxu1 %v10851_v30  ;;  %v2246_v34 = vcombine.low %v2223_v32, %v2238_v31  ;;  %v2247_v43 = vcombine.high %v2223_v32, %v2238_v31  ;;  %v2231_v46 = vcombine.high %v2147_v22, %v13927_v24  ;;  %v2442_v47 = vpack.c.bf16 %v11631_v63, %v11631_v63 }
 0x51a   : > { %v11641_v12 = vcombine.low %v2493_v8, %v2501_v3  ;;  %v2550_v14 = vrot.slane %v2543_v4, %v11584_v53  ;;  %10598 = vmatprep.subr.bf16.mxu1 %v13927_v24  ;;  %v2445_v33 = vpack.c.bf16 %v2215_v29, %v2215_v29  ;;  %v2441_v40 = vpack.c.bf16 %v2213_v36, %v2213_v36 }
 0x51b   : > { %2638 = vxpose.xlu0.c.b16.start.end [1/1] (short) (narrow) %v2443_v9, 64  ;;  %v2254_v37 = vrot.slane %v2246_v34, %v11584_v53  ;;  %v2261_v45 = vrot.slane %v2247_v43, %v11584_v53  ;;  %v2216_v48 = vcombine.high %v11571_v38, %v13927_v24  ;;  %v2245_v50 = vrot.slane %v2231_v46, %v11576_v44 }
 0x51c   : > { %14063 = vst [vmem:[#allocation21_spill] sm:$0xff] %v11641_v12  ;;  %v11647_v16 = vcombine.low %v2542_v13, %v2550_v14  ;;  %v2555_v20 = vshrl.u32 %v11641_v12, 16  ;;  %v2444_v55 = vpack.c.bf16 %v2211_v17, %v2211_v17 }
 0x51d   : > { %10599 = vmatpush3.bf16.msra.mxu1 %v10852_v35  ;;  %v2278_v41 = vcombine.high %v2254_v37, %v13927_v24  ;;  %v2279_v49 = vcombine.high %v2261_v45, %v13927_v24  ;;  %v2446_v59 = vpack.c.bf16 %v2254_v37, %v2254_v37  ;;  %v2448_v62 = vpack.c.bf16 %v2261_v45, %v2261_v45 }
 0x51e   : > { %14064 = vst [vmem:[#allocation22_spill] sm:$0xff] %v11647_v16  ;;  %v2556_v21 = vshrl.u32 %v11647_v16, 16  ;;  %10600 = vmatprep.subr.bf16.mxu1 %v13927_v24 }
 0x51f   : > { %v2447_v7 = vpack.c.bf16 %v2278_v41, %v2278_v41  ;;  %v2449_v51 = vpack.c.bf16 %v2279_v49, %v2279_v49 }
 0x520   : > { %v11656_v27 = vpack.i.b16 %v2556_v21, %v2555_v20  ;;  %2574 = vxpose.xlu1.c.b16.start.end [1/1] (short) (narrow) %v2439_v1, 64 }
 0x521   : > { %10601 = vmatpush3.bf16.msra.mxu1 %v10853_v39 }
 0x522   : > { %14065 = vst [vmem:[#allocation23_spill] sm:$0xff] %v11656_v27  ;;  %10602 = vmatprep.subr.bf16.mxu1 %v13927_v24 }
 0x525   : > { %10603 = vmatpush3.bf16.msra.mxu1 %v10854_v42 }
 0x526   : > { %10608 = vmatprep.subr.bf16.mxu1 %v13927_v24 }
 0x528   : > { %2670 = vxpose.xlu0.c.b16.start.end [1/1] (short) (narrow) %v2445_v33, 64  ;;  %10605 = vmatmul.mubr.bf16.vlgmr.msra.gmra.mrb[0].mxu1 %v11555_v23  ;;  %v2230_v23 = vrot.slane %v2216_v48, %v11576_v44 }
 0x529   : > { %10616 = vmatprep.mubr.msk.bf16.mxu1 %vm11042_vm5, %v13927_v24 }
 0x52a   : > { %v2262_v52 = vcombine.low %v2230_v23, %v2245_v50  ;;  %v2263_v58 = vcombine.high %v2230_v23, %v2245_v50 }
 0x52c   : > { %v2270_v54 = vrot.slane %v2262_v52, %v11584_v53  ;;  %v2277_v38 = vrot.slane %v2263_v58, %v11584_v53 }
 0x52d   : > { %2606 = vxpose.xlu1.c.b16.start.end [1/1] (short) (narrow) %v2441_v40, 64 }
 0x52e   : > { %v2280_v56 = vcombine.high %v2270_v54, %v13927_v24  ;;  %v2281_v60 = vcombine.high %v2277_v38, %v13927_v24  ;;  %v2450_v63 = vpack.c.bf16 %v2270_v54, %v2270_v54  ;;  %v2452_v5 = vpack.c.bf16 %v2277_v38, %v2277_v38 }
 0x530   : > { %v2451_v57 = vpack.c.bf16 %v2280_v56, %v2280_v56  ;;  %v2453_v61 = vpack.c.bf16 %v2281_v60, %v2281_v60 }
 0x535   : > { %2702 = vxpose.xlu0.c.b16.start.end [1/1] (short) (narrow) %v2447_v7, 64 }
 0x53a   : > { %2622 = vxpose.xlu1.c.b16.start.end [1/1] (short) (narrow) %v2442_v47, 64 }
 0x542   : > { %2734 = vxpose.xlu0.c.b16.start.end [1/1] (short) (narrow) %v2449_v51, 64 }
 0x547   : > { %2654 = vxpose.xlu1.c.b16.start.end [1/1] (short) (narrow) %v2444_v55, 64 }
 0x54f   : > { %2766 = vxpose.xlu0.c.b16.start.end [1/1] (short) (narrow) %v2451_v57, 64 }
 0x554   : > { %2686 = vxpose.xlu1.c.b16.start.end [1/1] (short) (narrow) %v2446_v59, 64 }
 0x55c   : > { %2798 = vxpose.xlu0.c.b16.start.end [1/1] (short) (narrow) %v2453_v61, 64 }
 0x561   : > { %2718 = vxpose.xlu1.c.b16.start.end [1/1] (short) (narrow) %v2448_v62, 64 }
 0x56e   : > { %2750 = vxpose.xlu1.c.b16.start.end [1/1] (short) (narrow) %v2450_v63, 64 }
 0x574   : > { %v11692_v0 = vpop.trf.xlu0 }
 0x578   : > { %v11694_v2 = vpop.trf.xlu0 }
 0x579   : > { %v11698_v4 = vpop.trf.xlu1 }
 0x57b   : > { %2782 = vxpose.xlu1.c.b16.start.end [1/1] (short) (narrow) %v2452_v5, 64 }
 0x57c   : > { %v11696_v3 = vpop.trf.xlu0 }
 0x57d   : > { %14066 = vst [vmem:[#allocation24_spill] sm:$0xff] %v11696_v3  ;;  %v11702_v9 = vpop.trf.xlu1 }
 0x580   : > { %v11700_v8 = vpop.trf.xlu0 }
 0x581   : > { %v11704_v11 = vpop.trf.xlu1 }
 0x582   : > { %14067 = vst [vmem:[#allocation25_spill] sm:$0xff] %v11704_v11 }
 0x584   : > { %v2646_v10 = vpop.trf.xlu0 }
 0x585   : > { %v11708_v14 = vpop.trf.xlu1 }
 0x588   : > { %v11706_v13 = vpop.trf.xlu0 }
 0x589   : > { %v2582_v17 = vpop.trf.xlu1 }
 0x58a   : > { %v2950_v63 = vcombine.low %v2582_v17, %v2646_v10  ;;  %v2951_v5 = vcombine.high %v2582_v17, %v2646_v10 }
 0x58c   : > { %v11710_v15 = vpop.trf.xlu0  ;;  %v2965_v10 = vrot.slane %v2951_v5, %v11576_v44 }
 0x58d   : > { %14068 = vst [vmem:[#allocation26_spill] sm:$0xff] %v11710_v15  ;;  %v11714_v20 = vpop.trf.xlu1 }
 0x58e   : > { %v3222_v28 = vcombine.low %v11714_v20, %v11706_v13  ;;  %v3223_v17 = vcombine.high %v11714_v20, %v11706_v13 }
 0x590   : > { %v11712_v18 = vpop.trf.xlu0  ;;  %v3237_v15 = vrot.slane %v3223_v17, %v11576_v44 }
 0x591   : > { %v11716_v22 = vpop.trf.xlu1 }
 0x592   : > { %14069 = vst [vmem:[#allocation27_spill] sm:$0xff] %v11716_v22 }
 0x594   : > { %v2678_v21 = vpop.trf.xlu0 }
 0x595   : > { %v11718_v29 = vpop.trf.xlu1 }
 0x598   : > { %v2679_v1 = vpop.trf.xlu0 }
 0x599   : > { %v2614_v31 = vpop.trf.xlu1 }
 0x59a   : > { %v2966_v60 = vcombine.low %v2614_v31, %v2678_v21  ;;  %v2967_v61 = vcombine.high %v2614_v31, %v2678_v21  ;;  %v2958_v21 = vrot.slane %v2950_v63, %v11576_v44  ;;  %v3230_v31 = vrot.slane %v3222_v28, %v11576_v44 }
 0x59b   : > { %v3767_v63 = vcombine.high %v11718_v29, %v11712_v18 }
 0x59c   : > { %v11720_v30 = vpop.trf.xlu0  ;;  %v2974_v19 = vrot.slane %v2966_v60, %v11576_v44  ;;  %v2981_v24 = vrot.slane %v2967_v61, %v11576_v44  ;;  %v3766_v60 = vcombine.low %v11718_v29, %v11712_v18 }
 0x59d   : > { %14070 = vst [vmem:[#allocation28_spill] sm:$0xff] %v11720_v30  ;;  %v2615_v33 = vpop.trf.xlu1 }
 0x59e   : > { %v3238_v6 = vcombine.low %v2615_v33, %v2679_v1  ;;  %v3239_v27 = vcombine.high %v2615_v33, %v2679_v1  ;;  %v3015_v5 = vcombine.high %v2958_v21, %v2974_v19  ;;  %v3014_v13 = vcombine.low %v2958_v21, %v2974_v19 }
 0x59f   : > { %v3030_v20 = vcombine.low %v2965_v10, %v2981_v24  ;;  %v3031_v18 = vcombine.high %v2965_v10, %v2981_v24 }
 0x5a0   : > { %v11722_v32 = vpop.trf.xlu0  ;;  %v3246_v1 = vrot.slane %v3238_v6, %v11576_v44  ;;  %v3253_v28 = vrot.slane %v3239_v27, %v11576_v44  ;;  %v11822_v21 = vrot.slane %v3015_v5, %v11584_v53  ;;  %v11825_v17 = vrot.slane %v3014_v13, %v11584_v53 }
 0x5a1   : > { %v11726_v35 = vpop.trf.xlu1  ;;  %v11836_v5 = vrot.slane %v3031_v18, %v11584_v53 }
 0x5a2   : > { %14071 = vst [vmem:[#allocation29_spill] sm:$0xff] %v11726_v35  ;;  %v3302_v27 = vcombine.low %v3237_v15, %v3253_v28 }
 0x5a4   : > { %v11724_v34 = vpop.trf.xlu0  ;;  %v11853_v18 = vrot.slane %v3302_v27, %v11584_v53 }
 0x5a5   : > { %v11730_v37 = vpop.trf.xlu1 }
 0x5a6   : > { %v3782_v33 = vcombine.low %v11730_v37, %v11722_v32  ;;  %v3783_v16 = vcombine.high %v11730_v37, %v11722_v32  ;;  %v3286_v32 = vcombine.low %v3230_v31, %v3246_v1  ;;  %v3774_v37 = vrot.slane %v3766_v60, %v11576_v44 }
 0x5a8   : > { %v11728_v36 = vpop.trf.xlu0  ;;  %v3790_v19 = vrot.slane %v3782_v33, %v11576_v44  ;;  %v3797_v24 = vrot.slane %v3783_v16, %v11576_v44  ;;  %v11829_v33 = vrot.slane %v3030_v20, %v11584_v53  ;;  %v11841_v20 = vrot.slane %v3286_v32, %v11584_v53 }
 0x5a9   : > { %v11734_v40 = vpop.trf.xlu1 }
 0x5aa   : > { %v3830_v13 = vcombine.low %v3774_v37, %v3790_v19  ;;  %v3831_v11 = vcombine.high %v3774_v37, %v3790_v19 }
 0x5ac   : > { %v11732_v39 = vpop.trf.xlu0 }
 0x5ad   : > { %14072 = vst [vmem:[#allocation30_spill] sm:$0xff] %v11732_v39  ;;  %v11738_v42 = vpop.trf.xlu1 }
 0x5b0   : > { %v11736_v41 = vpop.trf.xlu0 }
 0x5b1   : > { %v11742_v43 = vpop.trf.xlu1 }
 0x5b2   : > { %14073 = vst [vmem:[#allocation31_spill] sm:$0xff] %v11742_v43 }
 0x5b4   : > { %v11740_v7 = vpop.trf.xlu0 }
 0x5b5   : > { %v11746_v46 = vpop.trf.xlu1 }
 0x5b8   : > { %v11744_v45 = vpop.trf.xlu0 }
 0x5b9   : > { %v11750_v48 = vpop.trf.xlu1 }
 0x5ba   : > { %v2830_v16 = vcombine.low %v11692_v0, %v11750_v48 }
 0x5bc   : > { %v11748_v47 = vpop.trf.xlu0 }
 0x5bd   : > { %14074 = vst [vmem:[#allocation32_spill] sm:$0xff] %v11748_v47  ;;  %v11754_v50 = vpop.trf.xlu1  ;;  %v3838_v47 = vrot.slane %v3830_v13, %v11584_v53 }
 0x5c0   : > { %v11752_v49 = vpop.trf.xlu0 }
 0x5c1   : > { %v11758_v51 = vpop.trf.xlu1 }
 0x5c2   : > { %14075 = vst [vmem:[#allocation33_spill] sm:$0xff] %v11758_v51 }
 0x5c4   : > { %v11756_v23 = vpop.trf.xlu0 }
 0x5c5   : > { %v11762_v54 = vpop.trf.xlu1 }
 0x5c8   : > { %v11760_v52 = vpop.trf.xlu0 }
 0x5c9   : > { %v11766_v56 = vpop.trf.xlu1 }
 0x5cc   : > { %v11764_v55 = vpop.trf.xlu0 }
 0x5cd   : > { %14076 = vst [vmem:[#allocation34_spill] sm:$0xff] %v11764_v55  ;;  %v11768_v58 = vpop.trf.xlu1  ;;  %v3303_v55 = vcombine.high %v3237_v15, %v3253_v28  ;;  %v2814_v15 = vcombine.low %v11698_v4, %v11734_v40 }
 0x5cf   : > { %v11862_v30 = vrot.slane %v3303_v55, %v11584_v53  ;;  %v3631_v55 = vcombine.high %v11708_v14, %v11746_v46 }
 0x5d0   : > { %v2777_v57 = vpop.trf.xlu0 }
 0x5d1   : > { %v3798_v38 = vcombine.low %v11736_v41, %v2777_v57  ;;  %v3799_v59 = vcombine.high %v11736_v41, %v2777_v57  ;;  %v11776_v26 = vpop.trf.xlu1  ;;  %v3255_v41 = vcombine.high %v11728_v36, %v11760_v52 }
 0x5d3   : > { %v11804_v25 = vrot.slane %v3255_v41, %v11576_v44  ;;  %v3781_v41 = vrot.slane %v3767_v63, %v11576_v44 }
 0x5d4   : > { %v11772_v62 = vpop.trf.xlu0 }
 0x5d5   : > { %v11789_v12 = vpop.trf.xlu1  ;;  %v3847_v35 = vcombine.high %v3781_v41, %v3797_v24 }
 0x5d8   : > { %v11782_v57 = vpop.trf.xlu0 }
 0x5d9   : > { %v3271_v61 = vcombine.high %v11744_v45, %v11782_v57  ;;  %v11812_v39 = vpop.trf.xlu1 }
 0x5db   : > { %v11807_v6 = vrot.slane %v3271_v61, %v11576_v44  ;;  %v3287_v61 = vcombine.high %v3230_v31, %v3246_v1  ;;  %v3806_v31 = vrot.slane %v3798_v38, %v11576_v44  ;;  %v3813_v1 = vrot.slane %v3799_v59, %v11576_v44 }
 0x5dc   : > { %v11809_v22 = vpop.trf.xlu0 }
 0x5dd   : > { %14077 = vst [vmem:[#allocation35_spill] sm:$0xff] %v11809_v22  ;;  %v11831_v29 = vpop.trf.xlu1  ;;  %v11850_v28 = vrot.slane %v3287_v61, %v11584_v53  ;;  %v2838_v61 = vrot.slane %v2830_v16, %v11576_v44  ;;  %v3103_v16 = vcombine.high %v11694_v2, %v11754_v50 }
 0x5e0   : > { %v2809_v10 = vpop.trf.xlu0 }
 0x5e1   : > { %v3814_v60 = vcombine.low %v11752_v49, %v2809_v10  ;;  %v3815_v63 = vcombine.high %v11752_v49, %v2809_v10  ;;  %v3846_v10 = vcombine.low %v3781_v41, %v3797_v24  ;;  %v11855_v19 = vpop.trf.xlu1  ;;  %v3086_v41 = vcombine.low %v11702_v9, %v11738_v42 }
 0x5e3   : > { %v3822_v43 = vrot.slane %v3814_v60, %v11576_v44  ;;  %v3829_v49 = vrot.slane %v3815_v63, %v11576_v44  ;;  %v2815_v60 = vcombine.high %v11698_v4, %v11734_v40  ;;  %v2831_v63 = vcombine.high %v11692_v0, %v11750_v48 }
 0x5e4   : > { %v3102_v4 = vcombine.low %v11694_v2, %v11754_v50  ;;  %v3854_v0 = vrot.slane %v3846_v10, %v11584_v53  ;;  %v3087_v40 = vcombine.high %v11702_v9, %v11738_v42  ;;  %v3630_v48 = vcombine.low %v11708_v14, %v11746_v46 }
 0x5e5   : > { %v3862_v32 = vcombine.low %v3806_v31, %v3822_v43  ;;  %v3863_v38 = vcombine.high %v3806_v31, %v3822_v43  ;;  %v3878_v37 = vcombine.low %v3813_v1, %v3829_v49  ;;  %v3879_v59 = vcombine.high %v3813_v1, %v3829_v49  ;;  %v11882_v24 = vpop.trf.xlu1 }
 0x5e6   : > { %v3845_v43 = vrot.slane %v3831_v11, %v11584_v53  ;;  %v2822_v31 = vrot.slane %v2814_v15, %v11576_v44  ;;  %v2998_v11 = vcombine.low %v11740_v7, %v11772_v62  ;;  %v2845_v13 = vrot.slane %v2831_v63, %v11576_v44 }
 0x5e7   : > { %v3870_v27 = vrot.slane %v3862_v32, %v11584_v53  ;;  %v2982_v9 = vcombine.low %v11724_v34, %v11756_v23  ;;  %v2999_v14 = vcombine.high %v11740_v7, %v11772_v62  ;;  %v3861_v46 = vrot.slane %v3847_v35, %v11584_v53 }
 0x5e8   : > { %v2879_v42 = vcombine.high %v2822_v31, %v2838_v61  ;;  %v2829_v10 = vrot.slane %v2815_v60, %v11576_v44  ;;  %v3094_v15 = vrot.slane %v3086_v41, %v11576_v44  ;;  %v3110_v32 = vrot.slane %v3102_v4, %v11576_v44 }
 0x5e9   : > { %v11887_v1 = vcombine.low %v3838_v47, %v3870_v27  ;;  %v11889_v49 = vcombine.high %v3838_v47, %v3870_v27  ;;  %v2878_v2 = vcombine.low %v2822_v31, %v2838_v61  ;;  %v3101_v50 = vrot.slane %v3087_v40, %v11576_v44  ;;  %v11906_v62 = vpop.trf.xlu1 }
 0x5ea   : > { %v11901_v47 = vrot.slane %v3630_v48, %v11576_v44  ;;  %v2983_v63 = vcombine.high %v11724_v34, %v11756_v23  ;;  %v3006_v7 = vrot.slane %v2998_v11, %v11576_v44  ;;  %v11909_v35 = vrot.slane %v3631_v55, %v11576_v44 }
 0x5eb   : > { %v3117_v60 = vrot.slane %v3103_v16, %v11576_v44  ;;  %v2894_v27 = vcombine.low %v2829_v10, %v2845_v13  ;;  %v2895_v41 = vcombine.high %v2829_v10, %v2845_v13  ;;  %v2990_v61 = vrot.slane %v2982_v9, %v11576_v44 }
 0x5ec   : > { %v3013_v31 = vrot.slane %v2999_v14, %v11576_v44  ;;  %v3877_v4 = vrot.slane %v3863_v38, %v11584_v53  ;;  %v11916_v40 = vrot.slane %v2879_v42, %v11584_v53  ;;  %v3270_v34 = vcombine.low %v11744_v45, %v11782_v57 }
 0x5ed   : > { %v3886_v23 = vrot.slane %v3878_v37, %v11584_v53  ;;  %v11922_v48 = vrot.slane %v2878_v2, %v11584_v53  ;;  %v3150_v55 = vcombine.low %v3094_v15, %v3110_v32  ;;  %v2997_v11 = vrot.slane %v2983_v63, %v11576_v44  ;;  %v11926_v9 = vpop.trf.xlu1 }
 0x5ee   : > { %v3047_v13 = vcombine.high %v2990_v61, %v3006_v7  ;;  %v3893_v16 = vrot.slane %v3879_v59, %v11584_v53  ;;  %v3151_v38 = vcombine.high %v3094_v15, %v3110_v32  ;;  %v3254_v14 = vcombine.low %v11728_v36, %v11760_v52 }
 0x5ef   : > { %v3046_v42 = vcombine.low %v2990_v61, %v3006_v7  ;;  %v3166_v10 = vcombine.low %v3101_v50, %v3117_v60  ;;  %v3167_v45 = vcombine.high %v3101_v50, %v3117_v60  ;;  %v3646_v57 = vcombine.low %v11700_v8, %v11762_v54 }
 0x5f0   : > { %v3062_v37 = vcombine.low %v2997_v11, %v3013_v31  ;;  %v11932_v2 = vcombine.low %v3845_v43, %v3877_v4  ;;  %v11934_v22 = vcombine.high %v3845_v43, %v3877_v4  ;;  %v3647_v59 = vcombine.high %v11700_v8, %v11762_v54 }
 0x5f1   : > { %v3278_v63 = vrot.slane %v3270_v34, %v11576_v44  ;;  %v11939_v15 = vcombine.low %v3854_v0, %v3886_v23  ;;  %v11941_v32 = vcombine.high %v3854_v0, %v3886_v23  ;;  %v3063_v36 = vcombine.high %v2997_v11, %v3013_v31  ;;  %v11943_v52 = vpop.trf.xlu1 }
 0x5f2   : > { %v3061_v50 = vrot.slane %v3047_v13, %v11584_v53  ;;  %v11946_v7 = vcombine.low %v3861_v46, %v3893_v16  ;;  %v11948_v60 = vcombine.high %v3861_v46, %v3893_v16  ;;  %v3262_v43 = vrot.slane %v3254_v14, %v11576_v44 }
 0x5f3   : > { %v3054_v0 = vrot.slane %v3046_v42, %v11584_v53  ;;  %v11957_v61 = vrot.slane %v3646_v57, %v11576_v44  ;;  %v11960_v31 = vrot.slane %v2894_v27, %v11584_v53  ;;  %v3070_v4 = vrot.slane %v3062_v37, %v11584_v53 }
 0x5f4   : > { %14078 = vst [vmem:[#allocation36_spill] sm:$0xff] %v11946_v7  ;;  %14079 = vst [vmem:[#allocation37_spill] sm:$0xff] %v11948_v60  ;;  %v11964_v46 = vrot.slane %v2895_v41, %v11584_v53  ;;  %v11967_v34 = vrot.slane %v3647_v59, %v11576_v44  ;;  %v3318_v23 = vcombine.low %v3262_v43, %v3278_v63 }
 0x5f5   : > { %v11970_v11 = vrot.slane %v3150_v55, %v11584_v53  ;;  %v11973_v13 = vrot.slane %v3151_v38, %v11584_v53  ;;  %v3319_v16 = vcombine.high %v3262_v43, %v3278_v63  ;;  %v11975_v14 = vpop.trf.xlu1  ;;  %v11978_v27 = vcombine.low %v11822_v21, %v3061_v50 }
 0x5f6   : > { %v3077_v42 = vrot.slane %v3063_v36, %v11584_v53  ;;  %v11982_v41 = vrot.slane %v3166_v10, %v11584_v53  ;;  %v11989_v38 = vcombine.high %v11825_v17, %v3054_v0  ;;  %v11992_v37 = vrot.slane %v3167_v45, %v11584_v53 }
 0x5f7   : > { %v11999_v10 = vcombine.high %v11822_v21, %v3061_v50  ;;  %v12002_v36 = vcombine.low %v11829_v33, %v3070_v4  ;;  %v2846_v55 = vcombine.low %v11766_v56, %v11906_v62  ;;  %v12009_v45 = vcombine.low %v11825_v17, %v3054_v0 }
 0x5f8   : > { %v3326_v59 = vrot.slane %v3318_v23, %v11584_v53  ;;  %v12013_v63 = vcombine.high %v11829_v33, %v3070_v4  ;;  %v12017_v50 = vcombine.low %v11836_v5, %v3077_v42  ;;  %v3333_v54 = vrot.slane %v3319_v16, %v11584_v53 }
 0x5f9   : > { %v2790_v57 = vpop.trf.xlu1  ;;  %v2847_v43 = vcombine.high %v11766_v56, %v11906_v62  ;;  %v3119_v33 = vcombine.high %v11768_v58, %v11926_v9  ;;  %v12029_v23 = vcombine.high %v11836_v5, %v3077_v42  ;;  %v2854_v16 = vrot.slane %v2846_v55, %v11576_v44 }
 0x5fa   : > { %v2862_v8 = vcombine.low %v11812_v39, %v2790_v57  ;;  %v2863_v17 = vcombine.high %v11812_v39, %v2790_v57  ;;  %v12036_v39 = vcombine.low %v11841_v20, %v3326_v59  ;;  %v3118_v57 = vcombine.low %v11768_v58, %v11926_v9 }
 0x5fb   : > { %v12041_v4 = vcombine.high %v11841_v20, %v3326_v59  ;;  %v12044_v5 = vcombine.low %v11850_v28, %v3333_v54  ;;  %v14080_v42 = vcombine.low %v11804_v25, %v11807_v6  ;;  %v2861_v55 = vrot.slane %v2847_v43, %v11576_v44 }
 0x5fc   : > { %v2870_v56 = vrot.slane %v2862_v8, %v11576_v44  ;;  %v2877_v62 = vrot.slane %v2863_v17, %v11576_v44  ;;  %v12053_v58 = vrot.slane %v3119_v33, %v11576_v44  ;;  %v12057_v9 = vcombine.high %v11850_v28, %v3333_v54 }
 0x5fd   : > { %v2791_v0 = vpop.trf.xlu1  ;;  %v3342_v8 = vrot.slane %v14080_v42, %v11584_v53  ;;  %v14081_v59 = vcombine.high %v11804_v25, %v11807_v6 }
 0x5fe   : > { %v3135_v17 = vcombine.high %v11831_v29, %v2791_v0  ;;  %v2911_v21 = vcombine.high %v2854_v16, %v2870_v56  ;;  %v2910_v3 = vcombine.low %v2854_v16, %v2870_v56  ;;  %v3134_v20 = vcombine.low %v11831_v29, %v2791_v0 }
 0x5ff   : > { %v12063_v51 = vrot.slane %v14081_v59, %v11584_v53  ;;  %v2926_v33 = vcombine.low %v2861_v55, %v2877_v62  ;;  %v12071_v56 = vrot.slane %v3118_v57, %v11576_v44  ;;  %v14082_v29 = vcombine.low %v11776_v26, %v11943_v52 }
 0x600   : > { %v12066_v43 = vrot.slane %v3135_v17, %v11576_v44  ;;  %v2925_v42 = vrot.slane %v2911_v21, %v11584_v53  ;;  %v2918_v16 = vrot.slane %v2910_v3, %v11584_v53  ;;  %v12080_v6 = vcombine.low %v11853_v18, %v3342_v8 }
 0x601   : > { %v12077_v28 = vrot.slane %v14082_v29, %v11576_v44  ;;  %v2792_v25 = vpop.trf.xlu1  ;;  %v12083_v54 = vcombine.high %v11853_v18, %v3342_v8  ;;  %v14084_v3 = vcombine.high %v11776_v26, %v11943_v52  ;;  %v2927_v17 = vcombine.high %v2861_v55, %v2877_v62 }
 0x602   : > { %v3406_v59 = vcombine.low %v11855_v19, %v2792_v25  ;;  %v3407_v29 = vcombine.high %v11855_v19, %v2792_v25  ;;  %v2944_v18 = vcombine.low %v11916_v40, %v2925_v42  ;;  %v12099_v8 = vcombine.low %v11922_v48, %v2918_v16 }
 0x603   : > { %14083 = vst [vmem:[#allocation38_spill] sm:$0xff] %v12077_v28  ;;  %v12089_v21 = vrot.slane %v14084_v3, %v11576_v44  ;;  %v3142_v26 = vrot.slane %v3134_v20, %v11576_v44  ;;  %v2945_v52 = vcombine.high %v11916_v40, %v2925_v42  ;;  %v2943_v3 = vcombine.high %v11922_v48, %v2918_v16 }
 0x604   : > { %v2934_v0 = vrot.slane %v2926_v33, %v11584_v53  ;;  %v12106_v57 = vrot.slane %v3406_v59, %v11576_v44  ;;  %v12109_v62 = vrot.slane %v3407_v29, %v11576_v44  ;;  %v3920_v55 = vpack.i.b16 %v11978_v27, %v2944_v18 }
 0x605   : > { %14085 = vst [vmem:[#allocation39_spill] sm:$0xff] %v12089_v21  ;;  %v2793_v19 = vpop.trf.xlu1  ;;  %v3904_v25 = vpack.i.b16 %v12009_v45, %v12099_v8  ;;  %v14088_v40 = vcombine.low %v11789_v12, %v11975_v14  ;;  %v14089_v48 = vcombine.high %v11789_v12, %v11975_v14  ;;  %v3182_v12 = vcombine.low %v12071_v56, %v3142_v26 }
 0x606   : > { %14086 = vst [vmem:[#allocation40_spill] sm:$0xff] %v12106_v57  ;;  %14087 = vst [vmem:[#allocation41_spill] sm:$0xff] %v12109_v62  ;;  %v3678_v16 = vcombine.low %v11882_v24, %v2793_v19  ;;  %v3679_v33 = vcombine.high %v11882_v24, %v2793_v19  ;;  %4222 = vxpose.xlu0.c.b16.start.end [1/1] (short) (narrow) %v3920_v55, 16  ;;  %v2941_v19 = vrot.slane %v2927_v17, %v11584_v53 }
 0x607   : > { %v12118_v20 = vrot.slane %v14088_v40, %v11576_v44  ;;  %v12124_v42 = vrot.slane %v14089_v48, %v11576_v44  ;;  %4158 = vxpose.xlu1.c.b16.start.end [1/1] (short) (narrow) %v3904_v25, 16  ;;  %v3928_v48 = vpack.i.b16 %v11999_v10, %v2945_v52  ;;  %v3912_v29 = vpack.i.b16 %v11989_v38, %v2943_v3  ;;  %v12157_v25 = vpop.f32.mrb[0].mxu1 }
 0x608   : > { %v12138_v14 = vrot.slane %v3678_v16, %v11576_v44  ;;  %v12141_v24 = vrot.slane %v3679_v33, %v11576_v44  ;;  %v12147_v40 = vcombine.low %v11960_v31, %v2934_v0  ;;  %v3914_v60 = vshrl.u32 %v2943_v3, 16  ;;  %14090 = vst [vmem:[#allocation42_spill] sm:$0xff] %v12157_v25  ;;  %v10606_v16 = vpop.f32.mrb[1].mxu1 }
 0x609   : > { %v3183_v59 = vcombine.high %v12071_v56, %v3142_v26  ;;  %v12161_v62 = vcombine.high %v11960_v31, %v2934_v0  ;;  %v3922_v3 = vshrl.u32 %v2944_v18, 16  ;;  %v12165_v55 = vcombine.low %v11862_v30, %v12063_v51  ;;  %v12172_v56 = vpop.f32.mrb[2].mxu1 }
 0x60a   : > { %4254 = vxpose.xlu0.c.b16.start.end [1/1] (short) (narrow) %v3928_v48, 16  ;;  %v12168_v33 = vcombine.low %v11964_v46, %v2941_v19  ;;  %v3930_v21 = vshrl.u32 %v2945_v52, 16  ;;  %v3971_v17 = vshrl.u32 %v12036_v39, 16  ;;  %v3979_v25 = vshrl.u32 %v12041_v4, 16  ;;  %14091 = vst [vmem:[#allocation43_spill] sm:$0xff] %v12172_v56 }
 0x60b   : > { %4190 = vxpose.xlu1.c.b16.start.end [1/1] (short) (narrow) %v3912_v29, 16  ;;  %v3936_v31 = vpack.i.b16 %v12002_v36, %v12147_v40  ;;  %v3995_v0 = vshrl.u32 %v12057_v9, 16  ;;  %v3987_v18 = vshrl.u32 %v12044_v5, 16  ;;  %v12180_v26 = vcombine.high %v11862_v30, %v12063_v51  ;;  %v10607_v29 = vpop.f32.mrb[3].mxu1 }
 0x60c   : > { %v14092_v52 = vshrl.u32 %v11989_v38, 16  ;;  %v3190_v16 = vrot.slane %v3182_v12, %v11584_v53  ;;  %v4003_v57 = vshrl.u32 %v12080_v6, 16  ;;  %v4011_v56 = vshrl.u32 %v12083_v54, 16 }
 0x60d   : > { %v3944_v28 = vpack.i.b16 %v12013_v63, %v12161_v62  ;;  %v14093_v44 = vshrl.u32 %v11978_v27, 16  ;;  %v3197_v30 = vrot.slane %v3183_v59, %v11584_v53  ;;  %v4019_v51 = vshrl.u32 %v12165_v55, 16 }
 0x60e   : > { %v3916_v48 = vpack.i.b16 %v14092_v52, %v3914_v60  ;;  %4286 = vxpose.xlu0.c.b16.start.end [1/1] (short) (narrow) %v3936_v31, 16  ;;  %v3952_v60 = vpack.i.b16 %v12017_v50, %v12168_v33  ;;  %v14094_v38 = vshrl.u32 %v11999_v10, 16  ;;  %v12198_v29 = vcombine.high %v11964_v46, %v2941_v19 }
 0x60f   : > { %v3924_v7 = vpack.i.b16 %v14093_v44, %v3922_v3  ;;  %v12201_v31 = vcombine.low %v11970_v11, %v3190_v16  ;;  %v3938_v27 = vshrl.u32 %v12147_v40, 16  ;;  %v12205_v44 = vcombine.high %v11970_v11, %v3190_v16 }
 0x610   : > { %4206 = vxpose.xlu1.c.b16.start.end [1/1] (short) (narrow) %v3916_v48, 16  ;;  %v3932_v12 = vpack.i.b16 %v14094_v38, %v3930_v21  ;;  %v12208_v59 = vcombine.low %v11973_v13, %v3197_v30  ;;  %v12211_v3 = vcombine.high %v11973_v13, %v3197_v30  ;;  %v14095_v21 = vcombine.low %v12053_v58, %v12066_v43 }
 0x611   : > { %v3968_v10 = vpack.i.b16 %v12036_v39, %v12201_v31  ;;  %v3970_v46 = vshrl.u32 %v12201_v31, 16  ;;  %v14096_v11 = vcombine.high %v12053_v58, %v12066_v43  ;;  %v3976_v13 = vpack.i.b16 %v12041_v4, %v12205_v44 }
 0x612   : > { %v3206_v19 = vrot.slane %v14095_v21, %v11584_v53  ;;  %4318 = vxpose.xlu0.c.b16.start.end [1/1] (short) (narrow) %v3944_v28, 16  ;;  %v3978_v48 = vshrl.u32 %v12205_v44, 16  ;;  %v3994_v38 = vshrl.u32 %v12211_v3, 16  ;;  %v3986_v58 = vshrl.u32 %v12208_v59, 16 }
 0x613   : > { %v3213_v40 = vrot.slane %v14096_v11, %v11584_v53  ;;  %v12231_v30 = vpack.i.b16 %v3971_v17, %v3970_v46  ;;  %v3907_v17 = vshrl.u32 %v12009_v45, 16  ;;  %v14101_v45 = vcombine.high %v11901_v47, %v11957_v61 }
 0x614   : > { %4238 = vxpose.xlu1.c.b16.start.end [1/1] (short) (narrow) %v3924_v7, 16  ;;  %v12236_v43 = vcombine.low %v11982_v41, %v3206_v19  ;;  %v12238_v28 = vpack.i.b16 %v3979_v25, %v3978_v48  ;;  %v12241_v21 = vcombine.high %v11982_v41, %v3206_v19  ;;  %v12249_v7 = vpack.i.b16 %v3987_v18, %v3986_v58 }
 0x615   : > { %v12244_v11 = vcombine.low %v11992_v37, %v3213_v40  ;;  %v12247_v16 = vcombine.high %v11992_v37, %v3213_v40  ;;  %v12254_v52 = vpack.i.b16 %v3995_v0, %v3994_v38  ;;  %v3960_v48 = vpack.i.b16 %v12029_v23, %v12198_v29 }
 0x616   : > { %v4002_v46 = vshrl.u32 %v12236_v43, 16  ;;  %4350 = vxpose.xlu0.c.b16.start.end [1/1] (short) (narrow) %v3952_v60, 16  ;;  %v4010_v25 = vshrl.u32 %v12241_v21, 16  ;;  %v4027_v60 = vshrl.u32 %v12180_v26, 16  ;;  %v3906_v38 = vshrl.u32 %v12099_v8, 16 }
 0x617   : > { %v4018_v37 = vshrl.u32 %v12244_v11, 16  ;;  %v4026_v0 = vshrl.u32 %v12247_v16, 16  ;;  %v3946_v40 = vshrl.u32 %v12161_v62, 16  ;;  %v14098_v8 = vcombine.low %v12118_v20, %v12138_v14 }
 0x618   : > { %4270 = vxpose.xlu1.c.b16.start.end [1/1] (short) (narrow) %v3932_v12, 16  ;;  %v12262_v18 = vpack.i.b16 %v4003_v57, %v4002_v46  ;;  %v12271_v58 = vpack.i.b16 %v4011_v56, %v4010_v25  ;;  %v3711_v57 = vcombine.high %v11909_v35, %v11967_v34  ;;  %v14097_v12 = vshrl.u32 %v12002_v36, 16 }
 0x619   : > { %v12273_v19 = vpack.i.b16 %v4019_v51, %v4018_v37  ;;  %v12280_v41 = vpack.i.b16 %v4027_v60, %v4026_v0  ;;  %v3734_v56 = vrot.slane %v14098_v8, %v11584_v53  ;;  %v14099_v51 = vcombine.high %v12118_v20, %v12138_v14 }
 0x61a   : > { %v3940_v46 = vpack.i.b16 %v14097_v12, %v3938_v27  ;;  %4382 = vxpose.xlu0.c.b16.start.end [1/1] (short) (narrow) %v3960_v48, 16  ;;  %v3947_v36 = vshrl.u32 %v12013_v63, 16  ;;  %v3908_v27 = vpack.i.b16 %v3907_v17, %v3906_v38  ;;  %v14100_v62 = vcombine.low %v11901_v47, %v11957_v61 }
 0x61b   : > { %v3741_v25 = vrot.slane %v14099_v51, %v11584_v53  ;;  %v3709_v0 = vrot.slane %v14101_v45, %v11584_v53  ;;  %v14102_v60 = vcombine.low %v11909_v35, %v11967_v34  ;;  %v3954_v48 = vshrl.u32 %v12168_v33, 16 }
 0x61c   : > { %4302 = vxpose.xlu1.c.b16.start.end [1/1] (short) (narrow) %v3940_v46, 16  ;;  %v3702_v37 = vrot.slane %v14100_v62, %v11584_v53  ;;  %v3948_v14 = vpack.i.b16 %v3947_v36, %v3946_v40  ;;  %v3955_v63 = vshrl.u32 %v12017_v50, 16  ;;  %v3725_v17 = vrot.slane %v3711_v57, %v11584_v53  ;;  %v14123_v62 = vld [vmem:[#allocation20_spill] sm:$0xff] }
 0x61d   : > { %v3718_v20 = vrot.slane %v14102_v60, %v11584_v53  ;;  %v14103_v38 = vcombine.low %v12124_v42, %v12141_v24  ;;  %v3963_v47 = vshrl.u32 %v12029_v23, 16  ;;  %v4099_v61 = vshrl.u32 %v11887_v1, 16 }
 0x61e   : > { %4174 = vxpose.xlu0.c.b16.start.end [1/1] (short) (narrow) %v3908_v27, 16  ;;  %v4107_v35 = vshrl.u32 %v11889_v49, 16  ;;  %v3962_v34 = vshrl.u32 %v12198_v29, 16  ;;  %v12315_v33 = vcombine.low %v3702_v37, %v3734_v56  ;;  %v12317_v50 = vcombine.high %v3702_v37, %v3734_v56 }
 0x61f   : > { %v3750_v12 = vrot.slane %v14103_v38, %v11584_v53  ;;  %v12319_v40 = vcombine.low %v3709_v0, %v3741_v25  ;;  %v12321_v57 = vcombine.high %v3709_v0, %v3741_v25  ;;  %v4115_v46 = vshrl.u32 %v11932_v2, 16 }
 0x620   : > { %4334 = vxpose.xlu1.c.b16.start.end [1/1] (short) (narrow) %v3948_v14, 16  ;;  %v4123_v8 = vshrl.u32 %v11934_v22, 16  ;;  %v4131_v23 = vshrl.u32 %v11939_v15, 16  ;;  %v14104_v51 = vcombine.high %v12124_v42, %v12141_v24  ;;  %v3956_v29 = vpack.i.b16 %v3955_v63, %v3954_v48  ;;  %v14122_v63 = vld [vmem:[#allocation27_spill] sm:$0xff] }
 0x621   : > { %v4098_v25 = vshrl.u32 %v12315_v33, 16  ;;  %v4106_v37 = vshrl.u32 %v12317_v50, 16  ;;  %v4139_v42 = vshrl.u32 %v11941_v32, 16  ;;  %v3964_v24 = vpack.i.b16 %v3963_v47, %v3962_v34 }
 0x622   : > { %v3757_v36 = vrot.slane %v14104_v51, %v11584_v53  ;;  %4414 = vxpose.xlu0.c.b16.start.end [1/1] (short) (narrow) %v3968_v10, 16  ;;  %v4114_v0 = vshrl.u32 %v12319_v40, 16  ;;  %v12345_v60 = vcombine.low %v3718_v20, %v3750_v12  ;;  %v4122_v10 = vshrl.u32 %v12321_v57, 16 }
 0x623   : > { %v12347_v39 = vpack.i.b16 %v4099_v61, %v4098_v25  ;;  %v12349_v31 = vpack.i.b16 %v4107_v35, %v4106_v37  ;;  %v12352_v14 = vcombine.high %v3718_v20, %v3750_v12  ;;  %v14121_v35 = vld [vmem:[#allocation26_spill] sm:$0xff] }
 0x624   : > { %4366 = vxpose.xlu1.c.b16.start.end [1/1] (short) (narrow) %v3956_v29, 16  ;;  %v12354_v48 = vpack.i.b16 %v4115_v46, %v4114_v0  ;;  %v4130_v38 = vshrl.u32 %v12345_v60, 16  ;;  %v12359_v47 = vcombine.low %v3725_v17, %v3757_v36  ;;  %v12364_v61 = vpack.i.b16 %v4123_v8, %v4122_v10  ;;  %v14105_v46 = vld [vmem:[#allocation36_spill] sm:$0xff]  ;;  %v14112_v10 = vld [vmem:[#allocation35_spill] sm:$0xff] }
 0x625   : > { %v4138_v20 = vshrl.u32 %v12352_v14, 16  ;;  %v12369_v12 = vcombine.high %v3725_v17, %v3757_v36  ;;  %v4147_v4 = vshrl.u32 %v14105_v46, 16  ;;  %v14114_v8 = vpack.i.b16 %v12057_v9, %v12211_v3 }
 0x626   : > { %4446 = vxpose.xlu0.c.b16.start.end [1/1] (short) (narrow) %v3976_v13, 16  ;;  %v12371_v34 = vpack.i.b16 %v4131_v23, %v4130_v38  ;;  %v4146_v29 = vshrl.u32 %v12359_v47, 16  ;;  %v14106_v13 = vld [vmem:[#allocation37_spill] sm:$0xff]  ;;  %v14108_v23 = vpack.i.b16 %v12044_v5, %v12208_v59  ;;  %v14113_v38 = vld [vmem:[#allocation32_spill] sm:$0xff]  ;;  %v14117_v59 = vld [vmem:[#allocation31_spill] sm:$0xff]  ;;  %v3494_v45 = vcombine.low %v14122_v63, %v14121_v35 }
 0x627   : > { %v12377_v44 = vpack.i.b16 %v4139_v42, %v4138_v20  ;;  %v4154_v25 = vshrl.u32 %v12369_v12, 16  ;;  %v4155_v17 = vshrl.u32 %v14106_v13, 16  ;;  %v14111_v42 = vld [vmem:[#allocation24_spill] sm:$0xff]  ;;  %v3542_v20 = vcombine.low %v14113_v38, %v14112_v10 }
 0x628   : > { %4398 = vxpose.xlu1.c.b16.start.end [1/1] (short) (narrow) %v3964_v24, 16  ;;  %v12383_v36 = vpack.i.b16 %v4147_v4, %v4146_v29  ;;  %v14110_v24 = vld [vmem:[#allocation33_spill] sm:$0xff]  ;;  %v14115_v29 = vld [vmem:[#allocation28_spill] sm:$0xff]  ;;  %v14124_v9 = vpack.i.b16 %v12080_v6, %v12236_v43  ;;  %v14126_v6 = vld [vmem:[#allocation38_spill] sm:$0xff] }
 0x629   : > { %v12388_v37 = vpack.i.b16 %v4155_v17, %v4154_v25  ;;  %v3374_v0 = vcombine.low %v14111_v42, %v14110_v24  ;;  %v14116_v4 = vld [vmem:[#allocation29_spill] sm:$0xff]  ;;  %v3550_v56 = vrot.slane %v3542_v20, %v14123_v62  ;;  %v14127_v43 = vld [vmem:[#allocation40_spill] sm:$0xff] }
 0x62a   : > { %14107 = vst [vmem:[#allocation36_spill] sm:$0xff] %v12383_v36  ;;  %4478 = vxpose.xlu0.c.b16.start.end [1/1] (short) (narrow) %v14108_v23, 16  ;;  %v3510_v5 = vcombine.low %v14116_v4, %v14115_v29  ;;  %v14118_v25 = vld [vmem:[#allocation25_spill] sm:$0xff]  ;;  %v14119_v23 = vld [vmem:[#allocation34_spill] sm:$0xff]  ;;  %v14125_v36 = vpack.i.b16 %v12083_v54, %v12241_v21 }
 0x62b   : > { %14109 = vst [vmem:[#allocation37_spill] sm:$0xff] %v12388_v37  ;;  %v3358_v17 = vcombine.low %v14118_v25, %v14117_v59  ;;  %v3382_v27 = vrot.slane %v3374_v0, %v14123_v62  ;;  %v3502_v37 = vrot.slane %v3494_v45, %v14123_v62 }
 0x62c   : > { %4430 = vxpose.xlu1.c.b16.start.end [1/1] (short) (narrow) %v12231_v30, 16  ;;  %v14120_v30 = vld [vmem:[#allocation30_spill] sm:$0xff]  ;;  %v3518_v3 = vrot.slane %v3510_v5, %v14123_v62 }
 0x62d   : > { %v3526_v51 = vcombine.low %v14120_v30, %v14119_v23 }
 0x62e   : > { %4510 = vxpose.xlu0.c.b16.start.end [1/1] (short) (narrow) %v14114_v8, 16  ;;  %v3558_v5 = vcombine.low %v3502_v37, %v3518_v3 }
 0x62f   : > { %v3534_v8 = vrot.slane %v3526_v51, %v14123_v62 }
 0x630   : > { %4462 = vxpose.xlu1.c.b16.start.end [1/1] (short) (narrow) %v12238_v28, 16  ;;  %v3366_v28 = vrot.slane %v3358_v17, %v14123_v62  ;;  %v14129_v17 = vpack.i.b16 %v12165_v55, %v12244_v11  ;;  %v3566_v21 = vrot.slane %v3558_v5, %v11584_v53  ;;  %v3559_v5 = vcombine.high %v3502_v37, %v3518_v3 }
 0x631   : > { %v3590_v20 = vcombine.low %v3534_v8, %v3550_v56 }
 0x632   : > { %4542 = vxpose.xlu0.c.b16.start.end [1/1] (short) (narrow) %v14124_v9, 16  ;;  %v3422_v0 = vcombine.low %v3366_v28, %v3382_v27  ;;  %v3423_v11 = vcombine.high %v3366_v28, %v3382_v27 }
 0x633   : > { %v3598_v51 = vrot.slane %v3590_v20, %v11584_v53  ;;  %v3511_v20 = vcombine.high %v14116_v4, %v14115_v29 }
 0x634   : > { %4494 = vxpose.xlu1.c.b16.start.end [1/1] (short) (narrow) %v12249_v7, 16  ;;  %v14128_v7 = vcombine.low %v14126_v6, %v14127_v43  ;;  %v3430_v45 = vrot.slane %v3422_v0, %v11584_v53  ;;  %v3591_v0 = vcombine.high %v3534_v8, %v3550_v56  ;;  %v3495_v56 = vcombine.high %v14122_v63, %v14121_v35 }
 0x635   : > { %v3622_v55 = vcombine.low %v3566_v21, %v3598_v51  ;;  %v3437_v37 = vrot.slane %v3423_v11, %v11584_v53  ;;  %v3525_v4 = vrot.slane %v3511_v20, %v14123_v62 }
 0x636   : > { %4574 = vxpose.xlu0.c.b16.start.end [1/1] (short) (narrow) %v14125_v36, 16  ;;  %v3462_v9 = vrot.slane %v14128_v7, %v11584_v53  ;;  %v3543_v36 = vcombine.high %v14113_v38, %v14112_v10  ;;  %v14130_v7 = vpack.i.b16 %v12180_v26, %v12247_v16  ;;  %v14131_v26 = vcombine.high %v14126_v6, %v14127_v43 }
 0x637   : > { %v3605_v29 = vrot.slane %v3591_v0, %v11584_v53  ;;  %v3509_v3 = vrot.slane %v3495_v56, %v14123_v62  ;;  %v4035_v43 = vshrl.u32 %v3622_v55, 16 }
 0x638   : > { %4526 = vxpose.xlu1.c.b16.start.end [1/1] (short) (narrow) %v12254_v52, 16  ;;  %v3486_v54 = vcombine.low %v3430_v45, %v3462_v9  ;;  %v3375_v52 = vcombine.high %v14111_v42, %v14110_v24  ;;  %v3527_v24 = vcombine.high %v14120_v30, %v14119_v23  ;;  %v3487_v10 = vcombine.high %v3430_v45, %v3462_v9 }
 0x639   : > { %v3469_v16 = vrot.slane %v14131_v26, %v11584_v53  ;;  %v3557_v38 = vrot.slane %v3543_v36, %v14123_v62  ;;  %v3574_v9 = vcombine.low %v3509_v3, %v3525_v4  ;;  %v3575_v56 = vcombine.high %v3509_v3, %v3525_v4 }
 0x63a   : > { %4606 = vxpose.xlu0.c.b16.start.end [1/1] (short) (narrow) %v14129_v17, 16  ;;  %v4032_v42 = vpack.i.b16 %v3622_v55, %v3486_v54  ;;  %v3389_v27 = vrot.slane %v3375_v52, %v14123_v62  ;;  %v3541_v63 = vrot.slane %v3527_v24, %v14123_v62  ;;  %v4034_v30 = vshrl.u32 %v3486_v54, 16  ;;  %v14133_v17 = vld [vmem:[#allocation41_spill] sm:$0xff] }
 0x63b   : > { %v3488_v23 = vcombine.low %v3437_v37, %v3469_v16  ;;  %v3489_v52 = vcombine.high %v3437_v37, %v3469_v16  ;;  %v4042_v36 = vshrl.u32 %v3487_v10, 16  ;;  %v3589_v4 = vrot.slane %v3575_v56, %v11584_v53  ;;  %v14145_v56 = vld [vmem:[#allocation42_spill] sm:$0xff] }
 0x63c   : > { %4558 = vxpose.xlu1.c.b16.start.end [1/1] (short) (narrow) %v12262_v18, 16  ;;  %v3359_v18 = vcombine.high %v14118_v25, %v14117_v59  ;;  %v3573_v59 = vrot.slane %v3559_v5, %v11584_v53  ;;  %v3606_v8 = vcombine.low %v3541_v63, %v3557_v38  ;;  %v3607_v26 = vcombine.high %v3541_v63, %v3557_v38 }
 0x63d   : > { %v4050_v5 = vshrl.u32 %v3488_v23, 16 }
 0x63e   : > { %4638 = vxpose.xlu0.c.b16.start.end [1/1] (short) (narrow) %v14130_v7, 16  ;;  %v3373_v25 = vrot.slane %v3359_v18, %v14123_v62  ;;  %v3624_v6 = vcombine.low %v3573_v59, %v3605_v29  ;;  %v4036_v7 = vpack.i.b16 %v4035_v43, %v4034_v30  ;;  %v3625_v54 = vcombine.high %v3573_v59, %v3605_v29 }
 0x63f   : > { %v3614_v0 = vrot.slane %v3606_v8, %v11584_v53  ;;  %v3582_v18 = vrot.slane %v3574_v9, %v11584_v53  ;;  %v4058_v30 = vshrl.u32 %v3489_v52, 16 }
 0x640   : > { %4590 = vxpose.xlu1.c.b16.start.end [1/1] (short) (narrow) %v12271_v58, 16  ;;  %v3623_v58 = vcombine.high %v3566_v21, %v3598_v51  ;;  %v3438_v28 = vcombine.low %v3373_v25, %v3389_v27  ;;  %v4048_v21 = vpack.i.b16 %v3624_v6, %v3488_v23  ;;  %v4056_v55 = vpack.i.b16 %v3625_v54, %v3489_v52 }
 0x641   : > { %v3626_v16 = vcombine.low %v3582_v18, %v3614_v0  ;;  %v4059_v38 = vshrl.u32 %v3625_v54, 16 }
 0x642   : > { %4670 = vxpose.xlu0.c.b16.start.end [1/1] (short) (narrow) %v4032_v42, 16  ;;  %v4040_v35 = vpack.i.b16 %v3623_v58, %v3487_v10  ;;  %v3446_v11 = vrot.slane %v3438_v28, %v11584_v53  ;;  %v4043_v20 = vshrl.u32 %v3623_v58, 16  ;;  %v3439_v42 = vcombine.high %v3373_v25, %v3389_v27 }
 0x643   : > { %v4051_v10 = vshrl.u32 %v3624_v6, 16  ;;  %v3627_v28 = vcombine.high %v3582_v18, %v3614_v0  ;;  %v3621_v27 = vrot.slane %v3607_v26, %v11584_v53  ;;  %v4060_v3 = vpack.i.b16 %v4059_v38, %v4058_v30  ;;  %v14148_v38 = vld [vmem:[#allocation43_spill] sm:$0xff] }
 0x644   : > { %4622 = vxpose.xlu1.c.b16.start.end [1/1] (short) (narrow) %v12273_v19, 16  ;;  %v14132_v19 = vld [vmem:[#allocation39_spill] sm:$0xff]  ;;  %v4044_v24 = vpack.i.b16 %v4043_v20, %v4042_v36  ;;  %v3453_v23 = vrot.slane %v3439_v42, %v11584_v53  ;;  %v4067_v43 = vshrl.u32 %v3626_v16, 16  ;;  %v14136_v20 = vpack.i.b16 %v11887_v1, %v12315_v33 }
 0x645   : > { %v14134_v45 = vcombine.low %v14132_v19, %v14133_v17  ;;  %v14135_v37 = vcombine.high %v14132_v19, %v14133_v17  ;;  %v3628_v6 = vcombine.low %v3589_v4, %v3621_v27  ;;  %v14137_v18 = vpack.i.b16 %v11889_v49, %v12317_v50 }
 0x646   : > { %4702 = vxpose.xlu0.c.b16.start.end [1/1] (short) (narrow) %v4040_v35, 16  ;;  %v4052_v35 = vpack.i.b16 %v4051_v10, %v4050_v5  ;;  %v14138_v5 = vpack.i.b16 %v11932_v2, %v12319_v40  ;;  %v14139_v1 = vpack.i.b16 %v11934_v22, %v12321_v57  ;;  %v14140_v49 = vpack.i.b16 %v11939_v15, %v12345_v60  ;;  %v14143_v15 = vld [vmem:[#allocation19_spill] sm:$0xff] }
 0x647   : > { %v3478_v51 = vrot.slane %v14134_v45, %v11584_v53  ;;  %v3485_v29 = vrot.slane %v14135_v37, %v11584_v53  ;;  %v4083_v54 = vshrl.u32 %v3628_v6, 16  ;;  %v14141_v40 = vpack.i.b16 %v11941_v32, %v12352_v14  ;;  %v10927_v32 = vld [vmem:[%s11292_s7] sm:$0x7] }
 0x648   : > { %4654 = vxpose.xlu1.c.b16.start.end [1/1] (short) (narrow) %v12280_v41, 16  ;;  %v1785_v60 = vsub.s32 2, %v14143_v15 }
 0x649   : > { %v3490_v41 = vcombine.low %v3446_v11, %v3478_v51  ;;  %v3491_v59 = vcombine.high %v3446_v11, %v3478_v51  ;;  %v3492_v63 = vcombine.low %v3453_v23, %v3485_v29  ;;  %v3493_v19 = vcombine.high %v3453_v23, %v3485_v29 }
 0x64a   : > { %4734 = vxpose.xlu0.c.b16.start.end [1/1] (short) (narrow) %v4048_v21, 16  ;;  %v3629_v51 = vcombine.high %v3589_v4, %v3621_v27  ;;  %v4075_v21 = vshrl.u32 %v3627_v28, 16  ;;  %v1786_v14 = vrot.slane %v10927_v32, %v1785_v60 }
 0x64b   : > { %v4064_v58 = vpack.i.b16 %v3626_v16, %v3490_v41  ;;  %v4072_v25 = vpack.i.b16 %v3627_v28, %v3491_v59  ;;  %v4066_v8 = vshrl.u32 %v3490_v41, 16  ;;  %v4080_v9 = vpack.i.b16 %v3628_v6, %v3492_v63 }
 0x64c   : > { %4686 = vxpose.xlu1.c.b16.start.end [1/1] (short) (narrow) %v4036_v7, 16  ;;  %v4074_v45 = vshrl.u32 %v3491_v59, 16  ;;  %v4088_v52 = vpack.i.b16 %v3629_v51, %v3493_v19  ;;  %v4082_v7 = vshrl.u32 %v3492_v63, 16  ;;  %v4090_v0 = vshrl.u32 %v3493_v19, 16 }
 0x64d   : > { %v4068_v17 = vpack.i.b16 %v4067_v43, %v4066_v8  ;;  %v14144_v16 = vpack.i.b16 %v14106_v13, %v12369_v12  ;;  %v12510_v37 = vadd.f32 %v14145_v56, %v1786_v14  ;;  %v14147_v13 = vld [vmem:[#allocation37_spill] sm:$0xff] }
 0x64e   : > { %4766 = vxpose.xlu0.c.b16.start.end [1/1] (short) (narrow) %v4056_v55, 16  ;;  %v4076_v36 = vpack.i.b16 %v4075_v21, %v4074_v45  ;;  %v4084_v11 = vpack.i.b16 %v4083_v54, %v4082_v7  ;;  %v4091_v55 = vshrl.u32 %v3629_v51, 16 }
 0x650   : > { %4718 = vxpose.xlu1.c.b16.start.end [1/1] (short) (narrow) %v4044_v24, 16  ;;  %v4092_v41 = vpack.i.b16 %v4091_v55, %v4090_v0 }
 0x652   : > { %4798 = vxpose.xlu0.c.b16.start.end [1/1] (short) (narrow) %v4064_v58, 16 }
 0x654   : > { %4750 = vxpose.xlu1.c.b16.start.end [1/1] (short) (narrow) %v4052_v35, 16 }
 0x656   : > { %4830 = vxpose.xlu0.c.b16.start.end [1/1] (short) (narrow) %v4072_v25, 16  ;;  %v12520_v25 = vadd.f32 %v14148_v38, %v1786_v14 }
 0x658   : > { %4782 = vxpose.xlu1.c.b16.start.end [1/1] (short) (narrow) %v4060_v3, 16 }
 0x65a   : > { %4862 = vxpose.xlu0.c.b16.start.end [1/1] (short) (narrow) %v4080_v9, 16 }
 0x65c   : > { %4814 = vxpose.xlu1.c.b16.start.end [1/1] (short) (narrow) %v4068_v17, 16 }
 0x65e   : > { %4894 = vxpose.xlu0.c.b16.start.end [1/1] (short) (narrow) %v4088_v52, 16 }
 0x660   : > { %4846 = vxpose.xlu1.c.b16.start.end [1/1] (short) (narrow) %v4076_v36, 16 }
 0x662   : > { %4926 = vxpose.xlu0.c.b16.start.end [1/1] (short) (narrow) %v14136_v20, 16 }
 0x664   : > { %4878 = vxpose.xlu1.c.b16.start.end [1/1] (short) (narrow) %v4084_v11, 16 }
 0x666   : > { %4958 = vxpose.xlu0.c.b16.start.end [1/1] (short) (narrow) %v14137_v18, 16 }
 0x668   : > { %4910 = vxpose.xlu1.c.b16.start.end [1/1] (short) (narrow) %v4092_v41, 16 }
 0x66a   : > { %4990 = vxpose.xlu0.c.b16.start.end [1/1] (short) (narrow) %v14138_v5, 16 }
 0x66c   : > { %4942 = vxpose.xlu1.c.b16.start.end [1/1] (short) (narrow) %v12347_v39, 16  ;;  %v4230_v24 = vpop.trf.xlu0  ;;  %v14142_v39 = vpack.i.b16 %v14105_v46, %v12359_v47  ;;  %v14146_v47 = vld [vmem:[#allocation36_spill] sm:$0xff] }
 0x66d   : > { %v4166_v42 = vpop.trf.xlu1 }
 0x66e   : > { %5022 = vxpose.xlu0.c.b16.start.end [1/1] (short) (narrow) %v14139_v1, 16  ;;  %v5182_v58 = vcombine.low %v4166_v42, %v4230_v24 }
 0x670   : > { %4974 = vxpose.xlu1.c.b16.start.end [1/1] (short) (narrow) %v12349_v31, 16  ;;  %v4262_v33 = vpop.trf.xlu0  ;;  %v5189_v27 = vrot.slane %v5182_v58, %v14123_v62 }
 0x671   : > { %v4198_v26 = vpop.trf.xlu1 }
 0x672   : > { %5054 = vxpose.xlu0.c.b16.start.end [1/1] (short) (narrow) %v14140_v49, 16  ;;  %v5190_v35 = vcombine.low %v4198_v26, %v4262_v33 }
 0x674   : > { %5006 = vxpose.xlu1.c.b16.start.end [1/1] (short) (narrow) %v12354_v48, 16  ;;  %v4294_v2 = vpop.trf.xlu0  ;;  %v5197_v4 = vrot.slane %v5190_v35, %v14123_v62 }
 0x676   : > { %v4214_v50 = vpop.trf.xlu1  ;;  %5086 = vxpose.xlu0.c.b16.start.end [1/1] (short) (narrow) %v14141_v40, 16  ;;  %v5214_v17 = vcombine.low %v5189_v27, %v5197_v4 }
 0x678   : > { %5038 = vxpose.xlu1.c.b16.start.end [1/1] (short) (narrow) %v12364_v61, 16  ;;  %v4326_v22 = vpop.trf.xlu0  ;;  %v5221_v11 = vrot.slane %v5214_v17, %v11584_v53 }
 0x67a   : > { %v4246_v57 = vpop.trf.xlu1  ;;  %5118 = vxpose.xlu0.c.b16.start.end [1/1] (short) (narrow) %v14142_v39, 16 }
 0x67c   : > { %5070 = vxpose.xlu1.c.b16.start.end [1/1] (short) (narrow) %v12371_v34, 16  ;;  %v4358_v31 = vpop.trf.xlu0 }
 0x67d   : > { %v5198_v34 = vcombine.low %v4294_v2, %v4358_v31 }
 0x67e   : > { %v4278_v48 = vpop.trf.xlu1  ;;  %5150 = vxpose.xlu0.c.b16.start.end [1/1] (short) (narrow) %v14144_v16, 16 }
 0x67f   : > { %v5239_v30 = vcombine.low %v4214_v50, %v4278_v48  ;;  %v14149_v50 = vmov 0.0  }
 0x680   : > { %5102 = vxpose.xlu1.c.b16.start.end [1/1] (short) (narrow) %v12377_v44, 16  ;;  %v4390_v61 = vpop.trf.xlu0  ;;  %v5205_v44 = vrot.slane %v5198_v34, %v14123_v62 }
 0x681   : > { %v5206_v46 = vcombine.low %v4326_v22, %v4390_v61  ;;  %v5246_v3 = vrot.slane %v5239_v30, %v14123_v62 }
 0x682   : > { %v4310_v10 = vpop.trf.xlu1 }
 0x683   : > { %v5213_v28 = vrot.slane %v5206_v46, %v14123_v62 }
 0x684   : > { %5134 = vxpose.xlu1.c.b16.start.end [1/1] (short) (narrow) %v14146_v47, 16  ;;  %v4182_v29 = vpop.trf.xlu0 }
 0x685   : > { %v5231_v12 = vcombine.low %v4182_v29, %v4246_v57  ;;  %v5222_v43 = vcombine.low %v5205_v44, %v5213_v28 }
 0x686   : > { %v4342_v59 = vpop.trf.xlu1 }
 0x687   : > { %2284 = vrot.lane.b32.xlu0 %v12510_v37, %s11039_s29  ;;  %v5238_v8 = vrot.slane %v5231_v12, %v14123_v62  ;;  %v5229_v52 = vrot.slane %v5222_v43, %v11584_v53 }
 0x688   : > { %5166 = vxpose.xlu1.c.b16.start.end [1/1] (short) (narrow) %v14147_v13, 16  ;;  %v4422_v23 = vpop.trf.xlu0 }
 0x689   : > { %v5263_v45 = vcombine.low %v5238_v8, %v5246_v3  ;;  %v5230_v55 = vcombine.low %v5221_v11, %v5229_v52 }
 0x68a   : > { %v4374_v63 = vpop.trf.xlu1 }
 0x68b   : > { %v5247_v6 = vcombine.low %v4310_v10, %v4374_v63  ;;  %v5270_v0 = vrot.slane %v5263_v45, %v11584_v53  ;;  %v5578_v33 = vshrl.u32 %v5230_v55, 16 }
 0x68c   : > { %2286 = vrot.lane.b32.xlu1 %v12520_v25, %s11039_s29  ;;  %v4454_v9 = vpop.trf.xlu0 }
 0x68d   : > { %v5254_v51 = vrot.slane %v5247_v6, %v14123_v62 }
 0x68e   : > { %v4406_v19 = vpop.trf.xlu1 }
 0x68f   : > { %v5255_v21 = vcombine.low %v4342_v59, %v4406_v19 }
 0x690   : > { %v4486_v7 = vpop.trf.xlu0 }
 0x691   : > { %v5262_v36 = vrot.slane %v5255_v21, %v14123_v62  ;;  %v5280_v48 = vcombine.low %v4422_v23, %v4486_v7 }
 0x692   : > { %v4438_v54 = vpop.trf.xlu1 }
 0x693   : > { %v5271_v20 = vcombine.low %v5254_v51, %v5262_v36  ;;  %v5287_v46 = vrot.slane %v5280_v48, %v14123_v62 }
 0x694   : > { %v4518_v18 = vpop.trf.xlu0 }
 0x695   : > { %v5278_v41 = vrot.slane %v5271_v20, %v11584_v53  ;;  %v5288_v14 = vcombine.low %v4454_v9, %v4518_v18 }
 0x696   : > { %v4470_v5 = vpop.trf.xlu1 }
 0x697   : > { %v5279_v24 = vcombine.low %v5270_v0, %v5278_v41  ;;  %v5295_v58 = vrot.slane %v5288_v14, %v14123_v62 }
 0x698   : > { %v4550_v42 = vpop.trf.xlu0 }
 0x699   : > { %v5576_v1 = vpack.i.b16 %v5279_v24, %v5230_v55  ;;  %v5579_v26 = vshrl.u32 %v5279_v24, 16  ;;  %v5312_v28 = vcombine.low %v5287_v46, %v5295_v58 }
 0x69a   : > { %v4502_v49 = vpop.trf.xlu1 }
 0x69b   : > { %10609 = vmatpush3.bf16.msra.mxu1 %v5576_v1  ;;  %v12533_v2 = vpack.i.b16 %v5579_v26, %v5578_v33  ;;  %v5329_v61 = vcombine.low %v4438_v54, %v4502_v49  ;;  %v5319_v6 = vrot.slane %v5312_v28, %v11584_v53 }
 0x69c   : > { %10610 = vmatprep.subr.bf16.mxu1 %v14149_v50  ;;  %v4582_v40 = vpop.trf.xlu0 }
 0x69d   : > { %v5336_v59 = vrot.slane %v5329_v61, %v14123_v62 }
 0x69e   : > { %v4534_v22 = vpop.trf.xlu1 }
 0x69f   : > { %v5337_v10 = vcombine.low %v4470_v5, %v4534_v22 }
 0x6a0   : > { %v4614_v57 = vpop.trf.xlu0 }
 0x6a1   : > { %v5296_v60 = vcombine.low %v4550_v42, %v4614_v57  ;;  %v5344_v35 = vrot.slane %v5337_v10, %v14123_v62 }
 0x6a2   : > { %v4566_v39 = vpop.trf.xlu1 }
 0x6a3   : > { %v5303_v56 = vrot.slane %v5296_v60, %v14123_v62  ;;  %v5361_v23 = vcombine.low %v5336_v59, %v5344_v35 }
 0x6a4   : > { %v4646_v31 = vpop.trf.xlu0 }
 0x6a5   : > { %v5304_v16 = vcombine.low %v4582_v40, %v4646_v31  ;;  %v5368_v43 = vrot.slane %v5361_v23, %v11584_v53 }
 0x6a6   : > { %v4598_v32 = vpop.trf.xlu1 }
 0x6a7   : > { %v5311_v47 = vrot.slane %v5304_v16, %v14123_v62 }
 0x6a8   : > { %v4678_v34 = vpop.trf.xlu0 }
 0x6a9   : > { %v5320_v12 = vcombine.low %v5303_v56, %v5311_v47 }
 0x6aa   : > { %v4630_v29 = vpop.trf.xlu1 }
 0x6ab   : > { %v5345_v30 = vcombine.low %v4566_v39, %v4630_v29  ;;  %v5327_v63 = vrot.slane %v5320_v12, %v11584_v53 }
 0x6ac   : > { %v4710_v13 = vpop.trf.xlu0 }
 0x6ad   : > { %v5352_v27 = vrot.slane %v5345_v30, %v14123_v62  ;;  %v5328_v45 = vcombine.low %v5319_v6, %v5327_v63 }
 0x6ae   : > { %v4662_v44 = vpop.trf.xlu1 }
 0x6af   : > { %v5353_v38 = vcombine.low %v4598_v32, %v4662_v44  ;;  %v5586_v7 = vshrl.u32 %v5328_v45, 16 }
 0x6b0   : > { %v4742_v3 = vpop.trf.xlu0 }
 0x6b1   : > { %v5360_v4 = vrot.slane %v5353_v38, %v14123_v62  ;;  %v5378_v49 = vcombine.low %v4678_v34, %v4742_v3 }
 0x6b2   : > { %v4694_v8 = vpop.trf.xlu1 }
 0x6b3   : > { %v5369_v9 = vcombine.low %v5352_v27, %v5360_v4  ;;  %v5385_v32 = vrot.slane %v5378_v49, %v14123_v62 }
 0x6b4   : > { %v4774_v17 = vpop.trf.xlu0 }
 0x6b5   : > { %v5376_v19 = vrot.slane %v5369_v9, %v11584_v53  ;;  %v5386_v40 = vcombine.low %v4710_v13, %v4774_v17 }
 0x6b6   : > { %v4726_v51 = vpop.trf.xlu1 }
 0x6b7   : > { %v5377_v21 = vcombine.low %v5368_v43, %v5376_v19  ;;  %v5393_v14 = vrot.slane %v5386_v40, %v14123_v62 }
 0x6b8   : > { %v4806_v52 = vpop.trf.xlu0 }
 0x6b9   : > { %v5584_v36 = vpack.i.b16 %v5377_v21, %v5328_v45  ;;  %v5587_v54 = vshrl.u32 %v5377_v21, 16  ;;  %v5410_v29 = vcombine.low %v5385_v32, %v5393_v14 }
 0x6ba   : > { %v4758_v11 = vpop.trf.xlu1 }
 0x6bb   : > { %10611 = vmatpush3.bf16.msra.mxu1 %v5584_v36  ;;  %v12548_v0 = vpack.i.b16 %v5587_v54, %v5586_v7  ;;  %v5427_v24 = vcombine.low %v4694_v8, %v4758_v11  ;;  %v5417_v44 = vrot.slane %v5410_v29, %v11584_v53  ;;  %v14151_v29 = vld [vmem:[#allocation21_spill] sm:$0xff] }
 0x6bc   : > { %10612 = vmatprep.subr.bf16.mxu1 %v14149_v50  ;;  %v4838_v20 = vpop.trf.xlu0 }
 0x6bd   : > { %v5434_v57 = vrot.slane %v5427_v24, %v14123_v62 }
 0x6be   : > { %v4790_v55 = vpop.trf.xlu1 }
 0x6bf   : > { %v5435_v1 = vcombine.low %v4726_v51, %v4790_v55 }
 0x6c0   : > { %v4870_v41 = vpop.trf.xlu0 }
 0x6c1   : > { %v5394_v33 = vcombine.low %v4806_v52, %v4870_v41  ;;  %v5442_v60 = vrot.slane %v5435_v1, %v14123_v62 }
 0x6c2   : > { %v4822_v18 = vpop.trf.xlu1 }
 0x6c3   : > { %v5401_v31 = vrot.slane %v5394_v33, %v14123_v62  ;;  %v5459_v56 = vcombine.low %v5434_v57, %v5442_v60 }
 0x6c4   : > { %v4902_v5 = vpop.trf.xlu0 }
 0x6c5   : > { %v5402_v26 = vcombine.low %v4838_v20, %v4902_v5  ;;  %v5466_v30 = vrot.slane %v5459_v56, %v11584_v53  ;;  %v2297_v56 = vrot.slane %v12510_v37, %v14123_v62 }
 0x6c6   : > { %v4854_v42 = vpop.trf.xlu1 }
 0x6c7   : > { %v5409_v48 = vrot.slane %v5402_v26, %v14123_v62 }
 0x6c8   : > { %v4934_v22 = vpop.trf.xlu0 }
 0x6c9   : > { %v5418_v47 = vcombine.low %v5401_v31, %v5409_v48 }
 0x6ca   : > { %v4886_v39 = vpop.trf.xlu1 }
 0x6cb   : > { %v5443_v16 = vcombine.low %v4822_v18, %v4886_v39  ;;  %v5425_v12 = vrot.slane %v5418_v47, %v11584_v53 }
 0x6cc   : > { %v4966_v61 = vpop.trf.xlu0 }
 0x6cd   : > { %v5450_v34 = vrot.slane %v5443_v16, %v14123_v62  ;;  %v12563_v38 = vcombine.low %v5417_v44, %v5425_v12 }
 0x6ce   : > { %v4918_v10 = vpop.trf.xlu1 }
 0x6cf   : > { %v5451_v46 = vcombine.low %v4854_v42, %v4918_v10 }
 0x6d0   : > { %v4998_v59 = vpop.trf.xlu0 }
 0x6d1   : > { %v5458_v58 = vrot.slane %v5451_v46, %v14123_v62  ;;  %v5476_v7 = vcombine.low %v4934_v22, %v4998_v59  ;;  %v14150_v46 = vld [vmem:[#allocation22_spill] sm:$0xff] }
 0x6d2   : > { %v4950_v35 = vpop.trf.xlu1 }
 0x6d3   : > { %v5467_v13 = vcombine.low %v5450_v34, %v5458_v58  ;;  %v5483_v24 = vrot.slane %v5476_v7, %v14123_v62  ;;  %v14152_v58 = vpack.i.b16 %v14150_v46, %v14151_v29 }
 0x6d4   : > { %v5030_v23 = vpop.trf.xlu0 }
 0x6d5   : > { %v5474_v28 = vrot.slane %v5467_v13, %v11584_v53  ;;  %v5484_v54 = vcombine.low %v4966_v61, %v5030_v23 }
 0x6d6   : > { %v4982_v27 = vpop.trf.xlu1 }
 0x6d7   : > { %v12565_v63 = vcombine.low %v5466_v30, %v5474_v28  ;;  %v5491_v42 = vrot.slane %v5484_v54, %v14123_v62  ;;  %v5594_v28 = vshrl.u32 %v12563_v38, 16 }
 0x6d8   : > { %v5062_v4 = vpop.trf.xlu0 }
 0x6d9   : > { %v5592_v3 = vpack.i.b16 %v12565_v63, %v12563_v38  ;;  %v5508_v22 = vcombine.low %v5483_v24, %v5491_v42  ;;  %v5595_v12 = vshrl.u32 %v12565_v63, 16 }
 0x6da   : > { %v5014_v8 = vpop.trf.xlu1 }
 0x6db   : > { %10613 = vmatpush3.bf16.msra.mxu1 %v5592_v3  ;;  %v5525_v45 = vcombine.low %v4950_v35, %v5014_v8  ;;  %v5515_v48 = vrot.slane %v5508_v22, %v11584_v53 }
 0x6dc   : > { %10614 = vmatprep.subr.bf16.mxu1 %v14149_v50  ;;  %v5094_v6 = vpop.trf.xlu0 }
 0x6dd   : > { %v5532_v11 = vrot.slane %v5525_v45, %v14123_v62 }
 0x6de   : > { %v5046_v43 = vpop.trf.xlu1 }
 0x6df   : > { %v5533_v21 = vcombine.low %v4982_v27, %v5046_v43  ;;  %v14153_v43 = vld [vmem:[#allocation23_spill] sm:$0xff] }
 0x6e0   : > { %v5126_v9 = vpop.trf.xlu0 }
 0x6e1   : > { %v5492_v52 = vcombine.low %v5062_v4, %v5126_v9  ;;  %v5540_v55 = vrot.slane %v5533_v21, %v14123_v62 }
 0x6e2   : > { %v5078_v19 = vpop.trf.xlu1 }
 0x6e3   : > { %v5499_v41 = vrot.slane %v5492_v52, %v14123_v62  ;;  %v5557_v33 = vcombine.low %v5532_v11, %v5540_v55 }
 0x6e4   : > { %v5158_v17 = vpop.trf.xlu0 }
 0x6e5   : > { %v5500_v36 = vcombine.low %v5094_v6, %v5158_v17  ;;  %v5564_v39 = vrot.slane %v5557_v33, %v11584_v53 }
 0x6e6   : > { %v5110_v51 = vpop.trf.xlu1 }
 0x6e7   : > { %v5507_v18 = vrot.slane %v5500_v36, %v14123_v62 }
 0x6e9   : > { %v5516_v26 = vcombine.low %v5499_v41, %v5507_v18 }
 0x6ea   : > { %v5142_v20 = vpop.trf.xlu1 }
 0x6eb   : > { %v5541_v5 = vcombine.low %v5078_v19, %v5142_v20  ;;  %v5523_v60 = vrot.slane %v5516_v26, %v11584_v53  ;;  %v2363_v20 = vrot.slane %v12520_v25, %v14123_v62 }
 0x6ed   : > { %v5548_v49 = vrot.slane %v5541_v5, %v14123_v62  ;;  %v5524_v32 = vcombine.low %v5515_v48, %v5523_v60 }
 0x6ee   : > { %v5174_v1 = vpop.trf.xlu1 }
 0x6ef   : > { %v5549_v40 = vcombine.low %v5110_v51, %v5174_v1  ;;  %v5602_v3 = vshrl.u32 %v5524_v32, 16 }
 0x6f1   : > { %v5556_v57 = vrot.slane %v5549_v40, %v14123_v62  ;;  %v2356_v40 = vcombine.high %v12520_v25, %v14149_v50 }
 0x6f3   : > { %v5565_v31 = vcombine.low %v5548_v49, %v5556_v57 }
 0x6f5   : > { %v5572_v16 = vrot.slane %v5565_v31, %v11584_v53 }
 0x6f7   : > { %v5573_v14 = vcombine.low %v5564_v39, %v5572_v16  ;;  %v2370_v39 = vrot.slane %v2356_v40, %v14123_v62 }
 0x6f9   : > { %v5600_v61 = vpack.i.b16 %v5573_v14, %v5524_v32  ;;  %v2285_v10 = vpop.permute.xlu0 %2284  ;;  %v5603_v23 = vshrl.u32 %v5573_v14, 16 }
 0x6fa   : > { %v2312_v47 = vrot.slane %v2285_v10, %v14123_v62  ;;  %v2305_v4 = vcombine.high %v2285_v10, %v14149_v50 }
 0x6fb   : > { %10615 = vmatpush3.bf16.msra.mxu1 %v5600_v61  ;;  %v5604_v63 = vpack.i.b16 %v5603_v23, %v5602_v3 }
 0x6fc   : > { %10620 = vmatprep.subr.bf16.mxu1 %v14149_v50  ;;  %v2320_v34 = vcombine.low %v2297_v56, %v2312_v47  ;;  %v2321_v13 = vcombine.high %v2297_v56, %v2312_v47  ;;  %v2319_v38 = vrot.slane %v2305_v4, %v14123_v62 }
 0x6fe   : > { %10617 = vmatmul.mubr.msk.bf16.vlgmr.msra.gmra.mrb[4].mxu1 %vm5606_vm6, %v14152_v58  ;;  %v2328_v59 = vrot.slane %v2320_v34, %v11584_v53  ;;  %v2335_v27 = vrot.slane %v2321_v13, %v11584_v53  ;;  %v2287_v7 = vpop.permute.xlu1 %2286 }
 0x6ff   : > { %10621 = vmatpush3.bf16.msra.mxu1 %v12533_v2  ;;  %10628 = vmatprep.mubr.msk.bf16.mxu1 %vm11042_vm5, %v14149_v50  ;;  %v5596_v2 = vpack.i.b16 %v5595_v12, %v5594_v28  ;;  %v2378_v11 = vrot.slane %v2287_v7, %v14123_v62  ;;  %v2371_v49 = vcombine.high %v2287_v7, %v14149_v50 }
 0x700   : > { %10622 = vmatprep.subr.bf16.mxu1 %v14149_v50  ;;  %v5742_v35 = vpack.c.bf16 %v2328_v59, %v2328_v59  ;;  %v2352_v30 = vcombine.high %v2328_v59, %v14149_v50  ;;  %v2353_v8 = vcombine.high %v2335_v27, %v14149_v50  ;;  %v5744_v17 = vpack.c.bf16 %v2335_v27, %v2335_v27 }
 0x701   : > { %v2386_v41 = vcombine.low %v2363_v20, %v2378_v11  ;;  %v2387_v1 = vcombine.high %v2363_v20, %v2378_v11  ;;  %v2385_v57 = vrot.slane %v2371_v49, %v14123_v62 }
 0x702   : > { %5758 = vxpose.xlu1.c.b16.start.end [1/1] (short) (narrow) %v5742_v35, 64  ;;  %v5743_v44 = vpack.c.bf16 %v2352_v30, %v2352_v30  ;;  %v5745_v9 = vpack.c.bf16 %v2353_v8, %v2353_v8 }
 0x703   : > { %10623 = vmatpush3.bf16.msra.mxu1 %v12548_v0  ;;  %v2290_v0 = vcombine.high %v12510_v37, %v14149_v50  ;;  %v2394_v5 = vrot.slane %v2386_v41, %v11584_v53  ;;  %v2401_v26 = vrot.slane %v2387_v1, %v11584_v53  ;;  %v2402_v31 = vcombine.low %v2370_v39, %v2385_v57 }
 0x704   : > { %10624 = vmatprep.subr.bf16.mxu1 %v14149_v50  ;;  %5774 = vxpose.xlu0.c.b16.start.end [1/1] (short) (narrow) %v5743_v44, 64  ;;  %v2403_v61 = vcombine.high %v2370_v39, %v2385_v57 }
 0x705   : > { %v2304_v6 = vrot.slane %v2290_v0, %v14123_v62  ;;  %v2418_v24 = vcombine.high %v2394_v5, %v14149_v50  ;;  %v5750_v33 = vpack.c.bf16 %v2394_v5, %v2394_v5  ;;  %v2419_v22 = vcombine.high %v2401_v26, %v14149_v50 }
 0x706   : > { %v5752_v48 = vpack.c.bf16 %v2401_v26, %v2401_v26  ;;  %v2410_v16 = vrot.slane %v2402_v31, %v11584_v53  ;;  %v2417_v25 = vrot.slane %v2403_v61, %v11584_v53 }
 0x707   : > { %10625 = vmatpush3.bf16.msra.mxu1 %v5596_v2  ;;  %v2336_v19 = vcombine.low %v2304_v6, %v2319_v38  ;;  %v2337_v21 = vcombine.high %v2304_v6, %v2319_v38  ;;  %v5751_v42 = vpack.c.bf16 %v2418_v24, %v2418_v24  ;;  %v5753_v60 = vpack.c.bf16 %v2419_v22, %v2419_v22 }
 0x708   : > { %10626 = vmatprep.subr.bf16.mxu1 %v14149_v50  ;;  %v2420_v32 = vcombine.high %v2410_v16, %v14149_v50  ;;  %v5754_v10 = vpack.c.bf16 %v2410_v16, %v2410_v16  ;;  %v2421_v56 = vcombine.high %v2417_v25, %v14149_v50  ;;  %v5756_v34 = vpack.c.bf16 %v2417_v25, %v2417_v25 }
 0x709   : > { %v2344_v45 = vrot.slane %v2336_v19, %v11584_v53  ;;  %v2351_v36 = vrot.slane %v2337_v21, %v11584_v53 }
 0x70a   : > { %v5755_v14 = vpack.c.bf16 %v2420_v32, %v2420_v32  ;;  %v5757_v47 = vpack.c.bf16 %v2421_v56, %v2421_v56 }
 0x70b   : > { %10627 = vmatpush3.bf16.msra.mxu1 %v5604_v63  ;;  %v2354_v37 = vcombine.high %v2344_v45, %v14149_v50  ;;  %v5746_v52 = vpack.c.bf16 %v2344_v45, %v2344_v45  ;;  %v2355_v54 = vcombine.high %v2351_v36, %v14149_v50  ;;  %v5748_v18 = vpack.c.bf16 %v2351_v36, %v2351_v36 }
 0x70d   : > { %v5747_v51 = vpack.c.bf16 %v2354_v37, %v2354_v37  ;;  %v5749_v55 = vpack.c.bf16 %v2355_v54, %v2355_v54 }
 0x70e   : > { %10629 = vmatmul.mubr.msk.bf16.vlgmr.msra.gmra.mrb[8].mxu1 %vm5606_vm6, %v14153_v43 }
 0x70f   : > { %5806 = vxpose.xlu1.c.b16.start.end [1/1] (short) (narrow) %v5745_v9, 64 }
 0x711   : > { %5790 = vxpose.xlu0.c.b16.start.end [1/1] (short) (narrow) %v5744_v17, 64 }
 0x71c   : > { %5838 = vxpose.xlu1.c.b16.start.end [1/1] (short) (narrow) %v5747_v51, 64 }
 0x71e   : > { %5822 = vxpose.xlu0.c.b16.start.end [1/1] (short) (narrow) %v5746_v52, 64 }
 0x729   : > { %5870 = vxpose.xlu1.c.b16.start.end [1/1] (short) (narrow) %v5749_v55, 64 }
 0x72b   : > { %5854 = vxpose.xlu0.c.b16.start.end [1/1] (short) (narrow) %v5748_v18, 64 }
 0x736   : > { %5902 = vxpose.xlu1.c.b16.start.end [1/1] (short) (narrow) %v5751_v42, 64 }
 0x738   : > { %5886 = vxpose.xlu0.c.b16.start.end [1/1] (short) (narrow) %v5750_v33, 64 }
 0x743   : > { %5934 = vxpose.xlu1.c.b16.start.end [1/1] (short) (narrow) %v5753_v60, 64 }
 0x745   : > { %5918 = vxpose.xlu0.c.b16.start.end [1/1] (short) (narrow) %v5752_v48, 64 }
 0x750   : > { %5966 = vxpose.xlu1.c.b16.start.end [1/1] (short) (narrow) %v5755_v14, 64 }
 0x752   : > { %5950 = vxpose.xlu0.c.b16.start.end [1/1] (short) (narrow) %v5754_v10, 64 }
 0x75d   : > { %5998 = vxpose.xlu1.c.b16.start.end [1/1] (short) (narrow) %v5757_v47, 64 }
 0x75f   : > { %5982 = vxpose.xlu0.c.b16.start.end [1/1] (short) (narrow) %v5756_v34, 64 }
 0x768   : > { %v12630_v46 = vpop.trf.xlu1 }
 0x76a   : > { %v12632_v29 = vpop.trf.xlu0 }
 0x76c   : > { %v12634_v58 = vpop.trf.xlu1 }
 0x76e   : > { %v12636_v59 = vpop.trf.xlu0 }
 0x770   : > { %v12638_v35 = vpop.trf.xlu1 }
 0x772   : > { %v12640_v30 = vpop.trf.xlu0 }
 0x773   : > { %14154 = vst [vmem:[#allocation33_spill] sm:$0xff] %v12640_v30 }
 0x774   : > { %v12642_v12 = vpop.trf.xlu1 }
 0x776   : > { %v12644_v13 = vpop.trf.xlu0 }
 0x778   : > { %v12646_v44 = vpop.trf.xlu1 }
 0x77a   : > { %v12648_v28 = vpop.trf.xlu0 }
 0x77c   : > { %v12650_v2 = vpop.trf.xlu1 }
 0x77e   : > { %v12652_v23 = vpop.trf.xlu0 }
 0x780   : > { %v12654_v27 = vpop.trf.xlu1 }
 0x782   : > { %v12656_v4 = vpop.trf.xlu0 }
 0x784   : > { %v12658_v3 = vpop.trf.xlu1 }
 0x786   : > { %v12660_v0 = vpop.trf.xlu0 }
 0x788   : > { %v12662_v63 = vpop.trf.xlu1 }
 0x789   : > { %v6150_v60 = vcombine.low %v12632_v29, %v12662_v63  ;;  %v6151_v1 = vcombine.high %v12632_v29, %v12662_v63 }
 0x78a   : > { %v12664_v8 = vpop.trf.xlu0 }
 0x78b   : > { %v6014_v50 = vcombine.low %v12630_v46, %v12664_v8 }
 0x78c   : > { %v12666_v38 = vpop.trf.xlu1 }
 0x78d   : > { %v6423_v29 = vcombine.high %v12636_v59, %v12666_v38 }
 0x78e   : > { %v12668_v6 = vpop.trf.xlu0 }
 0x78f   : > { %v6286_v63 = vcombine.low %v12634_v58, %v12668_v6 }
 0x790   : > { %v12670_v43 = vpop.trf.xlu1 }
 0x791   : > { %14155 = vst [vmem:[#allocation24_spill] sm:$0xff] %v12670_v43  ;;  %v6695_v36 = vcombine.high %v12640_v30, %v12670_v43 }
 0x792   : > { %v12672_v9 = vpop.trf.xlu0 }
 0x793   : > { %v6559_v11 = vcombine.high %v12638_v35, %v12672_v9  ;;  %v12699_v55 = vrot.slane %v6695_v36, %v14123_v62 }
 0x794   : > { %v12674_v19 = vpop.trf.xlu1 }
 0x795   : > { %14156 = vst [vmem:[#allocation35_spill] sm:$0xff] %v12699_v55  ;;  %v6967_v41 = vcombine.high %v12644_v13, %v12674_v19  ;;  %v12715_v33 = vrot.slane %v6559_v11, %v14123_v62 }
 0x796   : > { %v12676_v17 = vpop.trf.xlu0 }
 0x797   : > { %14158 = vst [vmem:[#allocation28_spill] sm:$0xff] %v12715_v33  ;;  %v6831_v26 = vcombine.high %v12642_v12, %v12676_v17  ;;  %v12728_v57 = vrot.slane %v6967_v41, %v14123_v62 }
 0x798   : > { %v12678_v45 = vpop.trf.xlu1 }
 0x799   : > { %v12739_v16 = vrot.slane %v6831_v26, %v14123_v62 }
 0x79a   : > { %v12680_v37 = vpop.trf.xlu0 }
 0x79c   : > { %v12682_v51 = vpop.trf.xlu1 }
 0x79e   : > { %v12684_v21 = vpop.trf.xlu0 }
 0x7a0   : > { %v12686_v52 = vpop.trf.xlu1 }
 0x7a1   : > { %v6711_v7 = vcombine.high %v12654_v27, %v12686_v52 }
 0x7a2   : > { %v12692_v54 = vpop.trf.xlu0 }
 0x7a3   : > { %v12704_v18 = vrot.slane %v6711_v7, %v14123_v62  ;;  %v6575_v5 = vcombine.high %v12656_v4, %v12692_v54 }
 0x7a4   : > { %v12696_v20 = vpop.trf.xlu1 }
 0x7a5   : > { %14157 = vst [vmem:[#allocation32_spill] sm:$0xff] %v12704_v18  ;;  %v6983_v24 = vcombine.high %v12658_v3, %v12696_v20  ;;  %v12720_v49 = vrot.slane %v6575_v5, %v14123_v62 }
 0x7a6   : > { %v12710_v42 = vpop.trf.xlu0 }
 0x7a7   : > { %14159 = vst [vmem:[#allocation29_spill] sm:$0xff] %v12720_v49  ;;  %v12723_v40 = vrot.slane %v6983_v24, %v14123_v62  ;;  %v6847_v39 = vcombine.high %v12660_v0, %v12710_v42 }
 0x7a8   : > { %v12725_v22 = vpop.trf.xlu1 }
 0x7a9   : > { %v12742_v32 = vrot.slane %v6847_v39, %v14123_v62 }
 0x7aa   : > { %v12734_v31 = vpop.trf.xlu0 }
 0x7ac   : > { %v12744_v14 = vpop.trf.xlu1 }
 0x7ad   : > { %14160 = vst [vmem:[#allocation31_spill] sm:$0xff] %v12744_v14  ;;  %v6030_v14 = vcombine.low %v12648_v28, %v12680_v37 }
 0x7ae   : > { %v12748_v10 = vpop.trf.xlu0 }
 0x7af   : > { %14161 = vst [vmem:[#allocation25_spill] sm:$0xff] %v12748_v10  ;;  %v6422_v10 = vcombine.low %v12636_v59, %v12666_v38  ;;  %v6022_v38 = vrot.slane %v6014_v50, %v14123_v62  ;;  %v6038_v50 = vrot.slane %v6030_v14, %v14123_v62  ;;  %v6438_v14 = vcombine.low %v12650_v2, %v12682_v51 }
 0x7b0   : > { %v12750_v25 = vpop.trf.xlu1 }
 0x7b2   : > { %v12752_v56 = vpop.trf.xlu0 }
 0x7b4   : > { %v12754_v47 = vpop.trf.xlu1 }
 0x7b5   : > { %14162 = vst [vmem:[#allocation34_spill] sm:$0xff] %v12754_v47 }
 0x7b6   : > { %v12756_v34 = vpop.trf.xlu0 }
 0x7b8   : > { %v12758_v36 = vpop.trf.xlu1 }
 0x7ba   : > { %v12760_v7 = vpop.trf.xlu0 }
 0x7bc   : > { %v12762_v11 = vpop.trf.xlu1 }
 0x7bd   : > { %14163 = vst [vmem:[#allocation30_spill] sm:$0xff] %v12762_v11  ;;  %v6166_v11 = vcombine.low %v12646_v44, %v12678_v45 }
 0x7be   : > { %v12764_v41 = vpop.trf.xlu0 }
 0x7bf   : > { %14164 = vst [vmem:[#allocation26_spill] sm:$0xff] %v12764_v41  ;;  %v6015_v41 = vcombine.high %v12630_v46, %v12664_v8  ;;  %v6287_v46 = vcombine.high %v12634_v58, %v12668_v6  ;;  %v6158_v8 = vrot.slane %v6150_v60, %v14123_v62  ;;  %v6966_v58 = vcombine.low %v12644_v13, %v12674_v19 }
 0x7c0   : > { %v12766_v5 = vpop.trf.xlu1  ;;  %v6174_v6 = vrot.slane %v6166_v11, %v14123_v62  ;;  %v12834_v13 = vrot.slane %v6423_v29, %v14123_v62  ;;  %v12837_v19 = vrot.slane %v6286_v63, %v14123_v62  ;;  %v6439_v11 = vcombine.high %v12650_v2, %v12682_v51 }
 0x7c1   : > { %v12816_v47 = vrot.slane %v6015_v41, %v14123_v62  ;;  %v12857_v29 = vrot.slane %v6966_v58, %v14123_v62  ;;  %v6079_v51 = vcombine.high %v6022_v38, %v6038_v50  ;;  %v6982_v58 = vcombine.low %v12658_v3, %v12696_v20 }
 0x7c2   : > { %v12768_v24 = vpop.trf.xlu0  ;;  %14172 = vst [vmem:[#allocation36_spill] sm:$0xff] %v12834_v13  ;;  %v6214_v63 = vcombine.low %v6158_v8, %v6174_v6 }
 0x7c3   : > { %14165 = vst [vmem:[#allocation27_spill] sm:$0xff] %v12768_v24 }
 0x7c4   : > { %v12770_v26 = vpop.trf.xlu1 }
 0x7c5   : > { %14166 = vst [vmem:[#allocation20_spill] sm:$0xff] %v12770_v26  ;;  %v6558_v26 = vcombine.low %v12638_v35, %v12672_v9  ;;  %v12822_v35 = vrot.slane %v6422_v10, %v14123_v62  ;;  %v6031_v9 = vcombine.high %v12648_v28, %v12680_v37  ;;  %v12840_v10 = vrot.slane %v6287_v46, %v14123_v62 }
 0x7c6   : > { %v12772_v39 = vpop.trf.xlu0  ;;  %v6302_v46 = vcombine.low %v12652_v23, %v12684_v21 }
 0x7c7   : > { %14167 = vst [vmem:[#allocation38_spill] sm:$0xff] %v12772_v39  ;;  %v12845_v28 = vrot.slane %v6558_v26, %v14123_v62  ;;  %v6303_v26 = vcombine.high %v12652_v23, %v12684_v21 }
 0x7c8   : > { %v12774_v48 = vpop.trf.xlu1  ;;  %v6310_v3 = vrot.slane %v6302_v46, %v14123_v62  ;;  %v6574_v46 = vcombine.low %v12656_v4, %v12692_v54 }
 0x7c9   : > { %14173 = vst [vmem:[#allocation37_spill] sm:$0xff] %v12845_v28  ;;  %v6317_v20 = vrot.slane %v6303_v26, %v14123_v62 }
 0x7ca   : > { %v12776_v61 = vpop.trf.xlu0  ;;  %v6350_v54 = vcombine.low %v12837_v19, %v6310_v3 }
 0x7cc   : > { %v12782_v15 = vpop.trf.xlu1 }
 0x7cd   : > { %14168 = vst [vmem:[#allocation40_spill] sm:$0xff] %v12782_v15  ;;  %v12804_v15 = vrot.slane %v6151_v1, %v14123_v62 }
 0x7ce   : > { %v12794_v39 = vpop.trf.xlu0 }
 0x7cf   : > { %14169 = vst [vmem:[#allocation39_spill] sm:$0xff] %v12794_v39  ;;  %v6167_v39 = vcombine.high %v12646_v44, %v12678_v45  ;;  %v6830_v44 = vcombine.low %v12642_v12, %v12676_v17  ;;  %v6078_v12 = vcombine.low %v6022_v38, %v6038_v50 }
 0x7d0   : > { %v12812_v59 = vpop.trf.xlu1 }
 0x7d1   : > { %v12810_v24 = vpop.f32.mrb[4].mxu1  ;;  %v12848_v37 = vrot.slane %v6167_v39, %v14123_v62  ;;  %v12864_v39 = vrot.slane %v6830_v44, %v14123_v62  ;;  %v6846_v44 = vcombine.low %v12660_v0, %v12710_v42  ;;  %v12904_v0 = vrot.slane %v6982_v58, %v14123_v62 }
 0x7d2   : > { %14170 = vst [vmem:[#allocation41_spill] sm:$0xff] %v12810_v24  ;;  %v10618_v1 = vpop.f32.mrb[5].mxu1  ;;  %v12831_v60 = vpop.trf.xlu0  ;;  %v12907_v42 = vrot.slane %v6078_v12, %v11584_v53  ;;  %v6351_v12 = vcombine.high %v12837_v19, %v6310_v3  ;;  %v14176_v19 = vcombine.high %v12699_v55, %v12704_v18  ;;  %v14180_v24 = vcombine.high %v12715_v33, %v12720_v49 }
 0x7d3   : > { %v12829_v45 = vpop.f32.mrb[6].mxu1  ;;  %v6215_v1 = vcombine.high %v6158_v8, %v6174_v6  ;;  %v6230_v23 = vcombine.low %v12804_v15, %v12848_v37  ;;  %v6231_v21 = vcombine.high %v12804_v15, %v12848_v37  ;;  %v6446_v8 = vrot.slane %v6438_v14, %v14123_v62 }
 0x7d4   : > { %14171 = vst [vmem:[#allocation42_spill] sm:$0xff] %v12829_v45  ;;  %v10619_v17 = vpop.f32.mrb[7].mxu1  ;;  %v12854_v41 = vpop.trf.xlu1  ;;  %v12881_v6 = vrot.slane %v6439_v11, %v14123_v62  ;;  %v6710_v37 = vcombine.low %v12654_v27, %v12686_v52  ;;  %v12940_v3 = vrot.slane %v14176_v19, %v11584_v53  ;;  %v12973_v18 = vrot.slane %v6350_v54, %v11584_v53 }
 0x7d5   : > { %v6045_v17 = vrot.slane %v6031_v9, %v14123_v62  ;;  %v12890_v9 = vrot.slane %v6214_v63, %v11584_v53  ;;  %v12899_v11 = vrot.slane %v6215_v1, %v11584_v53  ;;  %v12910_v63 = vrot.slane %v6079_v51, %v11584_v53 }
 0x7d6   : > { %v12867_v2 = vpop.trf.xlu0  ;;  %14174 = vst [vmem:[#allocation43_spill] sm:$0xff] %v12881_v6  ;;  %v6487_v27 = vcombine.high %v12822_v35, %v6446_v8  ;;  %v6502_v52 = vcombine.low %v12834_v13, %v12881_v6  ;;  %v6366_v1 = vcombine.low %v12840_v10, %v6317_v20  ;;  %v6367_v51 = vcombine.high %v12840_v10, %v6317_v20 }
 0x7d7   : > { %v6094_v50 = vcombine.low %v12816_v47, %v6045_v17  ;;  %v6095_v15 = vcombine.high %v12816_v47, %v6045_v17  ;;  %v6486_v47 = vcombine.low %v12822_v35, %v6446_v8  ;;  %v6854_v17 = vrot.slane %v6846_v44, %v14123_v62  ;;  %14177 = vst [vmem:[#allocation21_spill] sm:$0xff] %v12940_v3 }
 0x7d8   : > { %v12883_v38 = vpop.trf.xlu1  ;;  %v12926_v35 = vrot.slane %v6710_v37, %v14123_v62  ;;  %v12934_v26 = vrot.slane %v6230_v23, %v11584_v53  ;;  %v12943_v44 = vrot.slane %v6574_v46, %v14123_v62  ;;  %v7030_v10 = vcombine.low %v12857_v29, %v12904_v0 }
 0x7d9   : > { %v12931_v8 = vrot.slane %v6094_v50, %v11584_v53  ;;  %v12948_v20 = vrot.slane %v6095_v15, %v11584_v53  ;;  %v7031_v50 = vcombine.high %v12857_v29, %v12904_v0  ;;  %v7046_v23 = vcombine.low %v12728_v57, %v12723_v40 }
 0x7da   : > { %v12896_v14 = vpop.trf.xlu0  ;;  %14175 = vst [vmem:[#allocation22_spill] sm:$0xff] %v12926_v35  ;;  %14178 = vst [vmem:[#allocation23_spill] sm:$0xff] %v12943_v44  ;;  %v6198_v37 = vcombine.low %v12758_v36, %v12883_v38  ;;  %v12964_v15 = vrot.slane %v14180_v24, %v11584_v53  ;;  %v6894_v45 = vcombine.low %v12864_v39, %v6854_v17 }
 0x7db   : > { %v6062_v19 = vcombine.low %v12760_v7, %v12896_v14  ;;  %v12970_v55 = vrot.slane %v6231_v21, %v11584_v53  ;;  %v6895_v35 = vcombine.high %v12864_v39, %v6854_v17  ;;  %v6046_v24 = vcombine.low %v12734_v31, %v12776_v61 }
 0x7dc   : > { %v12918_v4 = vpop.trf.xlu1  ;;  %14181 = vst [vmem:[#allocation45_spill] sm:$0xff] %v12964_v15  ;;  %v12983_v49 = vrot.slane %v6486_v47, %v11584_v53  ;;  %v6910_v21 = vcombine.low %v12739_v16, %v12742_v32  ;;  %v6727_v54 = vcombine.high %v12750_v25, %v12812_v59  ;;  %v12990_v39 = vrot.slane %v6351_v12, %v11584_v53 }
 0x7dd   : > { %v12993_v17 = vrot.slane %v6487_v27, %v11584_v53  ;;  %v6206_v28 = vrot.slane %v6198_v37, %v14123_v62  ;;  %v13002_v43 = vrot.slane %v6366_v1, %v11584_v53  ;;  %v13008_v12 = vrot.slane %v6367_v51, %v11584_v53  ;;  %v14189_v51 = vld [vmem:[#allocation34_spill] sm:$0xff] }
 0x7de   : > { %v12928_v58 = vpop.trf.xlu0  ;;  %v13011_v27 = vrot.slane %v6894_v45, %v11584_v53  ;;  %v13014_v37 = vrot.slane %v7030_v10, %v11584_v53  ;;  %v6054_v30 = vrot.slane %v6046_v24, %v14123_v62  ;;  %v6591_v1 = vcombine.high %v12752_v56, %v12831_v60  ;;  %v14190_v10 = vld [vmem:[#allocation27_spill] sm:$0xff] }
 0x7df   : > { %14183 = vst [vmem:[#allocation47_spill] sm:$0xff] %v13002_v43  ;;  %14185 = vst [vmem:[#allocation49_spill] sm:$0xff] %v13008_v12  ;;  %v13021_v6 = vrot.slane %v6895_v35, %v11584_v53  ;;  %v6999_v45 = vcombine.high %v14189_v51, %v12854_v41  ;;  %v13039_v35 = vrot.slane %v6910_v21, %v11584_v53 }
 0x7e0   : > { %v12967_v29 = vpop.trf.xlu1  ;;  %14186 = vst [vmem:[#allocation50_spill] sm:$0xff] %v13011_v27  ;;  %14187 = vst [vmem:[#allocation51_spill] sm:$0xff] %v13014_v37  ;;  %v13036_v27 = vrot.slane %v7031_v50, %v11584_v53  ;;  %v14196_v50 = vcombine.high %v12728_v57, %v12723_v40  ;;  %v6047_v21 = vcombine.high %v12734_v31, %v12776_v61 }
 0x7e1   : > { %v12958_v46 = vpop.f32.mrb[8].mxu1  ;;  %v6743_v47 = vcombine.high %v12766_v5, %v12967_v29  ;;  %14188 = vst [vmem:[#allocation52_spill] sm:$0xff] %v13021_v6  ;;  %14192 = vst [vmem:[#allocation27_spill] sm:$0xff] %v13039_v35  ;;  %v13044_v6 = vrot.slane %v7046_v23, %v11584_v53  ;;  %v13071_v40 = vrot.slane %v6999_v45, %v14123_v62 }
 0x7e2   : > { %14179 = vst [vmem:[#allocation44_spill] sm:$0xff] %v12958_v46  ;;  %v10630_v0 = vpop.f32.mrb[9].mxu1  ;;  %v6182_v46 = vcombine.low %v12725_v22, %v12774_v48  ;;  %v12999_v44 = vpop.trf.xlu0  ;;  %14191 = vst [vmem:[#allocation34_spill] sm:$0xff] %v13036_v27  ;;  %v13056_v27 = vrot.slane %v14196_v50, %v11584_v53  ;;  %v6199_v57 = vcombine.high %v12758_v36, %v12883_v38 }
 0x7e3   : > { %v12980_v33 = vpop.f32.mrb[10].mxu1  ;;  %v13029_v12 = vrot.slane %v6743_v47, %v14123_v62  ;;  %14193 = vst [vmem:[#allocation53_spill] sm:$0xff] %v13044_v6  ;;  %v14194_v47 = vcombine.high %v12739_v16, %v12742_v32  ;;  %v14198_v6 = vld [vmem:[#allocation20_spill] sm:$0xff]  ;;  %v6063_v31 = vcombine.high %v12760_v7, %v12896_v14  ;;  %v13087_v36 = vrot.slane %v6047_v21, %v14123_v62 }
 0x7e4   : > { %14182 = vst [vmem:[#allocation46_spill] sm:$0xff] %v12980_v33  ;;  %v10631_v0 = vpop.f32.mrb[11].mxu1  ;;  %v6070_v33 = vrot.slane %v6062_v19, %v14123_v62  ;;  %v6190_v19 = vrot.slane %v6182_v46, %v14123_v62  ;;  %v6607_v46 = vcombine.high %v14190_v10, %v12999_v44  ;;  %v13033_v13 = vpop.trf.xlu1  ;;  %14197 = vst [vmem:[#allocation55_spill] sm:$0xff] %v13056_v27  ;;  %v14200_v7 = vld [vmem:[#allocation40_spill] sm:$0xff] }
 0x7e5   : > { %v13005_v0 = vrot.slane %v6502_v52, %v11584_v53  ;;  %v13024_v52 = vrot.slane %v6727_v54, %v14123_v62  ;;  %v13050_v3 = vrot.slane %v14194_v47, %v11584_v53  ;;  %v13061_v54 = vrot.slane %v6591_v1, %v14123_v62 }
 0x7e6   : > { %v6246_v24 = vcombine.low %v6190_v19, %v6206_v28  ;;  %v6110_v37 = vcombine.low %v6054_v30, %v6070_v33  ;;  %v13064_v23 = vrot.slane %v6607_v46, %v14123_v62  ;;  %v7015_v16 = vcombine.high %v14198_v6, %v13033_v13  ;;  %v5993_v32 = vpop.trf.xlu0 }
 0x7e7   : > { %14184 = vst [vmem:[#allocation48_spill] sm:$0xff] %v13005_v0  ;;  %14195 = vst [vmem:[#allocation54_spill] sm:$0xff] %v13050_v3  ;;  %v6183_v47 = vcombine.high %v12725_v22, %v12774_v48  ;;  %v6247_v61 = vcombine.high %v6190_v19, %v6206_v28  ;;  %v6111_v27 = vcombine.high %v6054_v30, %v6070_v33  ;;  %v14199_v48 = vld [vmem:[#allocation38_spill] sm:$0xff]  ;;  %v14201_v28 = vld [vmem:[#allocation31_spill] sm:$0xff] }
 0x7e8   : > { %v6254_v1 = vrot.slane %v6246_v24, %v11584_v53  ;;  %v6118_v46 = vrot.slane %v6110_v37, %v11584_v53  ;;  %v13082_v22 = vrot.slane %v7015_v16, %v14123_v62  ;;  %v6878_v45 = vcombine.low %v14199_v48, %v5993_v32  ;;  %v14202_v37 = vld [vmem:[#allocation39_spill] sm:$0xff]  ;;  %v14203_v19 = vld [vmem:[#allocation25_spill] sm:$0xff] }
 0x7e9   : > { %v6879_v3 = vcombine.high %v14199_v48, %v5993_v32  ;;  %v6454_v38 = vcombine.low %v14201_v28, %v14200_v7  ;;  %v6455_v14 = vcombine.high %v14201_v28, %v14200_v7  ;;  %v6318_v24 = vcombine.low %v14203_v19, %v14202_v37 }
 0x7ea   : > { %v14204_v30 = vcombine.low %v12756_v34, %v12867_v2  ;;  %v14205_v21 = vcombine.high %v12756_v34, %v12867_v2  ;;  %v13108_v32 = vrot.slane %v6063_v31, %v14123_v62  ;;  %v13113_v7 = vrot.slane %v6878_v45, %v14123_v62 }
 0x7eb   : > { %v13116_v28 = vrot.slane %v6879_v3, %v14123_v62  ;;  %v6278_v50 = vcombine.low %v12890_v9, %v6254_v1  ;;  %v6319_v34 = vcombine.high %v14203_v19, %v14202_v37  ;;  %v6213_v2 = vrot.slane %v6199_v57, %v14123_v62  ;;  %v14207_v3 = vld [vmem:[#allocation30_spill] sm:$0xff] }
 0x7ec   : > { %v13099_v33 = vrot.slane %v14204_v30, %v14123_v62  ;;  %v13105_v16 = vrot.slane %v14205_v21, %v14123_v62  ;;  %v6142_v30 = vcombine.low %v12907_v42, %v6118_v46  ;;  %v6261_v31 = vrot.slane %v6247_v61, %v11584_v53 }
 0x7ed   : > { %14206 = vst [vmem:[#allocation20_spill] sm:$0xff] %v13116_v28  ;;  %v6125_v21 = vrot.slane %v6111_v27, %v11584_v53  ;;  %v7107_v19 = vshrl.u32 %v6278_v50, 16  ;;  %v6143_v57 = vcombine.high %v12907_v42, %v6118_v46  ;;  %v6197_v61 = vrot.slane %v6183_v47, %v14123_v62 }
 0x7ee   : > { %v7104_v15 = vpack.i.b16 %v6278_v50, %v6142_v30  ;;  %v7106_v37 = vshrl.u32 %v6142_v30, 16  ;;  %v13136_v27 = vrot.slane %v6454_v38, %v14123_v62  ;;  %v6126_v45 = vcombine.low %v13087_v36, %v13108_v32 }
 0x7ef   : > { %v6470_v0 = vcombine.low %v14207_v3, %v12918_v4  ;;  %v6279_v35 = vcombine.high %v12890_v9, %v6254_v1  ;;  %v7114_v43 = vshrl.u32 %v6143_v57, 16  ;;  %v6144_v50 = vcombine.low %v12910_v63, %v6125_v21 }
 0x7f0   : > { %7358 = vxpose.xlu0.c.b16.start.end [1/1] (short) (narrow) %v7104_v15, 16  ;;  %v7108_v48 = vpack.i.b16 %v7107_v19, %v7106_v37  ;;  %v13145_v42 = vrot.slane %v6455_v14, %v14123_v62  ;;  %v13148_v47 = vrot.slane %v6318_v24, %v14123_v62  ;;  %v13151_v46 = vrot.slane %v6319_v34, %v14123_v62  ;;  %v14208_v34 = vld [vmem:[#allocation26_spill] sm:$0xff] }
 0x7f1   : > { %v6262_v38 = vcombine.low %v6197_v61, %v6213_v2  ;;  %v6590_v30 = vcombine.low %v12752_v56, %v12831_v60  ;;  %v7112_v15 = vpack.i.b16 %v6279_v35, %v6143_v57  ;;  %v7115_v37 = vshrl.u32 %v6279_v35, 16 }
 0x7f2   : > { %7374 = vxpose.xlu1.c.b16.start.end [1/1] (short) (narrow) %v7108_v48, 16  ;;  %v6280_v9 = vcombine.low %v12899_v11, %v6261_v31  ;;  %v6998_v1 = vcombine.low %v14189_v51, %v12854_v41  ;;  %v6471_v14 = vcombine.high %v14207_v3, %v12918_v4  ;;  %v6478_v24 = vrot.slane %v6470_v0, %v14123_v62 }
 0x7f3   : > { %v6334_v19 = vcombine.low %v14208_v34, %v12928_v58  ;;  %v6134_v28 = vrot.slane %v6126_v45, %v11584_v53  ;;  %v7116_v56 = vpack.i.b16 %v7115_v37, %v7114_v43  ;;  %v7122_v60 = vshrl.u32 %v6144_v50, 16 }
 0x7f4   : > { %7390 = vxpose.xlu0.c.b16.start.end [1/1] (short) (narrow) %v7112_v15, 16  ;;  %v6145_v35 = vcombine.high %v12910_v63, %v6125_v21  ;;  %v6726_v48 = vcombine.low %v12750_v25, %v12812_v59  ;;  %v6263_v57 = vcombine.high %v6197_v61, %v6213_v2  ;;  %v6270_v41 = vrot.slane %v6262_v38, %v11584_v53  ;;  %v14234_v59 = vld [vmem:[#allocation49_spill] sm:$0xff] }
 0x7f5   : > { %v6335_v4 = vcombine.high %v14208_v34, %v12928_v58  ;;  %v6127_v0 = vcombine.high %v13087_v36, %v13108_v32  ;;  %v7120_v51 = vpack.i.b16 %v6280_v9, %v6144_v50  ;;  %v7123_v45 = vshrl.u32 %v6280_v9, 16 }
 0x7f6   : > { %7406 = vxpose.xlu1.c.b16.start.end [1/1] (short) (narrow) %v7116_v56, 16  ;;  %v6281_v43 = vcombine.high %v12899_v11, %v6261_v31  ;;  %v13174_v3 = vrot.slane %v6590_v30, %v14123_v62  ;;  %v13177_v63 = vrot.slane %v6998_v1, %v14123_v62  ;;  %v6485_v2 = vrot.slane %v6471_v14, %v14123_v62 }
 0x7f7   : > { %v6518_v21 = vcombine.low %v13136_v27, %v6478_v24  ;;  %v6342_v58 = vrot.slane %v6334_v19, %v14123_v62  ;;  %v7124_v61 = vpack.i.b16 %v7123_v45, %v7122_v60  ;;  %v7130_v36 = vshrl.u32 %v6145_v35, 16 }
 0x7f8   : > { %7422 = vxpose.xlu0.c.b16.start.end [1/1] (short) (narrow) %v7120_v51, 16  ;;  %v6146_v32 = vcombine.low %v12931_v8, %v6134_v28  ;;  %v6277_v50 = vrot.slane %v6263_v57, %v11584_v53  ;;  %v6519_v11 = vcombine.high %v13136_v27, %v6478_v24  ;;  %v6349_v31 = vrot.slane %v6335_v4, %v14123_v62 }
 0x7f9   : > { %v7014_v38 = vcombine.low %v14198_v6, %v13033_v13  ;;  %v6141_v30 = vrot.slane %v6127_v0, %v11584_v53  ;;  %v7128_v15 = vpack.i.b16 %v6281_v43, %v6145_v35  ;;  %v7131_v37 = vshrl.u32 %v6281_v43, 16 }
 0x7fa   : > { %7438 = vxpose.xlu1.c.b16.start.end [1/1] (short) (narrow) %v7124_v61, 16  ;;  %v6282_v9 = vcombine.low %v12934_v26, %v6270_v41  ;;  %v6526_v1 = vrot.slane %v6518_v21, %v11584_v53  ;;  %v6534_v14 = vcombine.low %v13145_v42, %v6485_v2  ;;  %v6535_v34 = vcombine.high %v13145_v42, %v6485_v2 }
 0x7fb   : > { %v6742_v27 = vcombine.low %v12766_v5, %v12967_v29  ;;  %v6382_v24 = vcombine.low %v13148_v47, %v6342_v58  ;;  %v7132_v13 = vpack.i.b16 %v7131_v37, %v7130_v36  ;;  %v7138_v6 = vshrl.u32 %v6146_v32, 16 }
 0x7fc   : > { %7454 = vxpose.xlu0.c.b16.start.end [1/1] (short) (narrow) %v7128_v15, 16  ;;  %v6147_v19 = vcombine.high %v12931_v8, %v6134_v28  ;;  %v6533_v56 = vrot.slane %v6519_v11, %v11584_v53  ;;  %v6383_v60 = vcombine.high %v13148_v47, %v6342_v58  ;;  %v6398_v35 = vcombine.low %v13151_v46, %v6349_v31 }
 0x7fd   : > { %v7022_v57 = vrot.slane %v7014_v38, %v14123_v62  ;;  %v6399_v42 = vcombine.high %v13151_v46, %v6349_v31  ;;  %v7136_v4 = vpack.i.b16 %v6282_v9, %v6146_v32  ;;  %v7139_v5 = vshrl.u32 %v6282_v9, 16 }
 0x7fe   : > { %7470 = vxpose.xlu1.c.b16.start.end [1/1] (short) (narrow) %v7132_v13, 16  ;;  %v6283_v29 = vcombine.high %v12934_v26, %v6270_v41  ;;  %v13204_v0 = vrot.slane %v6534_v14, %v11584_v53  ;;  %v13207_v8 = vrot.slane %v6535_v34, %v11584_v53  ;;  %v13210_v28 = vrot.slane %v6742_v27, %v14123_v62 }
 0x7ff   : > { %v6606_v47 = vcombine.low %v14190_v10, %v12999_v44  ;;  %v6390_v51 = vrot.slane %v6382_v24, %v11584_v53  ;;  %v7140_v46 = vpack.i.b16 %v7139_v5, %v7138_v6  ;;  %v7146_v45 = vshrl.u32 %v6147_v19, 16 }
 0x800   : > { %7486 = vxpose.xlu0.c.b16.start.end [1/1] (short) (narrow) %v7136_v4, 16  ;;  %v6148_v43 = vcombine.low %v12948_v20, %v6141_v30  ;;  %v6397_v26 = vrot.slane %v6383_v60, %v11584_v53  ;;  %v13218_v41 = vrot.slane %v6398_v35, %v11584_v53  ;;  %v7062_v2 = vcombine.low %v13177_v63, %v7022_v57 }
 0x801   : > { %v7063_v21 = vcombine.high %v13177_v63, %v7022_v57  ;;  %v13223_v58 = vrot.slane %v6399_v42, %v11584_v53  ;;  %v7144_v44 = vpack.i.b16 %v6283_v29, %v6147_v19  ;;  %v7147_v10 = vshrl.u32 %v6283_v29, 16 }
 0x802   : > { %7502 = vxpose.xlu1.c.b16.start.end [1/1] (short) (narrow) %v7140_v46, 16  ;;  %v6284_v61 = vcombine.low %v12970_v55, %v6277_v50  ;;  %v14209_v36 = vcombine.high %v13024_v52, %v13029_v12  ;;  %v13231_v11 = vrot.slane %v6606_v47, %v14123_v62  ;;  %v7078_v31 = vcombine.low %v13071_v40, %v13082_v22 }
 0x803   : > { %v6149_v63 = vcombine.high %v12948_v20, %v6141_v30  ;;  %v14210_v38 = vcombine.high %v13061_v54, %v13064_v23  ;;  %v7148_v37 = vpack.i.b16 %v7147_v10, %v7146_v45  ;;  %v7154_v9 = vshrl.u32 %v6148_v43, 16 }
 0x804   : > { %v6821_v32 = vrot.slane %v14209_v36, %v11584_v53  ;;  %7518 = vxpose.xlu0.c.b16.start.end [1/1] (short) (narrow) %v7144_v44, 16  ;;  %v6414_v14 = vcombine.low %v12973_v18, %v6390_v51  ;;  %v13242_v34 = vrot.slane %v7062_v2, %v11584_v53  ;;  %v13245_v27 = vrot.slane %v7063_v21, %v11584_v53 }
 0x805   : > { %v6685_v15 = vrot.slane %v14210_v38, %v11584_v53  ;;  %v7152_v24 = vpack.i.b16 %v6284_v61, %v6148_v43  ;;  %v6285_v13 = vcombine.high %v12970_v55, %v6277_v50  ;;  %v7155_v20 = vshrl.u32 %v6284_v61, 16 }
 0x806   : > { %7534 = vxpose.xlu1.c.b16.start.end [1/1] (short) (narrow) %v7148_v37, 16  ;;  %v6550_v30 = vcombine.low %v12983_v49, %v6526_v1  ;;  %v6415_v6 = vcombine.high %v12973_v18, %v6390_v51  ;;  %v13251_v19 = vcombine.low %v12990_v39, %v6397_v26  ;;  %v13254_v60 = vrot.slane %v7078_v31, %v11584_v53 }
 0x807   : > { %v14211_v35 = vcombine.high %v13071_v40, %v13082_v22  ;;  %v14212_v55 = vcombine.low %v13099_v33, %v13113_v7  ;;  %v7162_v42 = vshrl.u32 %v6149_v63, 16  ;;  %v7156_v18 = vpack.i.b16 %v7155_v20, %v7154_v9 }
 0x808   : > { %7550 = vxpose.xlu0.c.b16.start.end [1/1] (short) (narrow) %v7152_v24, 16  ;;  %v7170_v4 = vshrl.u32 %v6414_v14, 16  ;;  %v6551_v5 = vcombine.high %v12983_v49, %v6526_v1  ;;  %v13268_v29 = vcombine.low %v12993_v17, %v6533_v56  ;;  %v14213_v40 = vcombine.high %v13099_v33, %v13113_v7  ;;  %v14214_v1 = vld [vmem:[#allocation20_spill] sm:$0xff] }
 0x809   : > { %v13260_v57 = vrot.slane %v14211_v35, %v11584_v53  ;;  %v6934_v50 = vrot.slane %v14212_v55, %v11584_v53  ;;  %v7160_v47 = vpack.i.b16 %v6285_v13, %v6149_v63  ;;  %v7163_v51 = vshrl.u32 %v6285_v13, 16  ;;  %v14220_v55 = vld [vmem:[#allocation21_spill] sm:$0xff] }
 0x80a   : > { %v6941_v22 = vrot.slane %v14213_v40, %v11584_v53  ;;  %v13275_v46 = vcombine.high %v12990_v39, %v6397_v26  ;;  %7566 = vxpose.xlu1.c.b16.start.end [1/1] (short) (narrow) %v7156_v18, 16  ;;  %v7171_v45 = vshrl.u32 %v6550_v30, 16  ;;  %v7178_v43 = vshrl.u32 %v6415_v6, 16  ;;  %v14217_v26 = vld [vmem:[#allocation47_spill] sm:$0xff] }
 0x80b   : > { %v7186_v2 = vshrl.u32 %v13251_v19, 16  ;;  %v13279_v49 = vcombine.high %v12993_v17, %v6533_v56  ;;  %v14215_v21 = vcombine.low %v13105_v16, %v14214_v1  ;;  %v14216_v33 = vcombine.high %v13105_v16, %v14214_v1  ;;  %v14218_v16 = vld [vmem:[#allocation48_spill] sm:$0xff] }
 0x80c   : > { %v7168_v7 = vpack.i.b16 %v6550_v30, %v6414_v14  ;;  %v13295_v10 = vcombine.low %v14217_v26, %v13218_v41  ;;  %7582 = vxpose.xlu0.c.b16.start.end [1/1] (short) (narrow) %v7160_v47, 16  ;;  %v7164_v17 = vpack.i.b16 %v7163_v51, %v7162_v42  ;;  %v7172_v56 = vpack.i.b16 %v7171_v45, %v7170_v4  ;;  %v14222_v47 = vld [vmem:[#allocation51_spill] sm:$0xff]  ;;  %v14236_v45 = vld [vmem:[#allocation33_spill] sm:$0xff] }
 0x80d   : > { %v13285_v44 = vrot.slane %v14215_v21, %v11584_v53  ;;  %v13291_v39 = vrot.slane %v14216_v33, %v11584_v53  ;;  %v7179_v61 = vshrl.u32 %v6551_v5, 16  ;;  %v7187_v36 = vshrl.u32 %v13268_v29, 16 }
 0x80e   : > { %v7176_v31 = vpack.i.b16 %v6551_v5, %v6415_v6  ;;  %v7184_v63 = vpack.i.b16 %v13268_v29, %v13251_v19  ;;  %v7194_v38 = vshrl.u32 %v13275_v46, 16  ;;  %v13303_v37 = vcombine.low %v14218_v16, %v13204_v0  ;;  %7598 = vxpose.xlu1.c.b16.start.end [1/1] (short) (narrow) %v7164_v17, 16  ;;  %v14219_v19 = vld [vmem:[#allocation45_spill] sm:$0xff]  ;;  %v14221_v5 = vld [vmem:[#allocation50_spill] sm:$0xff] }
 0x80f   : > { %v7180_v9 = vpack.i.b16 %v7179_v61, %v7178_v43  ;;  %v7188_v14 = vpack.i.b16 %v7187_v36, %v7186_v2  ;;  %v7192_v24 = vpack.i.b16 %v13279_v49, %v13275_v46  ;;  %v7195_v13 = vshrl.u32 %v13279_v49, 16  ;;  %v14224_v36 = vld [vmem:[#allocation34_spill] sm:$0xff] }
 0x810   : > { %v7200_v20 = vpack.i.b16 %v13303_v37, %v13295_v10  ;;  %v7202_v30 = vshrl.u32 %v13295_v10, 16  ;;  %v13313_v6 = vcombine.high %v14217_v26, %v13218_v41  ;;  %v13316_v35 = vcombine.low %v14219_v19, %v6685_v15  ;;  %7614 = vxpose.xlu0.c.b16.start.end [1/1] (short) (narrow) %v7168_v7, 16  ;;  %v14223_v26 = vld [vmem:[#allocation52_spill] sm:$0xff] }
 0x811   : > { %v13319_v42 = vcombine.low %v14220_v55, %v6821_v32  ;;  %v13322_v18 = vcombine.high %v14219_v19, %v6685_v15  ;;  %v13325_v4 = vcombine.high %v14220_v55, %v6821_v32  ;;  %v13328_v29 = vcombine.low %v14221_v5, %v6934_v50 }
 0x812   : > { %v7196_v40 = vpack.i.b16 %v7195_v13, %v7194_v38  ;;  %v7282_v41 = vshrl.u32 %v13316_v35, 16  ;;  %v13333_v51 = vcombine.low %v14222_v47, %v13242_v34  ;;  %v13336_v46 = vcombine.high %v14221_v5, %v6934_v50  ;;  %7630 = vxpose.xlu1.c.b16.start.end [1/1] (short) (narrow) %v7172_v56, 16 }
 0x813   : > { %v7283_v32 = vshrl.u32 %v13319_v42, 16  ;;  %v7290_v43 = vshrl.u32 %v13322_v18, 16  ;;  %v7291_v2 = vshrl.u32 %v13325_v4, 16  ;;  %v7298_v1 = vshrl.u32 %v13328_v29, 16 }
 0x814   : > { %v7299_v50 = vshrl.u32 %v13333_v51, 16  ;;  %7646 = vxpose.xlu0.c.b16.start.end [1/1] (short) (narrow) %v7176_v31, 16  ;;  %v13353_v33 = vcombine.high %v14222_v47, %v13242_v34  ;;  %v7306_v7 = vshrl.u32 %v13336_v46, 16  ;;  %v13357_v17 = vcombine.low %v14223_v26, %v6941_v22 }
 0x815   : > { %v13349_v21 = vpack.i.b16 %v7283_v32, %v7282_v41  ;;  %v13359_v56 = vpack.i.b16 %v7291_v2, %v7290_v43  ;;  %v13365_v38 = vcombine.low %v14224_v36, %v13245_v27  ;;  %v13368_v31 = vcombine.high %v14223_v26, %v6941_v22  ;;  %v14226_v2 = vld [vmem:[#allocation53_spill] sm:$0xff] }
 0x816   : > { %v13361_v61 = vpack.i.b16 %v7299_v50, %v7298_v1  ;;  %7662 = vxpose.xlu1.c.b16.start.end [1/1] (short) (narrow) %v7180_v9, 16  ;;  %v7307_v13 = vshrl.u32 %v13353_v33, 16  ;;  %v7314_v19 = vshrl.u32 %v13357_v17, 16  ;;  %v13376_v55 = vcombine.high %v14224_v36, %v13245_v27  ;;  %v14225_v9 = vld [vmem:[#allocation27_spill] sm:$0xff] }
 0x817   : > { %v7315_v41 = vshrl.u32 %v13365_v38, 16  ;;  %v7322_v22 = vshrl.u32 %v13368_v31, 16  ;;  %v13384_v47 = vcombine.low %v14225_v9, %v13285_v44  ;;  %v13393_v1 = vcombine.low %v14226_v2, %v13254_v60 }
 0x818   : > { %7678 = vxpose.xlu0.c.b16.start.end [1/1] (short) (narrow) %v7184_v63, 16  ;;  %v13386_v32 = vpack.i.b16 %v7307_v13, %v7306_v7  ;;  %v7323_v27 = vshrl.u32 %v13376_v55, 16  ;;  %v13400_v36 = vcombine.high %v14225_v9, %v13285_v44  ;;  %v13404_v63 = vcombine.high %v14226_v2, %v13254_v60 }
 0x819   : > { %v13395_v50 = vpack.i.b16 %v7315_v41, %v7314_v19  ;;  %v7330_v26 = vshrl.u32 %v13384_v47, 16  ;;  %v7331_v43 = vshrl.u32 %v13393_v1, 16  ;;  %v14227_v19 = vld [vmem:[#allocation54_spill] sm:$0xff]  ;;  %v7203_v5 = vshrl.u32 %v13303_v37, 16 }
 0x81a   : > { %7694 = vxpose.xlu1.c.b16.start.end [1/1] (short) (narrow) %v7188_v14, 16  ;;  %v13406_v7 = vpack.i.b16 %v7323_v27, %v7322_v22  ;;  %v13413_v41 = vcombine.low %v14227_v19, %v13291_v39  ;;  %v7338_v9 = vshrl.u32 %v13400_v36, 16  ;;  %v7339_v60 = vshrl.u32 %v13404_v63, 16  ;;  %v14228_v14 = vld [vmem:[#allocation55_spill] sm:$0xff] }
 0x81b   : > { %v13421_v22 = vcombine.low %v14228_v14, %v13260_v57  ;;  %v13423_v27 = vpack.i.b16 %v7331_v43, %v7330_v26  ;;  %v13428_v13 = vcombine.high %v14227_v19, %v13291_v39  ;;  %v13432_v44 = vcombine.high %v14228_v14, %v13260_v57 }
 0x81c   : > { %7710 = vxpose.xlu0.c.b16.start.end [1/1] (short) (narrow) %v7192_v24, 16  ;;  %v7346_v2 = vshrl.u32 %v13413_v41, 16  ;;  %v13435_v34 = vpack.i.b16 %v7339_v60, %v7338_v9  ;;  %v6555_v43 = vcombine.high %v14218_v16, %v13204_v0  ;;  %v6734_v19 = vrot.slane %v6726_v48, %v14123_v62  ;;  %v14232_v60 = vld [vmem:[#allocation43_spill] sm:$0xff] }
 0x81d   : > { %14229 = vst [vmem:[#allocation38_spill] sm:$0xff] %v13428_v13  ;;  %14230 = vst [vmem:[#allocation40_spill] sm:$0xff] %v13432_v44  ;;  %v7347_v24 = vshrl.u32 %v13421_v22, 16  ;;  %v7354_v26 = vshrl.u32 %v13428_v13, 16  ;;  %v7355_v57 = vshrl.u32 %v13432_v44, 16  ;;  %v6654_v9 = vcombine.low %v13174_v3, %v13231_v11 }
 0x81e   : > { %7726 = vxpose.xlu1.c.b16.start.end [1/1] (short) (narrow) %v7196_v40, 16  ;;  %v14231_v40 = vld [vmem:[#allocation36_spill] sm:$0xff]  ;;  %v7204_v39 = vpack.i.b16 %v7203_v5, %v7202_v30  ;;  %v7210_v25 = vshrl.u32 %v13313_v6, 16  ;;  %v6420_v48 = vcombine.low %v14234_v59, %v13223_v58  ;;  %v6790_v37 = vcombine.low %v6734_v19, %v13210_v28  ;;  %v14241_v5 = vld [vmem:[#allocation22_spill] sm:$0xff] }
 0x81f   : > { %v14233_v14 = vcombine.high %v14231_v40, %v14232_v60  ;;  %v13456_v16 = vpack.i.b16 %v7347_v24, %v7346_v2  ;;  %v13466_v49 = vpack.i.b16 %v7355_v57, %v7354_v26  ;;  %v14237_v40 = vld [vmem:[#allocation24_spill] sm:$0xff]  ;;  %v14239_v24 = vld [vmem:[#allocation23_spill] sm:$0xff]  ;;  %v7208_v10 = vpack.i.b16 %v6555_v43, %v13313_v6 }
 0x820   : > { %7742 = vxpose.xlu0.c.b16.start.end [1/1] (short) (narrow) %v7200_v20, 16  ;;  %v14238_v60 = vcombine.low %v14236_v45, %v14237_v40  ;;  %v7211_v20 = vshrl.u32 %v6555_v43, 16  ;;  %v6662_v26 = vrot.slane %v6654_v9, %v11584_v53  ;;  %v6421_v45 = vcombine.high %v14234_v59, %v13223_v58 }
 0x821   : > { %v6517_v0 = vrot.slane %v14233_v14, %v11584_v53  ;;  %14235 = vst [vmem:[#allocation31_spill] sm:$0xff] %v13466_v49  ;;  %v14240_v14 = vld [vmem:[#allocation37_spill] sm:$0xff]  ;;  %v7218_v49 = vshrl.u32 %v6420_v48, 16  ;;  %v6655_v9 = vcombine.high %v13174_v3, %v13231_v11 }
 0x822   : > { %v6702_v2 = vrot.slane %v14238_v60, %v14123_v62  ;;  %v6622_v15 = vcombine.low %v14240_v14, %v14239_v24  ;;  %7758 = vxpose.xlu1.c.b16.start.end [1/1] (short) (narrow) %v7204_v39, 16  ;;  %v7212_v57 = vpack.i.b16 %v7211_v20, %v7210_v25  ;;  %v6798_v60 = vrot.slane %v6790_v37, %v11584_v53 }
 0x823   : > { %v6556_v30 = vcombine.low %v6517_v0, %v13207_v8  ;;  %v6557_v43 = vcombine.high %v6517_v0, %v13207_v8  ;;  %v6623_v58 = vcombine.high %v14240_v14, %v14239_v24 }
 0x824   : > { %v6758_v13 = vcombine.low %v6702_v2, %v14241_v5  ;;  %7774 = vxpose.xlu0.c.b16.start.end [1/1] (short) (narrow) %v7208_v10, 16  ;;  %v6630_v40 = vrot.slane %v6622_v15, %v11584_v53  ;;  %v7226_v10 = vshrl.u32 %v6421_v45, 16  ;;  %v6791_v15 = vcombine.high %v6734_v19, %v13210_v28 }
 0x825   : > { %v7216_v39 = vpack.i.b16 %v6556_v30, %v6420_v48  ;;  %v7219_v6 = vshrl.u32 %v6556_v30, 16  ;;  %v7224_v59 = vpack.i.b16 %v6557_v43, %v6421_v45  ;;  %v7227_v48 = vshrl.u32 %v6557_v43, 16 }
 0x826   : > { %7790 = vxpose.xlu1.c.b16.start.end [1/1] (short) (narrow) %v7212_v57, 16  ;;  %v6766_v44 = vrot.slane %v6758_v13, %v11584_v53  ;;  %v6686_v20 = vcombine.low %v6630_v40, %v6662_v26  ;;  %v6759_v8 = vcombine.high %v6702_v2, %v14241_v5  ;;  %v6669_v13 = vrot.slane %v6655_v9, %v11584_v53 }
 0x827   : > { %v7220_v25 = vpack.i.b16 %v7219_v6, %v7218_v49  ;;  %v7228_v0 = vpack.i.b16 %v7227_v48, %v7226_v10  ;;  %v6687_v11 = vcombine.high %v6630_v40, %v6662_v26  ;;  %v6637_v49 = vrot.slane %v6623_v58, %v11584_v53  ;;  %v14243_v6 = vld [vmem:[#allocation28_spill] sm:$0xff] }
 0x828   : > { %7806 = vxpose.xlu0.c.b16.start.end [1/1] (short) (narrow) %v7216_v39, 16  ;;  %v6822_v37 = vcombine.low %v6766_v44, %v6798_v60  ;;  %v7234_v3 = vshrl.u32 %v6686_v20, 16  ;;  %v6805_v30 = vrot.slane %v6791_v15, %v11584_v53  ;;  %v6823_v28 = vcombine.high %v6766_v44, %v6798_v60  ;;  %v14242_v39 = vld [vmem:[#allocation29_spill] sm:$0xff]  ;;  %v14244_v44 = vld [vmem:[#allocation32_spill] sm:$0xff]  ;;  %v14245_v60 = vld [vmem:[#allocation35_spill] sm:$0xff] }
 0x829   : > { %v6773_v19 = vrot.slane %v6759_v8, %v11584_v53  ;;  %v6670_v57 = vcombine.low %v13061_v54, %v13064_v23  ;;  %v7242_v5 = vshrl.u32 %v6687_v11, 16  ;;  %v6688_v45 = vcombine.low %v6637_v49, %v6669_v13 }
 0x82a   : > { %7822 = vxpose.xlu1.c.b16.start.end [1/1] (short) (narrow) %v7220_v25, 16  ;;  %v7232_v24 = vpack.i.b16 %v6822_v37, %v6686_v20  ;;  %v7235_v14 = vshrl.u32 %v6822_v37, 16  ;;  %v6638_v26 = vcombine.low %v14243_v6, %v14242_v39  ;;  %v6806_v40 = vcombine.low %v13024_v52, %v13029_v12 }
 0x82b   : > { %v7240_v43 = vpack.i.b16 %v6823_v28, %v6687_v11  ;;  %v7243_v9 = vshrl.u32 %v6823_v28, 16  ;;  %v6824_v25 = vcombine.low %v6773_v19, %v6805_v30  ;;  %v6774_v10 = vcombine.low %v14245_v60, %v14244_v44  ;;  %v14249_v60 = vld [vmem:[#allocation46_spill] sm:$0xff] }
 0x82c   : > { %7838 = vxpose.xlu0.c.b16.start.end [1/1] (short) (narrow) %v7224_v59, 16  ;;  %v7236_v2 = vpack.i.b16 %v7235_v14, %v7234_v3  ;;  %v6678_v20 = vrot.slane %v6670_v57, %v11584_v53  ;;  %v7250_v23 = vshrl.u32 %v6688_v45, 16  ;;  %v6689_v58 = vcombine.high %v6637_v49, %v6669_v13 }
 0x82d   : > { %v7244_v54 = vpack.i.b16 %v7243_v9, %v7242_v5  ;;  %v6646_v15 = vrot.slane %v6638_v26, %v11584_v53  ;;  %v6814_v59 = vrot.slane %v6806_v40, %v11584_v53  ;;  %v7248_v48 = vpack.i.b16 %v6824_v25, %v6688_v45  ;;  %v14246_v26 = vld [vmem:[#allocation41_spill] sm:$0xff] }
 0x82e   : > { %7854 = vxpose.xlu1.c.b16.start.end [1/1] (short) (narrow) %v7228_v0, 16  ;;  %v7251_v12 = vshrl.u32 %v6824_v25, 16  ;;  %v6825_v52 = vcombine.high %v6773_v19, %v6805_v30  ;;  %v7258_v8 = vshrl.u32 %v6689_v58, 16  ;;  %v6782_v3 = vrot.slane %v6774_v10, %v11584_v53  ;;  %v14248_v25 = vld [vmem:[#allocation44_spill] sm:$0xff] }
 0x82f   : > { %v6690_v0 = vcombine.low %v6646_v15, %v6678_v20  ;;  %v6691_v28 = vcombine.high %v6646_v15, %v6678_v20  ;;  %v5696_v40 = vsel %vm5695_vm7, %v14246_v26, -inf  ;;  %v5702_v44 = vsel %vm5695_vm7, %v14248_v25, -inf }
 0x830   : > { %7870 = vxpose.xlu0.c.b16.start.end [1/1] (short) (narrow) %v7232_v24, 16  ;;  %v7252_v37 = vpack.i.b16 %v7251_v12, %v7250_v23  ;;  %v7256_v11 = vpack.i.b16 %v6825_v52, %v6689_v58  ;;  %v7259_v24 = vshrl.u32 %v6825_v52, 16  ;;  %v6826_v14 = vcombine.low %v6782_v3, %v6814_v59 }
 0x831   : > { %v7266_v49 = vshrl.u32 %v6690_v0, 16  ;;  %v6827_v5 = vcombine.high %v6782_v3, %v6814_v59  ;;  %v7274_v19 = vshrl.u32 %v6691_v28, 16  ;;  %v5705_v10 = vsel %vm5695_vm7, %v14249_v60, -inf }
 0x832   : > { %7886 = vxpose.xlu1.c.b16.start.end [1/1] (short) (narrow) %v7236_v2, 16  ;;  %v7260_v13 = vpack.i.b16 %v7259_v24, %v7258_v8  ;;  %v7264_v57 = vpack.i.b16 %v6826_v14, %v6690_v0  ;;  %v7267_v2 = vshrl.u32 %v6826_v14, 16 }
 0x833   : > { %v7272_v45 = vpack.i.b16 %v6827_v5, %v6691_v28  ;;  %v7275_v39 = vshrl.u32 %v6827_v5, 16 }
 0x834   : > { %7902 = vxpose.xlu0.c.b16.start.end [1/1] (short) (narrow) %v7240_v43, 16  ;;  %v7268_v30 = vpack.i.b16 %v7267_v2, %v7266_v49  ;;  %v14247_v43 = vld [vmem:[#allocation42_spill] sm:$0xff] }
 0x835   : > { %v7276_v6 = vpack.i.b16 %v7275_v39, %v7274_v19  ;;  %v5699_v9 = vsel %vm5695_vm7, %v14247_v43, -inf }
 0x836   : > { %7918 = vxpose.xlu1.c.b16.start.end [1/1] (short) (narrow) %v7244_v54, 16 }
 0x838   : > { %7934 = vxpose.xlu0.c.b16.start.end [1/1] (short) (narrow) %v7248_v48, 16 }
 0x83a   : > { %7950 = vxpose.xlu1.c.b16.start.end [1/1] (short) (narrow) %v7252_v37, 16 }
 0x83c   : > { %7966 = vxpose.xlu0.c.b16.start.end [1/1] (short) (narrow) %v7256_v11, 16 }
 0x83e   : > { %7982 = vxpose.xlu1.c.b16.start.end [1/1] (short) (narrow) %v7260_v13, 16 }
 0x840   : > { %7998 = vxpose.xlu0.c.b16.start.end [1/1] (short) (narrow) %v7264_v57, 16 }
 0x842   : > { %8014 = vxpose.xlu1.c.b16.start.end [1/1] (short) (narrow) %v7268_v30, 16 }
 0x844   : > { %8030 = vxpose.xlu0.c.b16.start.end [1/1] (short) (narrow) %v7272_v45, 16 }
 0x846   : > { %8046 = vxpose.xlu1.c.b16.start.end [1/1] (short) (narrow) %v7276_v6, 16 }
 0x851   : > { %5697 = vmax.xlane.f32.xlu0 %v5696_v40 }
 0x853   : > { %5700 = vmax.xlane.f32.xlu1 %v5699_v9 }
 0x855   : > { %5703 = vmax.xlane.f32.xlu0 %v5702_v44 }
 0x856   : > { %v7366_v20 = vpop.trf.xlu0 }
 0x857   : > { %5706 = vmax.xlane.f32.xlu1 %v5705_v10 }
 0x858   : > { %v7382_v54 = vpop.trf.xlu1 }
 0x85a   : > { %v7398_v23 = vpop.trf.xlu0 }
 0x85c   : > { %v7414_v58 = vpop.trf.xlu1 }
 0x85e   : > { %v7430_v15 = vpop.trf.xlu0 }
 0x85f   : > { %v8382_v0 = vcombine.low %v7366_v20, %v7430_v15 }
 0x860   : > { %v7446_v59 = vpop.trf.xlu1 }
 0x861   : > { %v8431_v24 = vcombine.low %v7382_v54, %v7446_v59  ;;  %v8389_v49 = vrot.slane %v8382_v0, %v14123_v62 }
 0x862   : > { %v7462_v48 = vpop.trf.xlu0 }
 0x863   : > { %v8390_v3 = vcombine.low %v7398_v23, %v7462_v48  ;;  %v8438_v5 = vrot.slane %v8431_v24, %v14123_v62 }
 0x864   : > { %v7478_v12 = vpop.trf.xlu1 }
 0x865   : > { %v8439_v14 = vcombine.low %v7414_v58, %v7478_v12  ;;  %v8397_v28 = vrot.slane %v8390_v3, %v14123_v62 }
 0x866   : > { %v7494_v52 = vpop.trf.xlu0 }
 0x867   : > { %v8446_v30 = vrot.slane %v8439_v14, %v14123_v62  ;;  %v8414_v39 = vcombine.low %v8389_v49, %v8397_v28 }
 0x868   : > { %v7510_v37 = vpop.trf.xlu1 }
 0x869   : > { %v8463_v44 = vcombine.low %v8438_v5, %v8446_v30  ;;  %v8421_v58 = vrot.slane %v8414_v39, %v11584_v53 }
 0x86a   : > { %v7526_v8 = vpop.trf.xlu0 }
 0x86b   : > { %v8470_v12 = vrot.slane %v8463_v44, %v11584_v53 }
 0x86c   : > { %v7542_v11 = vpop.trf.xlu1 }
 0x86e   : > { %v7558_v13 = vpop.trf.xlu0 }
 0x86f   : > { %v8398_v57 = vcombine.low %v7494_v52, %v7558_v13 }
 0x870   : > { %v7574_v2 = vpop.trf.xlu1 }
 0x871   : > { %v8447_v19 = vcombine.low %v7510_v37, %v7574_v2  ;;  %v8405_v6 = vrot.slane %v8398_v57, %v14123_v62 }
 0x872   : > { %v7590_v45 = vpop.trf.xlu0 }
 0x873   : > { %v8406_v40 = vcombine.low %v7526_v8, %v7590_v45  ;;  %v8454_v10 = vrot.slane %v8447_v19, %v14123_v62  ;;  %v14250_v19 = vpack.i.b16 %v13319_v42, %v13316_v35 }
 0x874   : > { %v7606_v9 = vpop.trf.xlu1 }
 0x875   : > { %v8413_v20 = vrot.slane %v8406_v40, %v14123_v62  ;;  %v8455_v54 = vcombine.low %v7542_v11, %v7606_v9 }
 0x876   : > { %v7622_v23 = vpop.trf.xlu0 }
 0x877   : > { %v8422_v15 = vcombine.low %v8405_v6, %v8413_v20  ;;  %v8462_v59 = vrot.slane %v8455_v54, %v14123_v62  ;;  %v14251_v20 = vpack.i.b16 %v13325_v4, %v13322_v18  ;;  %v14253_v18 = vpack.i.b16 %v13353_v33, %v13336_v46 }
 0x878   : > { %v7638_v48 = vpop.trf.xlu1 }
 0x879   : > { %v8429_v52 = vrot.slane %v8422_v15, %v11584_v53  ;;  %v8471_v37 = vcombine.low %v8454_v10, %v8462_v59 }
 0x87a   : > { %v7654_v8 = vpop.trf.xlu0 }
 0x87b   : > { %v8430_v0 = vcombine.low %v8421_v58, %v8429_v52  ;;  %v8478_v3 = vrot.slane %v8471_v37, %v11584_v53  ;;  %v14254_v52 = vpack.i.b16 %v13365_v38, %v13357_v17 }
 0x87c   : > { %v7670_v24 = vpop.trf.xlu1 }
 0x87d   : > { %v8479_v14 = vcombine.low %v8470_v12, %v8478_v3  ;;  %v8777_v13 = vshrl.u32 %v8430_v0, 16 }
 0x87e   : > { %v7686_v11 = vpop.trf.xlu0 }
 0x87f   : > { %v8480_v49 = vcombine.low %v7622_v23, %v7686_v11  ;;  %v8776_v28 = vpack.i.b16 %v8479_v14, %v8430_v0  ;;  %v8778_v57 = vshrl.u32 %v8479_v14, 16  ;;  %v14256_v11 = vpack.i.b16 %v13393_v1, %v13384_v47 }
 0x880   : > { %v7702_v2 = vpop.trf.xlu1 }
 0x881   : > { %v8529_v5 = vcombine.low %v7638_v48, %v7702_v2  ;;  %10634 = vmatprep.mubr.msk.bf16.mxu0 %vm5695_vm7, %v8776_v28  ;;  %v8779_v30 = vpack.i.b16 %v8778_v57, %v8777_v13  ;;  %v8487_v39 = vrot.slane %v8480_v49, %v14123_v62 }
 0x882   : > { %8062 = vxpose.xlu0.c.b16.start.end [1/1] (short) (narrow) %v14250_v19, 16  ;;  %v7718_v45 = vpop.trf.xlu0 }
 0x883   : > { %10644 = vmatprep.mubr.msk.bf16.mxu1 %vm5695_vm7, %v8779_v30  ;;  %v8488_v6 = vcombine.low %v7654_v8, %v7718_v45  ;;  %v8536_v9 = vrot.slane %v8529_v5, %v14123_v62 }
 0x884   : > { %8078 = vxpose.xlu1.c.b16.start.end [1/1] (short) (narrow) %v13349_v21, 16  ;;  %v7734_v40 = vpop.trf.xlu1  ;;  %v14252_v21 = vpack.i.b16 %v13333_v51, %v13328_v29 }
 0x885   : > { %v8495_v44 = vrot.slane %v8488_v6, %v14123_v62  ;;  %v8537_v10 = vcombine.low %v7670_v24, %v7734_v40 }
 0x886   : > { %8094 = vxpose.xlu0.c.b16.start.end [1/1] (short) (narrow) %v14251_v20, 16  ;;  %v7750_v35 = vpop.trf.xlu0 }
 0x887   : > { %v8512_v42 = vcombine.low %v8487_v39, %v8495_v44  ;;  %v8544_v54 = vrot.slane %v8537_v10, %v14123_v62 }
 0x888   : > { %8110 = vxpose.xlu1.c.b16.start.end [1/1] (short) (narrow) %v13359_v56, 16  ;;  %v7766_v23 = vpop.trf.xlu1 }
 0x889   : > { %v8561_v58 = vcombine.low %v8536_v9, %v8544_v54  ;;  %v8519_v17 = vrot.slane %v8512_v42, %v11584_v53 }
 0x88a   : > { %8126 = vxpose.xlu0.c.b16.start.end [1/1] (short) (narrow) %v14252_v21, 16  ;;  %v7782_v15 = vpop.trf.xlu0 }
 0x88c   : > { %8142 = vxpose.xlu1.c.b16.start.end [1/1] (short) (narrow) %v13361_v61, 16  ;;  %v7798_v59 = vpop.trf.xlu1 }
 0x88e   : > { %8158 = vxpose.xlu0.c.b16.start.end [1/1] (short) (narrow) %v14253_v18, 16  ;;  %v7814_v4 = vpop.trf.xlu0 }
 0x88f   : > { %v8496_v48 = vcombine.low %v7750_v35, %v7814_v4 }
 0x890   : > { %8174 = vxpose.xlu1.c.b16.start.end [1/1] (short) (narrow) %v13386_v32, 16  ;;  %v7830_v12 = vpop.trf.xlu1  ;;  %v14255_v32 = vpack.i.b16 %v13376_v55, %v13368_v31 }
 0x891   : > { %v8545_v56 = vcombine.low %v7766_v23, %v7830_v12  ;;  %v8503_v51 = vrot.slane %v8496_v48, %v14123_v62 }
 0x892   : > { %8190 = vxpose.xlu0.c.b16.start.end [1/1] (short) (narrow) %v14254_v52, 16  ;;  %v7846_v29 = vpop.trf.xlu0 }
 0x893   : > { %v8504_v37 = vcombine.low %v7782_v15, %v7846_v29  ;;  %v8552_v46 = vrot.slane %v8545_v56, %v14123_v62 }
 0x894   : > { %8206 = vxpose.xlu1.c.b16.start.end [1/1] (short) (narrow) %v13395_v50, 16  ;;  %v7862_v61 = vpop.trf.xlu1  ;;  %v8568_v50 = vrot.slane %v8561_v58, %v11584_v53 }
 0x895   : > { %v8511_v33 = vrot.slane %v8504_v37, %v14123_v62  ;;  %v8553_v8 = vcombine.low %v7798_v59, %v7862_v61 }
 0x896   : > { %8222 = vxpose.xlu0.c.b16.start.end [1/1] (short) (narrow) %v14255_v32, 16  ;;  %v7878_v0 = vpop.trf.xlu0 }
 0x897   : > { %v8520_v38 = vcombine.low %v8503_v51, %v8511_v33  ;;  %v8560_v3 = vrot.slane %v8553_v8, %v14123_v62 }
 0x898   : > { %8238 = vxpose.xlu1.c.b16.start.end [1/1] (short) (narrow) %v13406_v7, 16  ;;  %v7894_v24 = vpop.trf.xlu1 }
 0x899   : > { %v8527_v14 = vrot.slane %v8520_v38, %v11584_v53  ;;  %v8569_v13 = vcombine.low %v8552_v46, %v8560_v3 }
 0x89a   : > { %8254 = vxpose.xlu0.c.b16.start.end [1/1] (short) (narrow) %v14256_v11, 16  ;;  %v7910_v31 = vpop.trf.xlu0 }
 0x89b   : > { %v13567_v55 = vcombine.low %v8519_v17, %v8527_v14  ;;  %v8576_v49 = vrot.slane %v8569_v13, %v11584_v53 }
 0x89c   : > { %8270 = vxpose.xlu1.c.b16.start.end [1/1] (short) (narrow) %v13423_v27, 16  ;;  %v7926_v28 = vpop.trf.xlu1 }
 0x89d   : > { %v8783_v7 = vshrl.u32 %v13567_v55, 16  ;;  %v13572_v57 = vcombine.low %v8568_v50, %v8576_v49 }
 0x89e   : > { %v7942_v2 = vpop.trf.xlu0 }
 0x89f   : > { %v8782_v5 = vpack.i.b16 %v13572_v57, %v13567_v55  ;;  %v8784_v30 = vshrl.u32 %v13572_v57, 16  ;;  %v8578_v47 = vcombine.low %v7878_v0, %v7942_v2 }
 0x8a0   : > { %v7958_v1 = vpop.trf.xlu1 }
 0x8a1   : > { %v8627_v19 = vcombine.low %v7894_v24, %v7958_v1  ;;  %v13577_v45 = vpack.i.b16 %v8784_v30, %v8783_v7  ;;  %v8585_v6 = vrot.slane %v8578_v47, %v14123_v62 }
 0x8a2   : > { %v7974_v39 = vpop.trf.xlu0 }
 0x8a3   : > { %v8586_v27 = vcombine.low %v7910_v31, %v7974_v39  ;;  %v8634_v9 = vrot.slane %v8627_v19, %v14123_v62 }
 0x8a4   : > { %v7990_v40 = vpop.trf.xlu1 }
 0x8a5   : > { %v8593_v44 = vrot.slane %v8586_v27, %v14123_v62  ;;  %v8635_v10 = vcombine.low %v7926_v28, %v7990_v40 }
 0x8a6   : > { %v8006_v54 = vpop.trf.xlu0 }
 0x8a7   : > { %v8610_v20 = vcombine.low %v8585_v6, %v8593_v44  ;;  %v8642_v35 = vrot.slane %v8635_v10, %v14123_v62  ;;  %v14257_v10 = vpack.i.b16 %v13404_v63, %v13400_v36 }
 0x8a8   : > { %v8022_v23 = vpop.trf.xlu1 }
 0x8a9   : > { %v8659_v42 = vcombine.low %v8634_v9, %v8642_v35  ;;  %v8617_v7 = vrot.slane %v8610_v20, %v11584_v53  ;;  %v14258_v20 = vpack.i.b16 %v13421_v22, %v13413_v41  ;;  %v14259_v35 = vld [vmem:[#allocation40_spill] sm:$0xff] }
 0x8aa   : > { %v8038_v58 = vpop.trf.xlu0 }
 0x8ab   : > { %v8666_v1 = vrot.slane %v8659_v42, %v11584_v53  ;;  %v14260_v42 = vld [vmem:[#allocation38_spill] sm:$0xff] }
 0x8ac   : > { %v8054_v21 = vpop.trf.xlu1 }
 0x8de   : > { %v5698_v15 = vpop.xlane.xlu0 %5697 }
 0x8df   : > { %v5708_v59 = vsub.f32 %v14246_v26, %v5698_v15 }
 0x8e0   : > { %v5701_v18 = vpop.xlane.xlu1 %5700 }
 0x8e1   : > { %v5712_v4 = vmul.f32 1.442695, %v5708_v59  ;;  %v5709_v48 = vsub.f32 %v14247_v43, %v5701_v18 }
 0x8e2   : > { %v5704_v12 = vpop.xlane.xlu0 %5703 }
 0x8e3   : > { %10903 = vpow2.f32 %v5712_v4  ;;  %v5714_v56 = vmul.f32 1.442695, %v5709_v48  ;;  %v5710_v52 = vsub.f32 %v14248_v25, %v5704_v12 }
 0x8e4   : > { %v5707_v29 = vpop.xlane.xlu1 %5706 }
 0x8e5   : > { %10905 = vpow2.f32 %v5714_v56  ;;  %v5716_v51 = vmul.f32 1.442695, %v5710_v52  ;;  %v5711_v37 = vsub.f32 %v14249_v60, %v5707_v29 }
 0x8e7   : > { %10907 = vpow2.f32 %v5716_v51  ;;  %v5718_v61 = vmul.f32 1.442695, %v5711_v37 }
 0x8e8   : > { %v8070_v46 = vpop.trf.xlu0 }
 0x8e9   : > { %10909 = vpow2.f32 %v5718_v61  ;;  %v8594_v26 = vcombine.low %v8006_v54, %v8070_v46  ;;  %v14261_v54 = vpack.i.b16 %v14259_v35, %v14260_v42 }
 0x8ea   : > { %v8086_v33 = vpop.trf.xlu1 }
 0x8eb   : > { %v8643_v43 = vcombine.low %v8022_v23, %v8086_v33  ;;  %v8601_v3 = vrot.slane %v8594_v26, %v14123_v62  ;;  %v14262_v23 = vld [vmem:[#allocation31_spill] sm:$0xff] }
 0x8ec   : > { %v8102_v8 = vpop.trf.xlu0 }
 0x8ed   : > { %v13587_v32 = vpop.eup %10903  ;;  %v8602_v0 = vcombine.low %v8038_v58, %v8102_v8  ;;  %v8650_v13 = vrot.slane %v8643_v43, %v14123_v62 }
 0x8ee   : > { %v8118_v17 = vpop.trf.xlu1  ;;  %v5720_v25 = vsel %vm5695_vm7, %v13587_v32, 0.0 }
 0x8ef   : > { %v10906_v38 = vpop.eup %10905  ;;  %v8609_v60 = vrot.slane %v8602_v0, %v14123_v62  ;;  %v8651_v24 = vcombine.low %v8054_v21, %v8118_v17  ;;  %5721 = vadd.xlane.f32.xlu0 %v5720_v25 }
 0x8f0   : > { %v5723_v50 = vsel %vm5695_vm7, %v10906_v38, 0.0  ;;  %v8134_v58 = vpop.trf.xlu0 }
 0x8f1   : > { %v13594_v14 = vpop.eup %10907  ;;  %v8618_v11 = vcombine.low %v8601_v3, %v8609_v60  ;;  %v8658_v31 = vrot.slane %v8651_v24, %v14123_v62  ;;  %5724 = vadd.xlane.f32.xlu1 %v5723_v50 }
 0x8f2   : > { %v5726_v49 = vsel %vm5695_vm7, %v13594_v14, 0.0  ;;  %v8150_v21 = vpop.trf.xlu1 }
 0x8f3   : > { %v10910_v28 = vpop.eup %10909  ;;  %v8625_v2 = vrot.slane %v8618_v11, %v11584_v53  ;;  %v8667_v30 = vcombine.low %v8650_v13, %v8658_v31  ;;  %5727 = vadd.xlane.f32.xlu0 %v5726_v49 }
 0x8f4   : > { %v5729_v47 = vsel %vm5695_vm7, %v10910_v28, 0.0  ;;  %v8166_v15 = vpop.trf.xlu0 }
 0x8f5   : > { %v13604_v19 = vcombine.low %v8617_v7, %v8625_v2  ;;  %v8674_v39 = vrot.slane %v8667_v30, %v11584_v53  ;;  %5730 = vadd.xlane.f32.xlu1 %v5729_v47 }
 0x8f6   : > { %v8182_v59 = vpop.trf.xlu1 }
 0x8f7   : > { %v13607_v6 = vcombine.low %v8666_v1, %v8674_v39  ;;  %v8789_v40 = vshrl.u32 %v13604_v19, 16  ;;  %v14263_v1 = vmov 0.0  }
 0x8f8   : > { %v8198_v36 = vpop.trf.xlu0 }
 0x8f9   : > { %v8788_v27 = vpack.i.b16 %v13607_v6, %v13604_v19  ;;  %v8790_v9 = vshrl.u32 %v13607_v6, 16  ;;  %v8676_v37 = vcombine.low %v8134_v58, %v8198_v36  ;;  %v14264_v19 = vmov 0  }
 0x8fa   : > { %v8214_v63 = vpop.trf.xlu1 }
 0x8fb   : > { %v13613_v44 = vpack.i.b16 %v8790_v9, %v8789_v40  ;;  %v8725_v43 = vcombine.low %v8150_v21, %v8214_v63  ;;  %v8683_v60 = vrot.slane %v8676_v37, %v14123_v62  ;;  %v10855_v37 = vld [vmem:[%s11278_s26] sm:$0xff]  }
 0x8fc   : > { %v8230_v18 = vpop.trf.xlu0 }
 0x8fd   : > { %v8684_v61 = vcombine.low %v8166_v15, %v8230_v18 }
 0x8ff   : > { %v8691_v50 = vrot.slane %v8684_v61, %v14123_v62  ;;  %v10856_v61 = vld [vmem:[%s11278_s26 + $0x8] sm:$0xff]  }
 0x900   : > { %v8262_v4 = vpop.trf.xlu0 }
 0x920   : > { %8286 = vxpose.xlu0.c.b16.start.end [1/1] (short) (narrow) %v14257_v10, 16  ;;  %v8708_v10 = vcombine.low %v8683_v60, %v8691_v50 }
 0x922   : > { %8302 = vxpose.xlu1.c.b16.start.end [1/1] (short) (narrow) %v13435_v34, 16  ;;  %v8246_v34 = vpop.trf.xlu1  ;;  %v8715_v58 = vrot.slane %v8708_v10, %v11584_v53 }
 0x923   : > { %v8733_v0 = vcombine.low %v8182_v59, %v8246_v34 }
 0x924   : > { %8318 = vxpose.xlu0.c.b16.start.end [1/1] (short) (narrow) %v14258_v20, 16 }
 0x925   : > { %v8740_v49 = vrot.slane %v8733_v0, %v14123_v62 }
 0x926   : > { %8334 = vxpose.xlu1.c.b16.start.end [1/1] (short) (narrow) %v13456_v16, 16  ;;  %v8278_v48 = vpop.trf.xlu1 }
 0x928   : > { %8350 = vxpose.xlu0.c.b16.start.end [1/1] (short) (narrow) %v14261_v54, 16 }
 0x92a   : > { %8366 = vxpose.xlu1.c.b16.start.end [1/1] (short) (narrow) %v14262_v23, 16 }
 0x97c   : > { %v5722_v41 = vpop.xlane.xlu0 %5721 }
 0x97d   : > { %10911 = vrcp.f32 %v5722_v41 }
 0x97e   : > { %v5725_v22 = vpop.xlane.xlu1 %5724 }
 0x97f   : > { %10913 = vrcp.f32 %v5725_v22 }
 0x980   : > { %v5728_v16 = vpop.xlane.xlu0 %5727 }
 0x981   : > { %10915 = vrcp.f32 %v5728_v16 }
 0x982   : > { %v5731_v12 = vpop.xlane.xlu1 %5730 }
 0x983   : > { %10917 = vrcp.f32 %v5731_v12 }
 0x986   : > { %v8294_v56 = vpop.trf.xlu0 }
 0x987   : > { %v10912_v52 = vpop.eup %10911 }
 0x988   : > { %v8310_v29 = vpop.trf.xlu1  ;;  %v5733_v33 = vmul.f32 %v10912_v52, %v13587_v32 }
 0x989   : > { %v10914_v51 = vpop.eup %10913 }
 0x98a   : > { %v8326_v46 = vpop.trf.xlu0  ;;  %v5735_v26 = vmul.f32 %v10914_v51, %v10906_v38  ;;  %v8732_v38 = vrot.slane %v8725_v43, %v14123_v62  ;;  %v10861_v43 = vld [vmem:[%s11278_s26 + $0x30] sm:$0xff]  }
 0x98b   : > { %v10916_v8 = vpop.eup %10915  ;;  %v8692_v24 = vcombine.low %v8262_v4, %v8326_v46  ;;  %v10857_v46 = vld [vmem:[%s11278_s26 + $0x10] sm:$0xff]  }
 0x98c   : > { %v8342_v17 = vpop.trf.xlu1  ;;  %v5740_v25 = vpack.c.bf16 %v5735_v26, %v5733_v33  ;;  %v5737_v31 = vmul.f32 %v10916_v8, %v13594_v14  ;;  %v10858_v33 = vld [vmem:[%s11278_s26 + $0x18] sm:$0xff]   ;;  %v10859_v26 = vld [vmem:[%s11278_s26 + $0x20] sm:$0xff]   ;;  %v10860_v8 = vld [vmem:[%s11278_s26 + $0x28] sm:$0xff]  }
 0x98d   : > { %v10918_v3 = vpop.eup %10917  ;;  %v8741_v7 = vcombine.low %v8278_v48, %v8342_v17  ;;  %v8699_v39 = vrot.slane %v8692_v24, %v14123_v62 }
 0x98e   : > { %v8358_v13 = vpop.trf.xlu0  ;;  %10692 = vmatprep.subr.msk.bf16.mxu0 %vm5695_vm7, %v5740_v25  ;;  %v8811_v11 = vsel %vm5695_vm7, %v5740_v25, 0  ;;  %v5739_v32 = vmul.f32 %v10918_v3, %v10910_v28  ;;  %v8757_v28 = vcombine.low %v8732_v38, %v8740_v49 }
 0x98f   : > { %v8700_v2 = vcombine.low %v8294_v56, %v8358_v13  ;;  %10633 = vmatpush3.bf16.xpose.msra.mxu0 %v8811_v11  ;;  %v8748_v20 = vrot.slane %v8741_v7, %v14123_v62 }
 0x990   : > { %v8374_v30 = vpop.trf.xlu1  ;;  %v5741_v47 = vpack.c.bf16 %v5739_v32, %v5737_v31  ;;  %10652 = vmatprep.subr.bf16.mxu0 %v14263_v1  ;;  %v8764_v21 = vrot.slane %v8757_v28, %v11584_v53 }
 0x991   : > { %v8707_v40 = vrot.slane %v8700_v2, %v14123_v62  ;;  %v8749_v9 = vcombine.low %v8310_v29, %v8374_v30 }
 0x992   : > { %10693 = vmatprep.subr.msk.bf16.mxu1 %vm5695_vm7, %v5741_v47  ;;  %v8891_v14 = vsel %vm5695_vm7, %v5741_v47, 0 }
 0x993   : > { %v8716_v35 = vcombine.low %v8699_v39, %v8707_v40  ;;  %v8756_v42 = vrot.slane %v8749_v9, %v14123_v62  ;;  %10643 = vmatpush3.bf16.xpose.msra.mxu1 %v8891_v14 }
 0x995   : > { %v8723_v54 = vrot.slane %v8716_v35, %v11584_v53  ;;  %v8765_v23 = vcombine.low %v8748_v20, %v8756_v42 }
 0x996   : > { %10635 = vmatmul.mubr.msk.bf16.vlgmr.msra.gmra.mrb[4].mxu0 %vm5695_vm7, %v8782_v5 }
 0x997   : > { %v8772_v15 = vrot.slane %v8765_v23, %v11584_v53  ;;  %10638 = vmatprep.mubr.msk.bf16.mxu0 %vm5695_vm7, %v8788_v27  ;;  %v8724_v59 = vcombine.low %v8715_v58, %v8723_v54  ;;  %10653 = vmatpush3.bf16.msra.mxu0 %v10855_v37 }
 0x998   : > { %10654 = vmatprep.subr.bf16.mxu0 %v14263_v1 }
 0x999   : > { %v8773_v36 = vcombine.low %v8764_v21, %v8772_v15  ;;  %v8795_v5 = vshrl.u32 %v8724_v59, 16 }
 0x99a   : > { %10645 = vmatmul.mubr.msk.bf16.vlgmr.msra.gmra.mrb[12].mxu1 %vm5695_vm7, %v13577_v45 }
 0x99b   : > { %10648 = vmatprep.mubr.msk.bf16.mxu1 %vm5695_vm7, %v13613_v44  ;;  %v8794_v55 = vpack.i.b16 %v8773_v36, %v8724_v59  ;;  %v8796_v57 = vshrl.u32 %v8773_v36, 16  ;;  %10655 = vmatpush3.bf16.msra.mxu0 %v10856_v61 }
 0x99c   : > { %10656 = vmatprep.subr.bf16.mxu0 %v14263_v1 }
 0x99d   : > { %v8797_v63 = vpack.i.b16 %v8796_v57, %v8795_v5 }
 0x99e   : > { %10639 = vmatmul.mubr.msk.bf16.gmra.mrb[8].mxu0 %vm5695_vm7, %v8794_v55 }
 0x99f   : > { %10668 = vmatprep.mubr.msk.bf16.mxu0 %vm11042_vm5, %v14263_v1  ;;  %10657 = vmatpush3.bf16.msra.mxu0 %v10857_v46 }
 0x9a0   : > { %10658 = vmatprep.subr.bf16.mxu0 %v14263_v1 }
 0x9a2   : > { %10649 = vmatmul.mubr.msk.bf16.gmra.mrb[16].mxu1 %vm5695_vm7, %v8797_v63 }
 0x9a3   : > { %9561 = vmatprep.mubr.bf16.mxu1 %v14264_v19  ;;  %10659 = vmatpush3.bf16.msra.mxu0 %v10858_v33 }
 0x9a4   : > { %10660 = vmatprep.subr.bf16.mxu0 %v14263_v1 }
 0x9a7   : > { %10661 = vmatpush3.bf16.msra.mxu0 %v10859_v26 }
 0x9a8   : > { %10662 = vmatprep.subr.bf16.mxu0 %v14263_v1 }
 0x9ab   : > { %10663 = vmatpush3.bf16.msra.mxu0 %v10860_v8 }
 0x9ac   : > { %10664 = vmatprep.subr.bf16.mxu0 %v14263_v1 }
 0x9af   : > { %10665 = vmatpush3.bf16.msra.mxu0 %v10861_v43 }
 0x9b0   : > { %10666 = vmatprep.subr.bf16.mxu0 %v14263_v1 }
 0xa69   : > { %v10636_v6 = vpop.f32.mrb[4].mxu0 }
 0xa6a   : > { %v8847_v27 = vpop.f32.mrb[5].mxu0 }
 0xa6b   : > { %8958 = vxpose.xlu0.b32.start [1/8] (short) (narrow) %v8847_v27, 16  ;;  %v10637_v45 = vpop.f32.mrb[6].mxu0 }
 0xa6c   : > { %v8850_v18 = vpop.f32.mrb[7].mxu0 }
 0xa6d   : > { %v10646_v34 = vpop.f32.mrb[12].mxu1 }
 0xa6e   : > { %v8927_v44 = vpop.f32.mrb[13].mxu1 }
 0xa6f   : > { %8959 = vxpose.xlu0.b32.cont [2/8] (short) (narrow) %v8850_v18, 16  ;;  %8990 = vxpose.xlu1.b32.start [1/8] (short) (narrow) %v8927_v44, 16  ;;  %v10647_v4 = vpop.f32.mrb[14].mxu1 }
 0xa70   : > { %v8930_v48 = vpop.f32.mrb[15].mxu1 }
 0xa71   : > { %v10640_v41 = vpop.f32.mrb[8].mxu0 }
 0xa72   : > { %v8863_v22 = vpop.f32.mrb[9].mxu0 }
 0xa73   : > { %8960 = vxpose.xlu0.b32.cont [3/8] (short) (narrow) %v10636_v6, 16  ;;  %v10641_v16 = vpop.f32.mrb[10].mxu0  ;;  %8991 = vxpose.xlu1.b32.cont [2/8] (short) (narrow) %v8930_v48, 16 }
 0xa74   : > { %v8866_v12 = vpop.f32.mrb[11].mxu0 }
 0xa75   : > { %v10650_v56 = vpop.f32.mrb[16].mxu1 }
 0xa76   : > { %v8943_v52 = vpop.f32.mrb[17].mxu1 }
 0xa77   : > { %8961 = vxpose.xlu0.b32.cont [4/8] (short) (narrow) %v10637_v45, 16  ;;  %8992 = vxpose.xlu1.b32.cont [3/8] (short) (narrow) %v10646_v34, 16  ;;  %v10651_v29 = vpop.f32.mrb[18].mxu1 }
 0xa78   : > { %v8946_v51 = vpop.f32.mrb[19].mxu1 }
 0xa7b   : > { %8962 = vxpose.xlu0.b32.cont [5/8] (short) (narrow) %v8863_v22, 16  ;;  %8993 = vxpose.xlu1.b32.cont [4/8] (short) (narrow) %v10647_v4, 16 }
 0xa7f   : > { %8963 = vxpose.xlu0.b32.cont [6/8] (short) (narrow) %v8866_v12, 16  ;;  %8994 = vxpose.xlu1.b32.cont [5/8] (short) (narrow) %v8943_v52, 16 }
 0xa83   : > { %8964 = vxpose.xlu0.b32.cont [7/8] (short) (narrow) %v10640_v41, 16  ;;  %8995 = vxpose.xlu1.b32.cont [6/8] (short) (narrow) %v8946_v51, 16 }
 0xa87   : > { %8965 = vxpose.xlu0.b32.end [8/8] (short) (narrow) %v10641_v16, 16  ;;  %8996 = vxpose.xlu1.b32.cont [7/8] (short) (narrow) %v10650_v56, 16 }
 0xa8b   : > { %8997 = vxpose.xlu1.b32.end [8/8] (short) (narrow) %v10651_v29, 16  ;;  %v10862_v29 = vld [vmem:[%s11278_s26 + $0x38] sm:$0xff]  }
 0xa8c   : > { %10667 = vmatpush3.bf16.msra.mxu0 %v10862_v29 }
 0xaeb   : > { %v8974_v0 = vpop.trf.xlu0 }
 0xaec   : > { %v9022_v17 = vcombine.high %v8974_v0, %v14263_v1  ;;  %v9029_v25 = vrot.slane %v8974_v0, %v14123_v62 }
 0xaee   : > { %v9036_v24 = vrot.slane %v9022_v17, %v14123_v62 }
 0xaef   : > { %v9006_v3 = vpop.trf.xlu1  ;;  %v8975_v60 = vpop.trf.xlu0 }
 0xaf0   : > { %v9037_v50 = vcombine.high %v9006_v3, %v14263_v1  ;;  %v9044_v13 = vrot.slane %v9006_v3, %v14123_v62  ;;  %v9088_v11 = vcombine.high %v8975_v60, %v14263_v1  ;;  %v9095_v49 = vrot.slane %v8975_v60, %v14123_v62 }
 0xaf2   : > { %v9051_v31 = vrot.slane %v9037_v50, %v14123_v62  ;;  %v9052_v32 = vcombine.low %v9029_v25, %v9044_v13  ;;  %v9053_v38 = vcombine.high %v9029_v25, %v9044_v13  ;;  %v9102_v40 = vrot.slane %v9088_v11, %v14123_v62 }
 0xaf3   : > { %v9007_v7 = vpop.trf.xlu1 }
 0xaf4   : > { %v9060_v2 = vrot.slane %v9052_v32, %v11584_v53  ;;  %v9067_v30 = vrot.slane %v9053_v38, %v11584_v53  ;;  %v9068_v47 = vcombine.low %v9036_v24, %v9051_v31  ;;  %v9069_v39 = vcombine.high %v9036_v24, %v9051_v31  ;;  %v10928_v31 = vld [vmem:[#allocation2] sm:$0xff] }
 0xaf5   : > { %v9103_v9 = vcombine.high %v9007_v7, %v14263_v1  ;;  %v9110_v10 = vrot.slane %v9007_v7, %v14123_v62  ;;  %v10929_v7 = vld [vmem:[#allocation2 + $0x8] sm:$0xff] }
 0xaf6   : > { %v9076_v14 = vrot.slane %v9068_v47, %v11584_v53  ;;  %v9083_v28 = vrot.slane %v9069_v39, %v11584_v53  ;;  %v9154_v20 = vcombine.low %v9060_v2, %v9067_v30  ;;  %v10299_v35 = vcombine.high %v9060_v2, %v9067_v30  ;;  %v10863_v30 = vld [vmem:[%s11306_s11] ss:$8 sps:$4 sm:$0xff]   ;;  %v10865_v47 = vld [vmem:[%s11306_s11 + $0x4] ss:$8 sps:$4 sm:$0xff]   ;;  %v10868_v39 = vld [vmem:[%s11306_s11 + $0x14] ss:$8 sps:$4 sm:$0xff]  }
 0xaf7   : > { %v9117_v42 = vrot.slane %v9103_v9, %v14123_v62  ;;  %v9118_v54 = vcombine.low %v9095_v49, %v9110_v10  ;;  %v9119_v23 = vcombine.high %v9095_v49, %v9110_v10  ;;  %9529 = vmatprep.subr.bf16.mxu1 %v10865_v47 }
 0xaf8   : > { %v9161_v58 = vrot.slane %v9154_v20, %v14123_v62  ;;  %v9169_v21 = vrot.slane %v10299_v35, %v14123_v62  ;;  %v9170_v15 = vcombine.low %v9076_v14, %v9083_v28  ;;  %v10300_v59 = vcombine.high %v9076_v14, %v9083_v28  ;;  %9530 = vmatpush1.bf16.msra.mxu1 %v10863_v30 }
 0xaf9   : > { %v9126_v1 = vrot.slane %v9118_v54, %v11584_v53  ;;  %v9133_v36 = vrot.slane %v9119_v23, %v11584_v53  ;;  %v9134_v55 = vcombine.low %v9102_v40, %v9117_v42  ;;  %v9135_v57 = vcombine.high %v9102_v40, %v9117_v42  ;;  %v10866_v40 = vld [vmem:[%s11306_s11 + $0x10] ss:$8 sps:$4 sm:$0xff]   ;;  %9531 = vmatprep.subr.bf16.mxu1 %v10868_v39  ;;  %v10869_v23 = vld [vmem:[%s11306_s11 + $0x20] ss:$8 sps:$4 sm:$0xff]  }
 0xafa   : > { %v9177_v5 = vrot.slane %v9170_v15, %v14123_v62  ;;  %v9185_v63 = vrot.slane %v10300_v59, %v14123_v62  ;;  %v9186_v19 = vcombine.low %v9161_v58, %v9169_v21  ;;  %v10871_v58 = vld [vmem:[%s11306_s11 + $0x24] ss:$8 sps:$4 sm:$0xff]   ;;  %v10872_v21 = vld [vmem:[%s11306_s11 + $0x30] ss:$8 sps:$4 sm:$0xff]   ;;  %v10874_v15 = vld [vmem:[%s11306_s11 + $0x34] ss:$8 sps:$4 sm:$0xff]  }
 0xafb   : > { %v9142_v6 = vrot.slane %v9134_v55, %v11584_v53  ;;  %v9149_v27 = vrot.slane %v9135_v57, %v11584_v53  ;;  %v9204_v45 = vcombine.low %v9126_v1, %v9133_v36  ;;  %v10301_v18 = vcombine.high %v9126_v1, %v9133_v36  ;;  %v10877_v59 = vld [vmem:[%s11306_s11 + $0x44] ss:$8 sps:$4 sm:$0xff]   ;;  %v10875_v1 = vld [vmem:[%s11306_s11 + $0x40] ss:$8 sps:$4 sm:$0xff]   ;;  %v10880_v36 = vld [vmem:[%s11306_s11 + $0x54] ss:$8 sps:$4 sm:$0xff]  }
 0xafc   : > { %v9194_v34 = vcombine.low %v9177_v5, %v9185_v63  ;;  %v9193_v22 = vrot.slane %v9186_v19, %v11584_v53  ;;  %9532 = vmatpush1.bf16.msra.mxu1 %v10866_v40  ;;  %v10887_v55 = vld [vmem:[%s11317_s10 + $0x40] sm:$0xff]   ;;  %v10889_v5 = vld [vmem:[%s11317_s10 + $0x48] sm:$0xff]   ;;  %v10878_v63 = vld [vmem:[%s11306_s11 + $0x50] ss:$8 sps:$4 sm:$0xff]  }
 0xafd   : > { %v9211_v44 = vrot.slane %v9204_v45, %v14123_v62  ;;  %v9219_v4 = vrot.slane %v10301_v18, %v14123_v62  ;;  %v9220_v48 = vcombine.low %v9142_v6, %v9149_v27  ;;  %v10302_v41 = vcombine.high %v9142_v6, %v9149_v27  ;;  %9533 = vmatprep.subr.bf16.mxu1 %v10871_v58  ;;  %v10888_v57 = vld [vmem:[%s11317_s10] sm:$0xff]   ;;  %v10890_v6 = vld [vmem:[%s11317_s10 + $0x8] sm:$0xff]   ;;  %v10891_v27 = vld [vmem:[%s11317_s10 + $0x50] sm:$0xff]  }
 0xafe   : > { %v9201_v16 = vrot.slane %v9194_v34, %v11584_v53  ;;  %v10883_v19 = vld [vmem:[%s11306_s11 + $0x64] ss:$8 sps:$4 sm:$0xff]   ;;  %10453 = vmatprep.subr.bf16.mxu0 %v10887_v55  ;;  %v10881_v45 = vld [vmem:[%s11306_s11 + $0x60] ss:$8 sps:$4 sm:$0xff]   ;;  %v10886_v18 = vld [vmem:[%s11306_s11 + $0x74] ss:$8 sps:$4 sm:$0xff]  }
 0xaff   : > { %v9227_v12 = vrot.slane %v9220_v48, %v14123_v62  ;;  %v9235_v56 = vrot.slane %v10302_v41, %v14123_v62  ;;  %v9236_v52 = vcombine.low %v9211_v44, %v9219_v4  ;;  %v10892_v34 = vld [vmem:[%s11317_s10 + $0x10] sm:$0xff]   ;;  %v10893_v44 = vld [vmem:[%s11317_s10 + $0x58] sm:$0xff]   ;;  %v10895_v41 = vld [vmem:[%s11317_s10 + $0x60] sm:$0xff]  }
 0xb00   : > { %v9202_v51 = vcombine.low %v9193_v22, %v9201_v16  ;;  %v9203_v33 = vcombine.high %v9193_v22, %v9201_v16  ;;  %9534 = vmatpush1.bf16.msra.mxu1 %v10869_v23  ;;  %v10884_v4 = vld [vmem:[%s11306_s11 + $0x70] ss:$8 sps:$4 sm:$0xff]   ;;  %v10896_v22 = vld [vmem:[%s11317_s10 + $0x20] sm:$0xff]   ;;  %v10897_v16 = vld [vmem:[%s11317_s10 + $0x68] sm:$0xff]  }
 0xb01   : > { %v9244_v37 = vcombine.low %v9227_v12, %v9235_v56  ;;  %v9243_v61 = vrot.slane %v9236_v52, %v11584_v53  ;;  %9535 = vmatprep.subr.bf16.mxu1 %v10874_v15  ;;  %v10894_v48 = vld [vmem:[%s11317_s10 + $0x18] sm:$0xff]  }
 0xb03   : > { %v9251_v46 = vrot.slane %v9244_v37, %v11584_v53  ;;  %v10303_v53 = vld [vmem:[%s14265_s6] ss:$0 sm:$0xff] }
 0xb04   : > { %9536 = vmatpush1.bf16.msra.mxu1 %v10872_v21  ;;  %v10330_v21 = vld [vmem:[%s994_s23] ss:$0 sm:$0xff] }
 0xb05   : > { %v9253_v26 = vcombine.high %v9243_v61, %v9251_v46  ;;  %v9252_v8 = vcombine.low %v9243_v61, %v9251_v46  ;;  %9537 = vmatprep.subr.bf16.mxu1 %v10877_v59 }
 0xb07   : > { %v10818_v43 = vpack.i.bf16 %v9253_v26, %v9203_v33  ;;  %v10312_v33 = vld [vmem:[%s14267_s28] ss:$0 sm:$0xff] }
 0xb08   : > { %9538 = vmatpush1.bf16.msra.mxu1 %v10875_v1 }
 0xb09   : > { %10819 = vrot.lane.b32.xlu0 %v10818_v43, %s11039_s29  ;;  %9539 = vmatprep.subr.bf16.mxu1 %v10880_v36  ;;  %s14275_s29 = sld [smem:[#allocation9_spill]] }
 0xb0c   : > { %9540 = vmatpush1.bf16.msra.mxu1 %v10878_v63 }
 0xb0d   : > { %9541 = vmatprep.subr.bf16.mxu1 %v10883_v19 }
 0xb0f   : > { %p10349_p1 = scmp.ge.s32.totalorder %s14275_s29, 1 }
 0xb10   : > { %9542 = vmatpush1.bf16.msra.mxu1 %v10881_v45 }
 0xb11   : > { %9543 = vmatprep.subr.bf16.mxu1 %v10886_v18 }
 0xb14   : > { %9544 = vmatpush1.bf16.msra.mxu1 %v10884_v4 }
 0xb7b   : > { %v10820_v0 = vpop.permute.xlu0 %10819 }
 0xb7c   : > { %v10822_v17 = vunpack.i.h.bf16 %v10820_v0  ;;  %v10821_v25 = vunpack.i.l.bf16 %v10820_v0  ;;  %v10313_v0 = vld [vmem:[%s14269_s17] ss:$0 sm:$0xff] }
 0xb7e   : > { %v9262_v62 = vsel %vm5606_vm6, %v9202_v51, %v10821_v25  ;;  %v9263_v3 = vsel %vm5606_vm6, %v9252_v8, %v10822_v17 }
 0xb7f   : > { %v9264_v60 = vpack.c.bf16 %v9263_v3, %v9262_v62 }
 0xb81   : > { %10669 = vmatmul.mubr.bf16.vlgmr.msra.gmra.mrb[12].mxu0 %v9264_v60  ;;  %v10898_v60 = vld [vmem:[%s11317_s10 + $0x28] sm:$0xff]  }
 0xb82   : > { %10454 = vmatpush3.bf16.msra.mxu0 %v10888_v57 }
 0xb83   : > { %10455 = vmatprep.subr.bf16.mxu0 %v10889_v5 }
 0xb86   : > { %10456 = vmatpush3.bf16.msra.mxu0 %v10890_v6 }
 0xb87   : > { %10457 = vmatprep.subr.bf16.mxu0 %v10891_v27 }
 0xb8a   : > { %10458 = vmatpush3.bf16.msra.mxu0 %v10892_v34 }
 0xb8b   : > { %10459 = vmatprep.subr.bf16.mxu0 %v10893_v44 }
 0xb8e   : > { %10460 = vmatpush3.bf16.msra.mxu0 %v10894_v48 }
 0xb8f   : > { %10461 = vmatprep.subr.bf16.mxu0 %v10895_v41 }
 0xb92   : > { %10462 = vmatpush3.bf16.msra.mxu0 %v10896_v22 }
 0xb93   : > { %10463 = vmatprep.subr.bf16.mxu0 %v10897_v16 }
 0xb96   : > { %10464 = vmatpush3.bf16.msra.mxu0 %v10898_v60 }
 0xc54   : > { %v9370_v24 = vpop.f32.mrb[12].mxu0 }
 0xc55   : > { %v9371_v50 = vadd.f32 %v10303_v53, %v9370_v24  ;;  %v10670_v13 = vpop.f32.mrb[13].mxu0  ;;  %v10900_v24 = vld [vmem:[%s11317_s10 + $0x30] sm:$0xff]  }
 0xc56   : > { %v9373_v11 = vpop.f32.mrb[14].mxu0  ;;  %v10902_v13 = vld [vmem:[%s11317_s10 + $0x38] sm:$0xff]  }
 0xc57   : > { %v9377_v32 = vadd.f32 %v10928_v31, %v9371_v50  ;;  %v9374_v38 = vadd.f32 %v10303_v53, %v9373_v11  ;;  %v10671_v49 = vpop.f32.mrb[15].mxu0  ;;  %v10899_v53 = vld [vmem:[%s11317_s10 + $0x70] sm:$0xff]   ;;  %v10901_v50 = vld [vmem:[%s11317_s10 + $0x78] sm:$0xff]   ;;  %v9437_v11 = vld [vmem:[%s11312_s30] sm:$0x3] }
 0xc58   : > { %10465 = vmatprep.subr.bf16.mxu0 %v10899_v53  ;;  %v14270_v31 = vld [vmem:[#allocation19_spill] sm:$0xff] }
 0xc59   : > { %v9378_v2 = vadd.f32 %v10929_v7, %v9374_v38  ;;  %9381 = vadd.xlane.f32.xlu1 %v9377_v32  ;;  %10466 = vmatpush3.bf16.msra.mxu0 %v10900_v24  ;;  %v14272_v49 = vsub.s32 1, %v14270_v31 }
 0xc5a   : > { %10467 = vmatprep.subr.bf16.mxu0 %v10901_v50 }
 0xc5b   : > { %9383 = vadd.xlane.f32.xlu0 %v9378_v2  ;;  %v9446_v7 = vrot.slane %v9437_v11, %v14272_v49 }
 0xc5d   : > { %10468 = vmatpush3.bf16.msra.mxu0 %v10902_v13 }
 0xce6   : > { %v9382_v9 = vpop.xlane.xlu1 %9381 }
 0xce7   : > { %v9386_v10 = vmul.f32 0.0078125, %v9382_v9 }
 0xce8   : > { %v9384_v14 = vpop.xlane.xlu0 %9383 }
 0xce9   : > { %v9388_v28 = vsub.f32 %v9377_v32, %v9386_v10  ;;  %v9387_v20 = vmul.f32 0.0078125, %v9384_v14  ;;  %v14271_v32 = vsub.s32 0, %v14270_v31 }
 0xceb   : > { %v13722_v35 = vsub.f32 %v9378_v2, %v9387_v20  ;;  %v9390_v42 = vmul.f32 %v9388_v28, %v9388_v28  ;;  %v9442_v38 = vrot.slane %v9437_v11, %v14271_v32 }
 0xced   : > { %9392 = vadd.xlane.f32.xlu1 %v9390_v42  ;;  %v9391_v54 = vmul.f32 %v13722_v35, %v13722_v35 }
 0xcf1   : > { %9394 = vadd.xlane.f32.xlu1 %v9391_v54 }
 0xd7a   : > { %v9393_v12 = vpop.xlane.xlu1 %9392 }
 0xd7b   : > { %v9396_v56 = vmul.f32 0.0078125, %v9393_v12 }
 0xd7d   : > { %v9398_v52 = vadd.f32 1e-05, %v9396_v56 }
 0xd7e   : > { %v9395_v29 = vpop.xlane.xlu1 %9394 }
 0xd7f   : > { %10919 = vrsqrt.f32 %v9398_v52  ;;  %v9397_v51 = vmul.f32 0.0078125, %v9395_v29 }
 0xd81   : > { %v9399_v37 = vadd.f32 1e-05, %v9397_v51  ;;  %v10347_v51 = vld [vmem:[%s997_s27] ss:$0 sm:$0xff] }
 0xd83   : > { %10921 = vrsqrt.f32 %v9399_v37 }
 0xd89   : > { %v10920_v61 = vpop.eup %10919 }
 0xd8a   : > { %v9402_v46 = vmul.f32 %v10920_v61, %v9388_v28  ;;  %v10348_v61 = vld [vmem:[%s1000_s15] ss:$0 sm:$0xff] }
 0xd8c   : > { %v9410_v8 = vmul.f32 %v10312_v33, %v9402_v46 }
 0xd8d   : > { %v10922_v26 = vpop.eup %10921 }
 0xd8e   : > { %v9403_v43 = vmul.f32 %v10922_v26, %v13722_v35  ;;  %v9418_v25 = vadd.f32 %v10313_v0, %v9410_v8 }
 0xd90   : > { %v9411_v17 = vmul.f32 %v10312_v33, %v9403_v43 }
 0xd92   : > { %v9419_v62 = vadd.f32 %v10313_v0, %v9411_v17 }
 0xd94   : > { %v9420_v3 = vpack.c.bf16 %v9419_v62, %v9418_v25 }
 0xd96   : > { %9562 = vmatmul.mubr.bf16.vlgmr.msra.gmra.mrb[20].mxu1 %v9420_v3 }
 0xe69   : > { %v9563_v2 = vpop.f32.mrb[20].mxu1 }
 0xe6a   : > { %v9564_v30 = vadd.f32 %v9563_v2, %v9442_v38  ;;  %v9565_v47 = vpop.f32.mrb[21].mxu1 }
 0xe6b   : > { %v9566_v39 = vadd.f32 %v9565_v47, %v9446_v7  ;;  %v9567_v40 = vpop.f32.mrb[22].mxu1 }
 0xe6c   : > { %v9568_v9 = vadd.f32 %v9567_v40, %v9442_v38  ;;  %v9569_v10 = vpop.f32.mrb[23].mxu1  ;;  %v9572_v28 = vmax.f32 %v9564_v30, 0.0 }
 0xe6d   : > { %v9570_v14 = vadd.f32 %v9569_v10, %v9446_v7  ;;  %v9573_v35 = vmax.f32 %v9566_v39, 0.0 }
 0xe6e   : > { %v9574_v20 = vmax.f32 %v9568_v9, 0.0 }
 0xe6f   : > { %v9575_v42 = vmax.f32 %v9570_v14, 0.0 }
 0xe70   : > { %v9576_v54 = vpack.c.bf16 %v9574_v20, %v9572_v28 }
 0xe71   : > { %v9577_v23 = vpack.c.bf16 %v9575_v42, %v9573_v35 }
 0xe73   : > { %9745 = vmatprep.mubr.bf16.mxu0 %v9577_v23 }
 0xe74   : > { %9746 = vmatmul.mubr.bf16.vlgmr.msra.gmra.mrb[16].mxu0 %v9576_v54 }
 0xf47   : > { %v10469_v58 = vpop.f32.mrb[16].mxu0 }
 0xf48   : > { %v10470_v15 = vpop.f32.mrb[17].mxu0 }
 0xf49   : > { %v10471_v59 = vadd.f32 %v10470_v15, %v10469_v58  ;;  %v10472_v1 = vpop.f32.mrb[18].mxu0 }
 0xf4a   : > { %v10473_v36 = vpop.f32.mrb[19].mxu0 }
 0xf4b   : > { %v9748_v55 = vadd.f32 %v10471_v59, %v10330_v21  ;;  %v10474_v57 = vadd.f32 %v10473_v36, %v10472_v1 }
 0xf4d   : > { %v9751_v5 = vadd.f32 %v10474_v57, %v10330_v21  ;;  %v9754_v63 = vadd.f32 %v9748_v55, %v9418_v25 }
 0xf4f   : > { %9758 = vadd.xlane.f32.xlu1 %v9754_v63  ;;  %v9755_v19 = vadd.f32 %v9751_v5, %v9419_v62 }
 0xf53   : > { %9760 = vadd.xlane.f32.xlu1 %v9755_v19 }
 0xfdc   : > { %v9759_v6 = vpop.xlane.xlu1 %9758 }
 0xfdd   : > { %v9762_v27 = vmul.f32 0.0078125, %v9759_v6 }
 0xfdf   : > { %v9764_v45 = vsub.f32 %v9754_v63, %v9762_v27 }
 0xfe0   : > { %v9761_v18 = vpop.xlane.xlu1 %9760 }
 0xfe1   : > { %v9763_v34 = vmul.f32 0.0078125, %v9761_v18  ;;  %v9766_v44 = vmul.f32 %v9764_v45, %v9764_v45 }
 0xfe3   : > { %v9765_v4 = vsub.f32 %v9755_v19, %v9763_v34  ;;  %9768 = vadd.xlane.f32.xlu1 %v9766_v44 }
 0xfe5   : > { %v9767_v48 = vmul.f32 %v9765_v4, %v9765_v4 }
 0xfe7   : > { %9770 = vadd.xlane.f32.xlu1 %v9767_v48 }
0x1070   : > { %v9769_v41 = vpop.xlane.xlu1 %9768 }
0x1071   : > { %v9772_v22 = vmul.f32 0.0078125, %v9769_v41 }
0x1073   : > { %v9774_v16 = vadd.f32 1e-05, %v9772_v22 }
0x1074   : > { %v9771_v12 = vpop.xlane.xlu1 %9770 }
0x1075   : > { %10923 = vrsqrt.f32 %v9774_v16  ;;  %v9773_v56 = vmul.f32 0.0078125, %v9771_v12 }
0x1077   : > { %v9775_v52 = vadd.f32 1e-05, %v9773_v56 }
0x1079   : > { %10925 = vrsqrt.f32 %v9775_v52 }
0x107f   : > { %v10924_v29 = vpop.eup %10923 }
0x1080   : > { %v9778_v37 = vmul.f32 %v10924_v29, %v9764_v45 }
0x1082   : > { %v9786_v46 = vmul.f32 %v10347_v51, %v9778_v37  ;;  %9799 = sbr.rel (%p10349_p1) target bundleno = 4235 (0x108b), region = 128 }
0x1083   : > { %v10926_v33 = vpop.eup %10925 }
0x1084   : > { %v9794_v26 = vadd.f32 %v10348_v61, %v9786_v46  ;;  %v9779_v8 = vmul.f32 %v10926_v33, %v9765_v4 }
0x1086   : > { %v9787_v43 = vmul.f32 %v10347_v51, %v9779_v8  ;;  %9800 = vst [vmem:[#allocation2] sm:$0xff] (!%p10349_p1), %v9794_v26 }
0x1088   : > { %v9795_v0 = vadd.f32 %v10348_v61, %v9787_v43 }
0x108a   : > { %9801 = vst [vmem:[#allocation2 + $0x8] sm:$0xff] %v9795_v0 }
0x108b PF: > { %s14276_s7 = sld [smem:[#allocation9_spill]] }
0x1091   : > { %p10350_p2 = scmp.ne.s32.totalorder %s14276_s7, 1 }
0x1092   : > { %s14277_s6 = sld [smem:[#allocation75_spill]] (!%p10350_p2)  ;;  %v11043_v25 = vmov (!%p10350_p2), 0.0   ;;  %vm11044_vm8 = vmmov (!%p10350_p2), 0   ;;  %v9806_v11 = vpack.c.bf16 (!%p10350_p2), %v9795_v0, %v9794_v26  ;;  %s14279_s22 = sld [smem:[#allocation76_spill]] (!%p10350_p2) }
0x1093   : > { %9805 = sbr.rel (%p10350_p2) target bundleno = 4497 (0x1191), region = 132  ;;  %10672 = vmatprep.subr.bf16.mxu0 (!%p10350_p2), %v11043_v25  ;;  %10688 = vmatprep.mubr.msk.bf16.mxu0 (!%p10350_p2), %vm11044_vm8, %v11043_v25 }
0x1098   : > { %s14278_s11 = smov (!%p10350_p2), %s14277_s6  ;;  %v10930_v17 = vld [vmem:[%s14277_s6] sm:$0xff] (!%p10350_p2)  }
0x1099   : > { %10673 = vmatpush3.bf16.msra.mxu0 (!%p10350_p2), %v10930_v17  ;;  %v10931_v62 = vld [vmem:[%s14278_s11 + $0x8] sm:$0xff] (!%p10350_p2)   ;;  %v10932_v3 = vld [vmem:[%s14278_s11 + $0x10] sm:$0xff] (!%p10350_p2)   ;;  %v10933_v60 = vld [vmem:[%s14278_s11 + $0x18] sm:$0xff] (!%p10350_p2)  }
0x109a   : > { %10674 = vmatprep.subr.bf16.mxu0 %v11043_v25  ;;  %v10934_v53 = vld [vmem:[%s14278_s11 + $0x20] sm:$0xff]   ;;  %v10935_v24 = vld [vmem:[%s14278_s11 + $0x28] sm:$0xff]   ;;  %v10936_v50 = vld [vmem:[%s14278_s11 + $0x30] sm:$0xff]  }
0x109b   : > { %v10937_v13 = vld [vmem:[%s14278_s11 + $0x38] sm:$0xff]   ;;  %v10351_v31 = vld [vmem:[%s14279_s22] ss:$0 sm:$0xff] }
0x109d   : > { %10675 = vmatpush3.bf16.msra.mxu0 %v10931_v62 }
0x109e   : > { %10676 = vmatprep.subr.bf16.mxu0 %v11043_v25 }
0x10a1   : > { %10677 = vmatpush3.bf16.msra.mxu0 %v10932_v3 }
0x10a2   : > { %10678 = vmatprep.subr.bf16.mxu0 %v11043_v25 }
0x10a5   : > { %10679 = vmatpush3.bf16.msra.mxu0 %v10933_v60 }
0x10a6   : > { %10680 = vmatprep.subr.bf16.mxu0 %v11043_v25 }
0x10a9   : > { %10681 = vmatpush3.bf16.msra.mxu0 %v10934_v53 }
0x10aa   : > { %10682 = vmatprep.subr.bf16.mxu0 %v11043_v25 }
0x10ad   : > { %10683 = vmatpush3.bf16.msra.mxu0 %v10935_v24 }
0x10ae   : > { %10684 = vmatprep.subr.bf16.mxu0 %v11043_v25 }
0x10b1   : > { %10685 = vmatpush3.bf16.msra.mxu0 %v10936_v50 }
0x10b2   : > { %10686 = vmatprep.subr.bf16.mxu0 %v11043_v25 }
0x10b5   : > { %10687 = vmatpush3.bf16.msra.mxu0 %v10937_v13 }
0x10b8   : > { %10689 = vmatmul.mubr.bf16.vlgmr.msra.gmra.mrb[0].mxu0 %v9806_v11 }
0x118b   : > { %v9912_v32 = vpop.f32.mrb[0].mxu0 }
0x118c   : > { %v9913_v38 = vadd.f32 %v10351_v31, %v9912_v32  ;;  %v10690_v49 = vpop.f32.mrb[1].mxu0 }
0x118d   : > { %v9915_v7 = vpop.f32.mrb[2].mxu0 }
0x118e   : > { %9919 = vst [vmem:[%s11331_s2] sm:$0xff] %v9913_v38  ;;  %v9916_v2 = vadd.f32 %v10351_v31, %v9915_v7  ;;  %v10691_v30 = vpop.f32.mrb[3].mxu0 }
0x1190   : > { %9920 = vst [vmem:[%s11331_s2 + $0x8] sm:$0xff] %v9916_v2 }
0x1191 PF: > { %s14280_s29 = sld [smem:[#allocation10_spill]]  ;;  %s14281_s7 = sld [smem:[#allocation7_spill]] }
0x1192   : > { %s14283_s0 = sld [smem:[#allocation77_spill]]  ;;  %s9935_s5 = sshll.u32 %s11331_s2, 4  ;;  %s13823_s5 = int_to_ptr.vmem [resolvable:$true] %s9935_s5 }
0x1193   : > { %s10938_s12 = scalar_lea.vmem %s13823_s5, 256  ;;  %s11045_s16 = smov [#allocation3]  }
0x1194   : > { %p10939_p4 = scmp.ne.s32.totalorder %s13823_s5, %s10938_s12  ;;  %s10942_s17 = sshll.u32 %s11045_s16, 4  ;;  %s10943_s17 = int_to_ptr.vmem [resolvable:$false] %s10942_s17 }
0x1195   : > { %s10944_s30 = scalar_lea.vmem %s10943_s17, 512  ;;  %p10945_p7 = scmp.lt.s32.totalorder %s13823_s5, %s10943_s17 }
0x1196   : > { %p10940_p5 = pnand %p10939_p4, %p11227_p3  ;;  %p10946_p8 = scmp.lt.s32.totalorder %s10944_s30, %s10938_s12 }
0x1197   : > { %s10369_s26 = sshll.u32 %s14280_s29, 8  ;;  %s14284_s28 = sand.u32 1, %s14281_s7  }
0x1198   : > { %s13820_s1 = scalar_lea.hbm %s14283_s0, %s10369_s26  ;;  %s13827_s13 = scalar_lea.sflag [#allocation4], %s14284_s28 }
0x1199   : > { %p10941_p6 = pneg %p10940_p5  ;;  %p10947_p10 = por %p10946_p8, %p10945_p7 }
0x119b   : > { %p10948_p11 = pnand %p10947_p10, %p10941_p6 }
0x119d   : > { %10951 = shalt.err (!%p10948_p11)
}
0x119e   : > { %s10952_s2 = scalar_lea.hbm %s13820_s1, 256  ;;  %s10956_s3 = scalar_lea.hbm %s14283_s0, 512 }
0x119f   : > { %p10953_p12 = scmp.ne.s32.totalorder %s13820_s1, %s10952_s2  ;;  %p10957_p1 = scmp.lt.u32.totalorder %s13820_s1, %s14283_s0 }
0x11a0   : > { %p10958_p2 = scmp.lt.u32.totalorder %s10956_s3, %s10952_s2  ;;  %p10960_p5 = scmp.lt.u32.totalorder %s10952_s2, %s13820_s1 }
0x11a1   : > { %p10954_p13 = pnand %p10953_p12, %p11227_p3 }
0x11a2   : > { %p10959_p4 = por %p10958_p2, %p10957_p1 }
0x11a3   : > { %p10955_p0 = pneg %p10954_p13 }
0x11a4   : > { %p10961_p6 = por %p10960_p5, %p10959_p4 }
0x11a6   : > { %p10962_p7 = pnand %p10961_p6, %p10955_p0 }
0x11a8   : > { %10965 = shalt.err (!%p10962_p7)
}
0x11a9   : > { %s11046_s25 = smov 128   ;;  %s11047_s22 = smov 8  }
0x11aa   : > { %10696 = dma.vmem_to_hbm [thread:$0]  (%p11227_p3), %s13823_s5, 256, %s13820_s1, %s13827_s13, %s11046_s25, %s11046_s25, %s11047_s22  }
0x11ab PF: > { %s14285_s29 = sld [smem:[#allocation13_spill]]  ;;  %s14286_s7 = sld [smem:[#allocation6_spill]] }
0x11b1   : > { %p10702_p8 = scmp.ge.s32.totalorder %s14285_s29, 2  ;;  %s9950_s6 = sand.u32 1, %s14286_s7  }
0x11b2   : > { %s9951_s15 = scalar_lea.sflag [#allocation4], %s9950_s6 }
0x11b3   : > { %p10699_p10 = pnand %p10702_p8, %p11237_p9 }
0x11b5   : > { %10999 = dma.done.wait (!%p10699_p10), %s9951_s15, 256  }
0x11b6   : > { %11001 = vsyncadd (!%p10699_p10), %s9951_s15, 4294967040  ;;  %s38_s1 = sadd.s32 1, %s14285_s29   ;;  %s14288_s29 = sld [smem:[#allocation7_spill]] }
0x11b7   : > { %p35_p11 = scmp.ge.s32.totalorder %s38_s1, 6   ;;  %s14289_s2 = sld [smem:[#allocation8_spill]] }
0x11b8   : > { %s14290_s6 = sld [smem:[#allocation18_spill]]  ;;  %s14291_s30 = sld [smem:[#allocation11_spill]] }
0x11b9   : > { %s14292_s7 = sld [smem:[#allocation12_spill]]  ;;  %s14293_s3 = sld [smem:[#allocation14_spill]] }
0x11ba   : > { %s14294_s26 = sld [smem:[#allocation16_spill]]  ;;  %37 = sbr.rel (!%p35_p11) target bundleno = 28 (0x1c), region = 213 }
0x11c1   :  { %9956 = vsyncpa [#allocation4], 1 }
0x11c2   :  { %9958 = vsyncpa [#allocation4 + $0x1], 1 }

</bundles_post_ra>
